<compile_context>
chip_gen: v7x
topology: tpu7x:2x2x1
jax: 0.10.0
libtpu: 0.0.40
codegen_flags: <defaults>
</compile_context>

<pallas_src>
import functools

import jax
import jax.numpy as jnp
import numpy as np
from jax import lax
from jax.experimental import pallas as pl
from jax.experimental.pallas import tpu as pltpu


def _round_up(x, m):
    return (x + m - 1) // m * m


# ---------------------------------------------------------------------------
# Pallas kernel 1: whole-K matmul with fused bias (+ ReLU), direct output write
# ---------------------------------------------------------------------------
def _mm_bias_kernel(a_ref, b_ref, bias_ref, o_ref, *, relu):
    acc = jnp.dot(a_ref[...], b_ref[...], preferred_element_type=jnp.float32)
    acc = acc + bias_ref[...]                      # bias: (1, N), broadcasts over rows
    if relu:
        acc = jnp.maximum(acc, 0.0)
    o_ref[...] = acc.astype(o_ref.dtype)


def matmul_bias_act(a, b, bias, *, relu, out_dtype, block_m=1024):
    """y = a @ b + bias (optional ReLU) with a whole-K Pallas matmul.

    a: (M, K) bf16, b: (K, N) bf16, bias: (1, N) f32 -> (M, N) out_dtype.
    K and N are used at full extent (no padding); M is rounded up to a sublane
    multiple (8) and, for very large M, tiled by `block_m`.
    """
    M, K = a.shape
    Kb, N = b.shape
    assert K == Kb and bias.shape == (1, N)

    Mp = _round_up(M, 8)
    if Mp > block_m:
        tm = block_m
        Mp = _round_up(M, block_m)
    else:
        tm = Mp
    if Mp != M:
        a = jnp.pad(a, ((0, Mp - M), (0, 0)))      # zero rows -> zero contribution

    grid = (Mp // tm,)
    out = pl.pallas_call(
        functools.partial(_mm_bias_kernel, relu=relu),
        out_shape=jax.ShapeDtypeStruct((Mp, N), out_dtype),
        grid_spec=pltpu.PrefetchScalarGridSpec(
            num_scalar_prefetch=0,
            grid=grid,
            in_specs=[
                pl.BlockSpec((tm, K), lambda i: (i, 0)),
                pl.BlockSpec((K, N), lambda i: (0, 0)),
                pl.BlockSpec((1, N), lambda i: (0, 0)),
            ],
            out_specs=pl.BlockSpec((tm, N), lambda i: (i, 0)),
        ),
        compiler_params=pltpu.CompilerParams(
            dimension_semantics=("parallel",)),
    )(a, b, bias)

    return out if Mp == M else out[:M]


# ---------------------------------------------------------------------------
# Pallas kernel 2: fused FC head  (fc1 -> ReLU -> fc2), whole problem in VMEM
# ---------------------------------------------------------------------------
def _mlp_head_kernel(h_ref, w4_ref, b4_ref, w5_ref, b5_ref, o_ref):
    hid = jnp.dot(h_ref[...], w4_ref[...], preferred_element_type=jnp.float32)
    hid = jnp.maximum(hid + b4_ref[...], 0.0)
    out = jnp.dot(hid.astype(w5_ref.dtype), w5_ref[...],
                  preferred_element_type=jnp.float32)
    o_ref[...] = (out + b5_ref[...]).astype(o_ref.dtype)


def mlp_head(h, w4, b4, w5, b5):
    """q = relu(h @ w4 + b4) @ w5 + b5 in a single pallas_call.

    h: (B, 3136) bf16, w4: (3136, F) bf16, w5: (F, N) bf16, biases f32.
    """
    B, K = h.shape
    F = w4.shape[1]
    N = w5.shape[1]
    Bp = _round_up(B, 8)
    if Bp != B:
        h = jnp.pad(h, ((0, Bp - B), (0, 0)))

    out = pl.pallas_call(
        _mlp_head_kernel,
        out_shape=jax.ShapeDtypeStruct((Bp, N), jnp.float32),
        grid_spec=pltpu.PrefetchScalarGridSpec(
            num_scalar_prefetch=0,
            grid=(1,),
            in_specs=[
                pl.BlockSpec((Bp, K), lambda i: (0, 0)),
                pl.BlockSpec((K, F), lambda i: (0, 0)),
                pl.BlockSpec((1, F), lambda i: (0, 0)),
                pl.BlockSpec((F, N), lambda i: (0, 0)),
                pl.BlockSpec((1, N), lambda i: (0, 0)),
            ],
            out_specs=pl.BlockSpec((Bp, N), lambda i: (0, 0)),
        ),
        compiler_params=pltpu.CompilerParams(
            dimension_semantics=("arbitrary",)),
    )(h, w4, b4, w5, b5)

    return out if Bp == B else out[:B]


# ---------------------------------------------------------------------------
# Conv2d (valid, square kernel) via strided-slice im2col (NHWC) + Pallas matmul
# ---------------------------------------------------------------------------
def conv2d_relu_nhwc(x, w_mat, bias, kernel, stride):
    """x: (B, H, W, C) bf16, w_mat: (k*k*C, OC) bf16, bias: (1, OC) f32."""
    B, H, W, C = x.shape
    OH = (H - kernel) // stride + 1
    OW = (W - kernel) // stride + 1

    chunks = []
    for ki in range(kernel):
        for kj in range(kernel):
            chunks.append(
                x[:, ki:ki + (OH - 1) * stride + 1:stride,
                     kj:kj + (OW - 1) * stride + 1:stride, :])
    # (B, OH, OW, k*k*C) with flatten order (ki, kj, c) — matches prepared weights.
    patches = jnp.concatenate(chunks, axis=-1).reshape(B * OH * OW, kernel * kernel * C)

    y = matmul_bias_act(patches, w_mat, bias, relu=True, out_dtype=jnp.bfloat16)
    return y.reshape(B, OH, OW, w_mat.shape[1])


# ---------------------------------------------------------------------------
# Parameter initialization (deterministic, mirrors the PyTorch __init__)
# ---------------------------------------------------------------------------
def _xavier_uniform(key, shape, fan_in, fan_out, gain):
    bound = gain * float(np.sqrt(6.0 / (fan_in + fan_out)))
    return jax.random.uniform(key, shape, jnp.float32, -bound, bound)


def _torch_default_bias(key, n_out, fan_in):
    bound = 1.0 / float(np.sqrt(fan_in))
    return jax.random.uniform(key, (n_out,), jnp.float32, -bound, bound)


def init_params(key, n_input, n_output, n_features=512):
    gain_relu = float(np.sqrt(2.0))   # calculate_gain('relu')
    gain_lin = 1.0                    # calculate_gain('linear')
    ks = jax.random.split(key, 10)

    def conv_p(kw_, kb_, oc, ic, k, gain):
        fan_in, fan_out = ic * k * k, oc * k * k
        return (_xavier_uniform(kw_, (oc, ic, k, k), fan_in, fan_out, gain),
                _torch_default_bias(kb_, oc, fan_in))

    def lin_p(kw_, kb_, out_f, in_f, gain):
        return (_xavier_uniform(kw_, (out_f, in_f), in_f, out_f, gain),
                _torch_default_bias(kb_, out_f, in_f))

    p = {}
    p["h1_w"], p["h1_b"] = conv_p(ks[0], ks[1], 32, n_input, 8, gain_relu)
    p["h2_w"], p["h2_b"] = conv_p(ks[2], ks[3], 64, 32, 4, gain_relu)
    p["h3_w"], p["h3_b"] = conv_p(ks[4], ks[5], 64, 64, 3, gain_relu)
    p["h4_w"], p["h4_b"] = lin_p(ks[6], ks[7], n_features, 3136, gain_relu)
    p["h5_w"], p["h5_b"] = lin_p(ks[8], ks[9], n_output, n_features, gain_lin)
    return p


# ---------------------------------------------------------------------------
# One-time parameter preparation (transpose / permute / pad-free / bf16 cast)
# ---------------------------------------------------------------------------
def _conv_weight_matrix(w):
    """(OC, IC, kh, kw) torch layout -> (kh*kw*IC, OC), flatten order (ki, kj, c)."""
    OC, IC, kh, kw = w.shape
    return w.transpose(2, 3, 1, 0).reshape(kh * kw * IC, OC)


def prepare_params(params, dtype=jnp.bfloat16):
    prep = {}
    # Fold the 1/255 input scale into conv1 weights (inputs fed as raw 0..255).
    prep["w1"] = (_conv_weight_matrix(params["h1_w"]) / 255.0).astype(dtype)
    prep["b1"] = params["h1_b"].astype(jnp.float32).reshape(1, -1)
    prep["w2"] = _conv_weight_matrix(params["h2_w"]).astype(dtype)
    prep["b2"] = params["h2_b"].astype(jnp.float32).reshape(1, -1)
    prep["w3"] = _conv_weight_matrix(params["h3_w"]).astype(dtype)
    prep["b3"] = params["h3_b"].astype(jnp.float32).reshape(1, -1)
    # fc1 weight: permute columns from PyTorch's (C,H,W) flatten to NHWC (H,W,C) flatten.
    w4 = params["h4_w"]                                   # (512, 3136)
    nf = w4.shape[0]
    w4 = w4.reshape(nf, 64, 7, 7).transpose(0, 2, 3, 1).reshape(nf, 3136).T
    prep["w4"] = w4.astype(dtype)                         # (3136, 512)
    prep["b4"] = params["h4_b"].astype(jnp.float32).reshape(1, -1)
    prep["w5"] = params["h5_w"].T.astype(dtype)           # (512, n_out)
    prep["b5"] = params["h5_b"].astype(jnp.float32).reshape(1, -1)
    return prep


# ---------------------------------------------------------------------------
# Network.forward
# ---------------------------------------------------------------------------
def network_forward(prep, state, action=None):
    """state: (B, 4, 84, 84) uint8 (NCHW, like PyTorch); returns q: (B, n_out) f32."""
    B = state.shape[0]
    # uint8 -> bf16 is exact (0..255); the /255 scale lives in prep["w1"].
    x = state.astype(jnp.bfloat16).transpose(0, 2, 3, 1)               # (B, 84, 84, 4) NHWC

    x = conv2d_relu_nhwc(x, prep["w1"], prep["b1"], kernel=8, stride=4)  # (B, 20, 20, 32)
    x = conv2d_relu_nhwc(x, prep["w2"], prep["b2"], kernel=4, stride=2)  # (B,  9,  9, 64)
    x = conv2d_relu_nhwc(x, prep["w3"], prep["b3"], kernel=3, stride=1)  # (B,  7,  7, 64)

    h = x.reshape(B, 3136)                    # NHWC flatten; prep["w4"] is permuted to match
    q = mlp_head(h, prep["w4"], prep["b4"], prep["w5"], prep["b5"])      # (B, n_out) f32

    if action is None:
        return q
    # q.gather(1, action).squeeze()
    return jnp.squeeze(jnp.take_along_axis(q, action.astype(jnp.int32), axis=1))


# ---------------------------------------------------------------------------
# Pure-JAX (XLA, f32) reference for a numerical sanity check
# ---------------------------------------------------------------------------
def reference_forward(params, state):
    x = state.astype(jnp.float32) / 255.0

    def conv(x, w, b, s):
        y = lax.conv_general_dilated(x, w, (s, s), "VALID",
                                     dimension_numbers=("NCHW", "OIHW", "NCHW"))
        return jax.nn.relu(y + b[None, :, None, None])

    h = conv(x, params["h1_w"], params["h1_b"], 4)
    h = conv(h, params["h2_w"], params["h2_b"], 2)
    h = conv(h, params["h3_w"], params["h3_b"], 1)
    h = h.reshape(-1, 3136)
    h = jax.nn.relu(h @ params["h4_w"].T + params["h4_b"])
    return h @ params["h5_w"].T + params["h5_b"]


if __name__ == "__main__":
    key = jax.random.PRNGKey(0)
    k_param, k_state = jax.random.split(key)

    batch = 2
    n_output = 6               # e.g. Atari action count
    input_shape = (4, 84, 84)  # the hard-coded view(-1, 3136) implies 84x84 inputs

    params = init_params(k_param, n_input=input_shape[0], n_output=n_output)
    prep = jax.tree_util.tree_map(jnp.asarray, prepare_params(params))

    state = jax.random.randint(k_state, (batch,) + input_shape, 0, 256,
                               dtype=jnp.int32).astype(jnp.uint8)

    fwd = jax.jit(network_forward)
    q = jax.block_until_ready(fwd(prep, state))
    assert q.shape == (batch, n_output) and q.dtype == jnp.float32

    # Check against the f32 XLA reference (bf16 MXU inputs -> slightly looser tolerance).
    q_ref = jax.block_until_ready(reference_forward(params, state))
    np.testing.assert_allclose(np.asarray(q), np.asarray(q_ref), rtol=4e-2, atol=4e-2)

    # action path (q.gather(1, action).squeeze())
    action = jnp.array([[1], [3]], dtype=jnp.int32)
    q_acted = jax.block_until_ready(network_forward(prep, state, action))
    assert q_acted.shape == (batch,)
    np.testing.assert_allclose(np.asarray(q_acted),
                               np.asarray(q)[np.arange(batch), np.asarray(action)[:, 0]],
                               rtol=1e-6, atol=1e-6)

    print("KERNEL_OK")
</pallas_src>

<mosaic_0001>
module attributes {stable_mosaic.version = 11 : i64} {
  func.func @_mm_bias_kernel(%arg0: i32, %arg1: memref<800x256xbf16, #tpu.memory_space<vmem>>, %arg2: memref<256x32xbf16, #tpu.memory_space<vmem>>, %arg3: memref<1x32xf32, #tpu.memory_space<vmem>>, %arg4: memref<800x32xbf16, #tpu.memory_space<vmem>>) attributes {dimension_semantics = [#tpu.dimension_semantics<parallel>], iteration_bounds = array<i64: 1>, scalar_prefetch = 0 : i64, scratch_operands = 0 : i64, tpu.core_type = #tpu.core_type<tc>, window_params = [{transform_indices = @transform_0, window_bounds = array<i64: 800, 256>}, {pipeline_mode = #tpu.pipeline_mode<synchronous>, transform_indices = @transform_1, window_bounds = array<i64: 256, 32>}, {pipeline_mode = #tpu.pipeline_mode<synchronous>, transform_indices = @transform_2, window_bounds = array<i64: 1, 32>}, {transform_indices = @transform_3, window_bounds = array<i64: 800, 32>}]} {
    %c0 = arith.constant 0 : index
    %c0_0 = arith.constant 0 : index
    %0 = vector.load %arg1[%c0, %c0_0] : memref<800x256xbf16, #tpu.memory_space<vmem>>, vector<800x256xbf16>
    %c0_1 = arith.constant 0 : index
    %c0_2 = arith.constant 0 : index
    %1 = vector.load %arg2[%c0_1, %c0_2] : memref<256x32xbf16, #tpu.memory_space<vmem>>, vector<256x32xbf16>
    %cst = arith.constant dense<0.000000e+00> : vector<800x32xf32>
    %2 = tpu.matmul %0, %1, %cst {dimension_numbers = #tpu.dot_dimension_numbers<[1], [0], [0], [1], [0, 0, 1, 1], [], []>} : vector<800x256xbf16>, vector<256x32xbf16>, vector<800x32xf32> -> vector<800x32xf32>
    %c0_3 = arith.constant 0 : index
    %c0_4 = arith.constant 0 : index
    %3 = vector.load %arg3[%c0_3, %c0_4] : memref<1x32xf32, #tpu.memory_space<vmem>>, vector<1x32xf32>
    %4 = vector.broadcast %3 : vector<1x32xf32> to vector<800x32xf32>
    %5 = arith.addf %2, %4 : vector<800x32xf32>
    %cst_5 = arith.constant 0.000000e+00 : f32
    %6 = vector.broadcast %cst_5 : f32 to vector<800x32xf32>
    %7 = arith.maximumf %5, %6 : vector<800x32xf32>
    %8 = arith.truncf %7 : vector<800x32xf32> to vector<800x32xbf16>
    %c0_6 = arith.constant 0 : index
    %c0_7 = arith.constant 0 : index
    %9 = vector.load %arg4[%c0_6, %c0_7] : memref<800x32xbf16, #tpu.memory_space<vmem>>, vector<800x32xbf16>
    tpu.vector_store %arg4[%c0_6, %c0_7], %8 {strides = array<i32>} : memref<800x32xbf16, #tpu.memory_space<vmem>>, vector<800x32xbf16>,
    return
  }
  func.func @transform_0(%arg0: i32) -> (i32, i32) {
    %c0_i32 = arith.constant 0 : i32
    %c0_i32_0 = arith.constant 0 : i32
    return %arg0, %c0_i32 : i32, i32
  }
  func.func @transform_1(%arg0: i32) -> (i32, i32) {
    %c0_i32 = arith.constant 0 : i32
    %c0_i32_0 = arith.constant 0 : i32
    %c0_i32_1 = arith.constant 0 : i32
    return %c0_i32, %c0_i32_0 : i32, i32
  }
  func.func @transform_2(%arg0: i32) -> (i32, i32) {
    %c0_i32 = arith.constant 0 : i32
    %c0_i32_0 = arith.constant 0 : i32
    %c0_i32_1 = arith.constant 0 : i32
    return %c0_i32, %c0_i32_0 : i32, i32
  }
  func.func @transform_3(%arg0: i32) -> (i32, i32) {
    %c0_i32 = arith.constant 0 : i32
    %c0_i32_0 = arith.constant 0 : i32
    return %arg0, %c0_i32 : i32, i32
  }
}

module attributes {stable_mosaic.version = 11 : i64} {
  func.func @_mm_bias_kernel(%arg0: i32, %arg1: memref<168x512xbf16, #tpu.memory_space<vmem>>, %arg2: memref<512x64xbf16, #tpu.memory_space<vmem>>, %arg3: memref<1x64xf32, #tpu.memory_space<vmem>>, %arg4: memref<168x64xbf16, #tpu.memory_space<vmem>>) attributes {dimension_semantics = [#tpu.dimension_semantics<parallel>], iteration_bounds = array<i64: 1>, scalar_prefetch = 0 : i64, scratch_operands = 0 : i64, tpu.core_type = #tpu.core_type<tc>, window_params = [{transform_indices = @transform_0, window_bounds = array<i64: 168, 512>}, {pipeline_mode = #tpu.pipeline_mode<synchronous>, transform_indices = @transform_1, window_bounds = array<i64: 512, 64>}, {pipeline_mode = #tpu.pipeline_mode<synchronous>, transform_indices = @transform_2, window_bounds = array<i64: 1, 64>}, {transform_indices = @transform_3, window_bounds = array<i64: 168, 64>}]} {
    %c0 = arith.constant 0 : index
    %c0_0 = arith.constant 0 : index
    %0 = vector.load %arg1[%c0, %c0_0] : memref<168x512xbf16, #tpu.memory_space<vmem>>, vector<168x512xbf16>
    %c0_1 = arith.constant 0 : index
    %c0_2 = arith.constant 0 : index
    %1 = vector.load %arg2[%c0_1, %c0_2] : memref<512x64xbf16, #tpu.memory_space<vmem>>, vector<512x64xbf16>
    %cst = arith.constant dense<0.000000e+00> : vector<168x64xf32>
    %2 = tpu.matmul %0, %1, %cst {dimension_numbers = #tpu.dot_dimension_numbers<[1], [0], [0], [1], [0, 0, 1, 1], [], []>} : vector<168x512xbf16>, vector<512x64xbf16>, vector<168x64xf32> -> vector<168x64xf32>
    %c0_3 = arith.constant 0 : index
    %c0_4 = arith.constant 0 : index
    %3 = vector.load %arg3[%c0_3, %c0_4] : memref<1x64xf32, #tpu.memory_space<vmem>>, vector<1x64xf32>
    %4 = vector.broadcast %3 : vector<1x64xf32> to vector<168x64xf32>
    %5 = arith.addf %2, %4 : vector<168x64xf32>
    %cst_5 = arith.constant 0.000000e+00 : f32
    %6 = vector.broadcast %cst_5 : f32 to vector<168x64xf32>
    %7 = arith.maximumf %5, %6 : vector<168x64xf32>
    %8 = arith.truncf %7 : vector<168x64xf32> to vector<168x64xbf16>
    %c0_6 = arith.constant 0 : index
    %c0_7 = arith.constant 0 : index
    %9 = vector.load %arg4[%c0_6, %c0_7] : memref<168x64xbf16, #tpu.memory_space<vmem>>, vector<168x64xbf16>
    tpu.vector_store %arg4[%c0_6, %c0_7], %8 {strides = array<i32>} : memref<168x64xbf16, #tpu.memory_space<vmem>>, vector<168x64xbf16>,
    return
  }
  func.func @transform_0(%arg0: i32) -> (i32, i32) {
    %c0_i32 = arith.constant 0 : i32
    %c0_i32_0 = arith.constant 0 : i32
    return %arg0, %c0_i32 : i32, i32
  }
  func.func @transform_1(%arg0: i32) -> (i32, i32) {
    %c0_i32 = arith.constant 0 : i32
    %c0_i32_0 = arith.constant 0 : i32
    %c0_i32_1 = arith.constant 0 : i32
    return %c0_i32, %c0_i32_0 : i32, i32
  }
  func.func @transform_2(%arg0: i32) -> (i32, i32) {
    %c0_i32 = arith.constant 0 : i32
    %c0_i32_0 = arith.constant 0 : i32
    %c0_i32_1 = arith.constant 0 : i32
    return %c0_i32, %c0_i32_0 : i32, i32
  }
  func.func @transform_3(%arg0: i32) -> (i32, i32) {
    %c0_i32 = arith.constant 0 : i32
    %c0_i32_0 = arith.constant 0 : i32
    return %arg0, %c0_i32 : i32, i32
  }
}

module attributes {stable_mosaic.version = 11 : i64} {
  func.func @_mm_bias_kernel(%arg0: i32, %arg1: memref<104x576xbf16, #tpu.memory_space<vmem>>, %arg2: memref<576x64xbf16, #tpu.memory_space<vmem>>, %arg3: memref<1x64xf32, #tpu.memory_space<vmem>>, %arg4: memref<104x64xbf16, #tpu.memory_space<vmem>>) attributes {dimension_semantics = [#tpu.dimension_semantics<parallel>], iteration_bounds = array<i64: 1>, scalar_prefetch = 0 : i64, scratch_operands = 0 : i64, tpu.core_type = #tpu.core_type<tc>, window_params = [{transform_indices = @transform_0, window_bounds = array<i64: 104, 576>}, {pipeline_mode = #tpu.pipeline_mode<synchronous>, transform_indices = @transform_1, window_bounds = array<i64: 576, 64>}, {pipeline_mode = #tpu.pipeline_mode<synchronous>, transform_indices = @transform_2, window_bounds = array<i64: 1, 64>}, {transform_indices = @transform_3, window_bounds = array<i64: 104, 64>}]} {
    %c0 = arith.constant 0 : index
    %c0_0 = arith.constant 0 : index
    %0 = vector.load %arg1[%c0, %c0_0] : memref<104x576xbf16, #tpu.memory_space<vmem>>, vector<104x576xbf16>
    %c0_1 = arith.constant 0 : index
    %c0_2 = arith.constant 0 : index
    %1 = vector.load %arg2[%c0_1, %c0_2] : memref<576x64xbf16, #tpu.memory_space<vmem>>, vector<576x64xbf16>
    %cst = arith.constant dense<0.000000e+00> : vector<104x64xf32>
    %2 = tpu.matmul %0, %1, %cst {dimension_numbers = #tpu.dot_dimension_numbers<[1], [0], [0], [1], [0, 0, 1, 1], [], []>} : vector<104x576xbf16>, vector<576x64xbf16>, vector<104x64xf32> -> vector<104x64xf32>
    %c0_3 = arith.constant 0 : index
    %c0_4 = arith.constant 0 : index
    %3 = vector.load %arg3[%c0_3, %c0_4] : memref<1x64xf32, #tpu.memory_space<vmem>>, vector<1x64xf32>
    %4 = vector.broadcast %3 : vector<1x64xf32> to vector<104x64xf32>
    %5 = arith.addf %2, %4 : vector<104x64xf32>
    %cst_5 = arith.constant 0.000000e+00 : f32
    %6 = vector.broadcast %cst_5 : f32 to vector<104x64xf32>
    %7 = arith.maximumf %5, %6 : vector<104x64xf32>
    %8 = arith.truncf %7 : vector<104x64xf32> to vector<104x64xbf16>
    %c0_6 = arith.constant 0 : index
    %c0_7 = arith.constant 0 : index
    %9 = vector.load %arg4[%c0_6, %c0_7] : memref<104x64xbf16, #tpu.memory_space<vmem>>, vector<104x64xbf16>
    tpu.vector_store %arg4[%c0_6, %c0_7], %8 {strides = array<i32>} : memref<104x64xbf16, #tpu.memory_space<vmem>>, vector<104x64xbf16>,
    return
  }
  func.func @transform_0(%arg0: i32) -> (i32, i32) {
    %c0_i32 = arith.constant 0 : i32
    %c0_i32_0 = arith.constant 0 : i32
    return %arg0, %c0_i32 : i32, i32
  }
  func.func @transform_1(%arg0: i32) -> (i32, i32) {
    %c0_i32 = arith.constant 0 : i32
    %c0_i32_0 = arith.constant 0 : i32
    %c0_i32_1 = arith.constant 0 : i32
    return %c0_i32, %c0_i32_0 : i32, i32
  }
  func.func @transform_2(%arg0: i32) -> (i32, i32) {
    %c0_i32 = arith.constant 0 : i32
    %c0_i32_0 = arith.constant 0 : i32
    %c0_i32_1 = arith.constant 0 : i32
    return %c0_i32, %c0_i32_0 : i32, i32
  }
  func.func @transform_3(%arg0: i32) -> (i32, i32) {
    %c0_i32 = arith.constant 0 : i32
    %c0_i32_0 = arith.constant 0 : i32
    return %arg0, %c0_i32 : i32, i32
  }
}

module attributes {stable_mosaic.version = 11 : i64} {
  func.func @_mlp_head_kernel(%arg0: i32, %arg1: memref<8x3136xbf16, #tpu.memory_space<vmem>>, %arg2: memref<3136x512xbf16, #tpu.memory_space<vmem>>, %arg3: memref<1x512xf32, #tpu.memory_space<vmem>>, %arg4: memref<512x6xbf16, #tpu.memory_space<vmem>>, %arg5: memref<1x6xf32, #tpu.memory_space<vmem>>, %arg6: memref<8x6xf32, #tpu.memory_space<vmem>>) attributes {dimension_semantics = [#tpu.dimension_semantics<arbitrary>], iteration_bounds = array<i64: 1>, scalar_prefetch = 0 : i64, scratch_operands = 0 : i64, tpu.core_type = #tpu.core_type<tc>, window_params = [{pipeline_mode = #tpu.pipeline_mode<synchronous>, transform_indices = @transform_0, window_bounds = array<i64: 8, 3136>}, {pipeline_mode = #tpu.pipeline_mode<synchronous>, transform_indices = @transform_1, window_bounds = array<i64: 3136, 512>}, {pipeline_mode = #tpu.pipeline_mode<synchronous>, transform_indices = @transform_2, window_bounds = array<i64: 1, 512>}, {pipeline_mode = #tpu.pipeline_mode<synchronous>, transform_indices = @transform_3, window_bounds = array<i64: 512, 6>}, {pipeline_mode = #tpu.pipeline_mode<synchronous>, transform_indices = @transform_4, window_bounds = array<i64: 1, 6>}, {pipeline_mode = #tpu.pipeline_mode<synchronous>, transform_indices = @transform_5, window_bounds = array<i64: 8, 6>}]} {
    %c0 = arith.constant 0 : index
    %c0_0 = arith.constant 0 : index
    %0 = vector.load %arg1[%c0, %c0_0] : memref<8x3136xbf16, #tpu.memory_space<vmem>>, vector<8x3136xbf16>
    %c0_1 = arith.constant 0 : index
    %c0_2 = arith.constant 0 : index
    %1 = vector.load %arg2[%c0_1, %c0_2] : memref<3136x512xbf16, #tpu.memory_space<vmem>>, vector<3136x512xbf16>
    %cst = arith.constant dense<0.000000e+00> : vector<8x512xf32>
    %2 = tpu.matmul %0, %1, %cst {dimension_numbers = #tpu.dot_dimension_numbers<[1], [0], [0], [1], [0, 0, 1, 1], [], []>} : vector<8x3136xbf16>, vector<3136x512xbf16>, vector<8x512xf32> -> vector<8x512xf32>
    %c0_3 = arith.constant 0 : index
    %c0_4 = arith.constant 0 : index
    %3 = vector.load %arg3[%c0_3, %c0_4] : memref<1x512xf32, #tpu.memory_space<vmem>>, vector<1x512xf32>
    %4 = vector.broadcast %3 : vector<1x512xf32> to vector<8x512xf32>
    %5 = arith.addf %2, %4 : vector<8x512xf32>
    %cst_5 = arith.constant 0.000000e+00 : f32
    %6 = vector.broadcast %cst_5 : f32 to vector<8x512xf32>
    %7 = arith.maximumf %5, %6 : vector<8x512xf32>
    %8 = arith.truncf %7 : vector<8x512xf32> to vector<8x512xbf16>
    %c0_6 = arith.constant 0 : index
    %c0_7 = arith.constant 0 : index
    %9 = vector.load %arg4[%c0_6, %c0_7] : memref<512x6xbf16, #tpu.memory_space<vmem>>, vector<512x6xbf16>
    %cst_8 = arith.constant dense<0.000000e+00> : vector<8x6xf32>
    %10 = tpu.matmul %8, %9, %cst_8 {dimension_numbers = #tpu.dot_dimension_numbers<[1], [0], [0], [1], [0, 0, 1, 1], [], []>} : vector<8x512xbf16>, vector<512x6xbf16>, vector<8x6xf32> -> vector<8x6xf32>
    %c0_9 = arith.constant 0 : index
    %c0_10 = arith.constant 0 : index
    %11 = vector.load %arg5[%c0_9, %c0_10] : memref<1x6xf32, #tpu.memory_space<vmem>>, vector<1x6xf32>
    %12 = vector.broadcast %11 : vector<1x6xf32> to vector<8x6xf32>
    %13 = arith.addf %10, %12 : vector<8x6xf32>
    %c0_11 = arith.constant 0 : index
    %c0_12 = arith.constant 0 : index
    %14 = vector.load %arg6[%c0_11, %c0_12] : memref<8x6xf32, #tpu.memory_space<vmem>>, vector<8x6xf32>
    tpu.vector_store %arg6[%c0_11, %c0_12], %13 {strides = array<i32>} : memref<8x6xf32, #tpu.memory_space<vmem>>, vector<8x6xf32>,
    return
  }
  func.func @transform_0(%arg0: i32) -> (i32, i32) {
    %c0_i32 = arith.constant 0 : i32
    %c0_i32_0 = arith.constant 0 : i32
    %c0_i32_1 = arith.constant 0 : i32
    return %c0_i32, %c0_i32_0 : i32, i32
  }
  func.func @transform_1(%arg0: i32) -> (i32, i32) {
    %c0_i32 = arith.constant 0 : i32
    %c0_i32_0 = arith.constant 0 : i32
    %c0_i32_1 = arith.constant 0 : i32
    return %c0_i32, %c0_i32_0 : i32, i32
  }
  func.func @transform_2(%arg0: i32) -> (i32, i32) {
    %c0_i32 = arith.constant 0 : i32
    %c0_i32_0 = arith.constant 0 : i32
    %c0_i32_1 = arith.constant 0 : i32
    return %c0_i32, %c0_i32_0 : i32, i32
  }
  func.func @transform_3(%arg0: i32) -> (i32, i32) {
    %c0_i32 = arith.constant 0 : i32
    %c0_i32_0 = arith.constant 0 : i32
    %c0_i32_1 = arith.constant 0 : i32
    return %c0_i32, %c0_i32_0 : i32, i32
  }
  func.func @transform_4(%arg0: i32) -> (i32, i32) {
    %c0_i32 = arith.constant 0 : i32
    %c0_i32_0 = arith.constant 0 : i32
    %c0_i32_1 = arith.constant 0 : i32
    return %c0_i32, %c0_i32_0 : i32, i32
  }
  func.func @transform_5(%arg0: i32) -> (i32, i32) {
    %c0_i32 = arith.constant 0 : i32
    %c0_i32_0 = arith.constant 0 : i32
    %c0_i32_1 = arith.constant 0 : i32
    return %c0_i32, %c0_i32_0 : i32, i32
  }
}

</mosaic_0001>

<bundles_post_ra>
// kernel: network_forward.4
= control target key start
LH: loop header
LB: loop body
LE: loop exit
PB: predicated region body
PF: predicated region fallthrough
CT: control target
= control target key end

     0   :  { %v2305_v0 = vmov 0   ;;  %vm1683_vm0 = vcmask 257024   ;;  %s3216_s1 = inlined_call_operand.vmem [shape: bf16[256,32], index: 1, kind: input, shape index: {}]   ;;  %s3217_s0 = inlined_call_operand.vmem [shape: bf16[800,256], index: 0, kind: input, shape index: {}]   ;;  %s3218_s2 = inlined_call_operand.vmem [shape: f32[1,32], index: 2, kind: input, shape index: {}]   ;;  %s3219_s3 = inlined_call_operand.vmem [shape: bf16[800,32], index: 3, kind: output, shape index: {}]  }
   0x1   :  { %750 = vmatprep.subr.bf16.mxu0 %v2305_v0  ;;  %2105 = vmatprep.subr.bf16.mxu1 %v2305_v0  ;;  %v2138_v1 = vld [vmem:[%s3216_s1] sm:$0xff]   ;;  %v2139_v2 = vld [vmem:[%s3216_s1 + $0x8] sm:$0xff]   ;;  %v2140_v3 = vld [vmem:[%s3216_s1 + $0x10] sm:$0xff]  }
   0x2   :  { %751 = vmatpush1.bf16.msra.mxu0 %v2138_v1  ;;  %2121 = vmatpush1.bf16.msra.mxu1 %v2138_v1  ;;  %v2141_v4 = vld [vmem:[%s3216_s1 + $0x18] sm:$0xff]   ;;  %v2142_v5 = vld [vmem:[%s3216_s1 + $0x20] sm:$0xff]   ;;  %v2143_v7 = vld [vmem:[%s3216_s1 + $0x28] sm:$0xff]  }
   0x3   :  { %752 = vmatprep.subr.bf16.mxu0 %v2305_v0  ;;  %2106 = vmatprep.subr.bf16.mxu1 %v2305_v0  ;;  %v2156_v6 = vld [vmem:[%s3217_s0 + $0x4] ss:$8 sps:$4 sm:$0xff]   ;;  %v2159_v8 = vld [vmem:[%s3217_s0 + $0x194] ss:$8 sps:$4 sm:$0xff]   ;;  %v2154_v19 = vld [vmem:[%s3217_s0] ss:$8 sps:$4 sm:$0xff]  }
   0x4   :  { %782 = vmatprep.mubr.bf16.mxu0 %v2156_v6  ;;  %982 = vmatprep.mubr.bf16.mxu1 %v2159_v8  ;;  %v2144_v9 = vld [vmem:[%s3216_s1 + $0x30] sm:$0xff]   ;;  %v2145_v10 = vld [vmem:[%s3216_s1 + $0x38] sm:$0xff]   ;;  %v2146_v11 = vld [vmem:[%s3216_s1 + $0x40] sm:$0xff]  }
   0x5   :  { %v2147_v12 = vld [vmem:[%s3216_s1 + $0x48] sm:$0xff]   ;;  %v2148_v13 = vld [vmem:[%s3216_s1 + $0x50] sm:$0xff]   ;;  %v2149_v14 = vld [vmem:[%s3216_s1 + $0x58] sm:$0xff]  }
   0x6   :  { %753 = vmatpush1.bf16.msra.mxu0 %v2139_v2  ;;  %2122 = vmatpush1.bf16.msra.mxu1 %v2139_v2  ;;  %v2150_v15 = vld [vmem:[%s3216_s1 + $0x60] sm:$0xff]   ;;  %v2151_v16 = vld [vmem:[%s3216_s1 + $0x68] sm:$0xff]   ;;  %v2152_v17 = vld [vmem:[%s3216_s1 + $0x70] sm:$0xff]  }
   0x7   :  { %754 = vmatprep.subr.bf16.mxu0 %v2305_v0  ;;  %2107 = vmatprep.subr.bf16.mxu1 %v2305_v0  ;;  %v2153_v18 = vld [vmem:[%s3216_s1 + $0x78] sm:$0xff]   ;;  %v2162_v22 = vld [vmem:[%s3217_s0 + $0x1a4] ss:$8 sps:$4 sm:$0xff]   ;;  %v2165_v24 = vld [vmem:[%s3217_s0 + $0x1a0] ss:$8 sps:$4 sm:$0xff]  }
   0x8   :  { %v2157_v20 = vld [vmem:[%s3217_s0 + $0x190] ss:$8 sps:$4 sm:$0xff]   ;;  %v2160_v21 = vld [vmem:[%s3217_s0 + $0x14] ss:$8 sps:$4 sm:$0xff]   ;;  %v2166_v25 = vld [vmem:[%s3217_s0 + $0x24] ss:$8 sps:$4 sm:$0xff]  }
   0x9   :  { %v2164_v23 = vld [vmem:[%s3217_s0 + $0x10] ss:$8 sps:$4 sm:$0xff]   ;;  %v2168_v26 = vld [vmem:[%s3217_s0 + $0x1b4] ss:$8 sps:$4 sm:$0xff]   ;;  %v2170_v27 = vld [vmem:[%s3217_s0 + $0x20] ss:$8 sps:$4 sm:$0xff]  }
   0xa   :  { %755 = vmatpush1.bf16.msra.mxu0 %v2140_v3  ;;  %2123 = vmatpush1.bf16.msra.mxu1 %v2140_v3  ;;  %v2171_v28 = vld [vmem:[%s3217_s0 + $0x1b0] ss:$8 sps:$4 sm:$0xff]   ;;  %v2172_v29 = vld [vmem:[%s3217_s0 + $0x34] ss:$8 sps:$4 sm:$0xff]   ;;  %v2174_v30 = vld [vmem:[%s3217_s0 + $0x1c4] ss:$8 sps:$4 sm:$0xff]  }
   0xb   :  { %756 = vmatprep.subr.bf16.mxu0 %v2305_v0  ;;  %2108 = vmatprep.subr.bf16.mxu1 %v2305_v0  ;;  %v2176_v31 = vld [vmem:[%s3217_s0 + $0x30] ss:$8 sps:$4 sm:$0xff]   ;;  %v2177_v32 = vld [vmem:[%s3217_s0 + $0x1c0] ss:$8 sps:$4 sm:$0xff]   ;;  %v2178_v33 = vld [vmem:[%s3217_s0 + $0x44] ss:$8 sps:$4 sm:$0xff]  }
   0xc   :  { %v2180_v34 = vld [vmem:[%s3217_s0 + $0x1d4] ss:$8 sps:$4 sm:$0xff]   ;;  %v2182_v35 = vld [vmem:[%s3217_s0 + $0x40] ss:$8 sps:$4 sm:$0xff]   ;;  %v2183_v36 = vld [vmem:[%s3217_s0 + $0x1d0] ss:$8 sps:$4 sm:$0xff]  }
   0xd   :  { %v2184_v37 = vld [vmem:[%s3217_s0 + $0x54] ss:$8 sps:$4 sm:$0xff]   ;;  %v2186_v38 = vld [vmem:[%s3217_s0 + $0x1e4] ss:$8 sps:$4 sm:$0xff]   ;;  %v2188_v39 = vld [vmem:[%s3217_s0 + $0x50] ss:$8 sps:$4 sm:$0xff]  }
   0xe   :  { %757 = vmatpush1.bf16.msra.mxu0 %v2141_v4  ;;  %2124 = vmatpush1.bf16.msra.mxu1 %v2141_v4  ;;  %v2189_v40 = vld [vmem:[%s3217_s0 + $0x1e0] ss:$8 sps:$4 sm:$0xff]   ;;  %v2190_v41 = vld [vmem:[%s3217_s0 + $0x64] ss:$8 sps:$4 sm:$0xff]   ;;  %v2192_v42 = vld [vmem:[%s3217_s0 + $0x1f4] ss:$8 sps:$4 sm:$0xff]  }
   0xf   :  { %758 = vmatprep.subr.bf16.mxu0 %v2305_v0  ;;  %2109 = vmatprep.subr.bf16.mxu1 %v2305_v0  ;;  %v2194_v43 = vld [vmem:[%s3217_s0 + $0x60] ss:$8 sps:$4 sm:$0xff]   ;;  %v2195_v44 = vld [vmem:[%s3217_s0 + $0x1f0] ss:$8 sps:$4 sm:$0xff]   ;;  %v2196_v45 = vld [vmem:[%s3217_s0 + $0x74] ss:$8 sps:$4 sm:$0xff]  }
  0x10   :  { %v2198_v46 = vld [vmem:[%s3217_s0 + $0x204] ss:$8 sps:$4 sm:$0xff]   ;;  %v2200_v47 = vld [vmem:[%s3217_s0 + $0x70] ss:$8 sps:$4 sm:$0xff]   ;;  %v2201_v48 = vld [vmem:[%s3217_s0 + $0x200] ss:$8 sps:$4 sm:$0xff]  }
  0x11   :  { %v2202_v49 = vld [vmem:[%s3217_s0 + $0x84] ss:$8 sps:$4 sm:$0xff]   ;;  %v2204_v50 = vld [vmem:[%s3217_s0 + $0x214] ss:$8 sps:$4 sm:$0xff]   ;;  %v2206_v51 = vld [vmem:[%s3217_s0 + $0x80] ss:$8 sps:$4 sm:$0xff]  }
  0x12   :  { %759 = vmatpush1.bf16.msra.mxu0 %v2142_v5  ;;  %2125 = vmatpush1.bf16.msra.mxu1 %v2142_v5  ;;  %v2207_v52 = vld [vmem:[%s3217_s0 + $0x210] ss:$8 sps:$4 sm:$0xff]   ;;  %v2208_v53 = vld [vmem:[%s3217_s0 + $0x94] ss:$8 sps:$4 sm:$0xff]   ;;  %v2210_v54 = vld [vmem:[%s3217_s0 + $0x224] ss:$8 sps:$4 sm:$0xff]  }
  0x13   :  { %760 = vmatprep.subr.bf16.mxu0 %v2305_v0  ;;  %2110 = vmatprep.subr.bf16.mxu1 %v2305_v0  ;;  %v2212_v55 = vld [vmem:[%s3217_s0 + $0x90] ss:$8 sps:$4 sm:$0xff]   ;;  %v2213_v56 = vld [vmem:[%s3217_s0 + $0x220] ss:$8 sps:$4 sm:$0xff]   ;;  %v2214_v57 = vld [vmem:[%s3217_s0 + $0xa4] ss:$8 sps:$4 sm:$0xff]  }
  0x14   :  { %v2216_v58 = vld [vmem:[%s3217_s0 + $0x234] ss:$8 sps:$4 sm:$0xff]   ;;  %v2218_v59 = vld [vmem:[%s3217_s0 + $0xa0] ss:$8 sps:$4 sm:$0xff]   ;;  %v2219_v60 = vld [vmem:[%s3217_s0 + $0x230] ss:$8 sps:$4 sm:$0xff]  }
  0x15   :  { %v2220_v61 = vld [vmem:[%s3217_s0 + $0xb4] ss:$8 sps:$4 sm:$0xff]   ;;  %v2222_v62 = vld [vmem:[%s3217_s0 + $0x244] ss:$8 sps:$4 sm:$0xff]   ;;  %v2224_v63 = vld [vmem:[%s3217_s0 + $0xb0] ss:$8 sps:$4 sm:$0xff]  }
  0x16   :  { %761 = vmatpush1.bf16.msra.mxu0 %v2143_v7  ;;  %2126 = vmatpush1.bf16.msra.mxu1 %v2143_v7  ;;  %v2226_v1 = vld [vmem:[%s3217_s0 + $0xc4] ss:$8 sps:$4 sm:$0xff]   ;;  %v2228_v2 = vld [vmem:[%s3217_s0 + $0x254] ss:$8 sps:$4 sm:$0xff]   ;;  %v2230_v3 = vld [vmem:[%s3217_s0 + $0xc0] ss:$8 sps:$4 sm:$0xff]  }
  0x17   :  { %762 = vmatprep.subr.bf16.mxu0 %v2305_v0  ;;  %2111 = vmatprep.subr.bf16.mxu1 %v2305_v0  ;;  %v2231_v4 = vld [vmem:[%s3217_s0 + $0x250] ss:$8 sps:$4 sm:$0xff]   ;;  %v2232_v5 = vld [vmem:[%s3217_s0 + $0xd4] ss:$8 sps:$4 sm:$0xff]   ;;  %v2234_v6 = vld [vmem:[%s3217_s0 + $0x264] ss:$8 sps:$4 sm:$0xff]  }
  0x18   :  { %v2236_v7 = vld [vmem:[%s3217_s0 + $0xd0] ss:$8 sps:$4 sm:$0xff]   ;;  %v2237_v8 = vld [vmem:[%s3217_s0 + $0x260] ss:$8 sps:$4 sm:$0xff]  }
  0x1a   :  { %763 = vmatpush1.bf16.msra.mxu0 %v2144_v9  ;;  %2127 = vmatpush1.bf16.msra.mxu1 %v2144_v9  ;;  %v2238_v9 = vld [vmem:[%s3217_s0 + $0xe4] ss:$8 sps:$4 sm:$0xff]  }
  0x1b   :  { %764 = vmatprep.subr.bf16.mxu0 %v2305_v0  ;;  %2112 = vmatprep.subr.bf16.mxu1 %v2305_v0 }
  0x1e   :  { %765 = vmatpush1.bf16.msra.mxu0 %v2145_v10  ;;  %2128 = vmatpush1.bf16.msra.mxu1 %v2145_v10  ;;  %v2240_v10 = vld [vmem:[%s3217_s0 + $0x274] ss:$8 sps:$4 sm:$0xff]  }
  0x1f   :  { %766 = vmatprep.subr.bf16.mxu0 %v2305_v0  ;;  %2113 = vmatprep.subr.bf16.mxu1 %v2305_v0 }
  0x22   :  { %767 = vmatpush1.bf16.msra.mxu0 %v2146_v11  ;;  %2129 = vmatpush1.bf16.msra.mxu1 %v2146_v11  ;;  %v2242_v11 = vld [vmem:[%s3217_s0 + $0xe0] ss:$8 sps:$4 sm:$0xff]  }
  0x23   :  { %768 = vmatprep.subr.bf16.mxu0 %v2305_v0  ;;  %2114 = vmatprep.subr.bf16.mxu1 %v2305_v0 }
  0x26   :  { %769 = vmatpush1.bf16.msra.mxu0 %v2147_v12  ;;  %2130 = vmatpush1.bf16.msra.mxu1 %v2147_v12  ;;  %v2243_v12 = vld [vmem:[%s3217_s0 + $0x270] ss:$8 sps:$4 sm:$0xff]  }
  0x27   :  { %770 = vmatprep.subr.bf16.mxu0 %v2305_v0  ;;  %2115 = vmatprep.subr.bf16.mxu1 %v2305_v0 }
  0x2a   :  { %771 = vmatpush1.bf16.msra.mxu0 %v2148_v13  ;;  %2131 = vmatpush1.bf16.msra.mxu1 %v2148_v13  ;;  %v2244_v13 = vld [vmem:[%s3217_s0 + $0xf4] ss:$8 sps:$4 sm:$0xff]  }
  0x2b   :  { %772 = vmatprep.subr.bf16.mxu0 %v2305_v0  ;;  %2116 = vmatprep.subr.bf16.mxu1 %v2305_v0 }
  0x2e   :  { %773 = vmatpush1.bf16.msra.mxu0 %v2149_v14  ;;  %2132 = vmatpush1.bf16.msra.mxu1 %v2149_v14  ;;  %v2246_v14 = vld [vmem:[%s3217_s0 + $0x284] ss:$8 sps:$4 sm:$0xff]  }
  0x2f   :  { %774 = vmatprep.subr.bf16.mxu0 %v2305_v0  ;;  %2117 = vmatprep.subr.bf16.mxu1 %v2305_v0 }
  0x32   :  { %775 = vmatpush1.bf16.msra.mxu0 %v2150_v15  ;;  %2133 = vmatpush1.bf16.msra.mxu1 %v2150_v15  ;;  %v2248_v15 = vld [vmem:[%s3217_s0 + $0xf0] ss:$8 sps:$4 sm:$0xff]  }
  0x33   :  { %776 = vmatprep.subr.bf16.mxu0 %v2305_v0  ;;  %2118 = vmatprep.subr.bf16.mxu1 %v2305_v0 }
  0x36   :  { %777 = vmatpush1.bf16.msra.mxu0 %v2151_v16  ;;  %2134 = vmatpush1.bf16.msra.mxu1 %v2151_v16  ;;  %v2249_v16 = vld [vmem:[%s3217_s0 + $0x280] ss:$8 sps:$4 sm:$0xff]  }
  0x37   :  { %778 = vmatprep.subr.bf16.mxu0 %v2305_v0  ;;  %2119 = vmatprep.subr.bf16.mxu1 %v2305_v0 }
  0x3a   :  { %779 = vmatpush1.bf16.msra.mxu0 %v2152_v17  ;;  %2135 = vmatpush1.bf16.msra.mxu1 %v2152_v17  ;;  %v2250_v17 = vld [vmem:[%s3217_s0 + $0x104] ss:$8 sps:$4 sm:$0xff]  }
  0x3b   :  { %780 = vmatprep.subr.bf16.mxu0 %v2305_v0  ;;  %2120 = vmatprep.subr.bf16.mxu1 %v2305_v0  ;;  %v2225_v0 = vld [vmem:[%s3217_s0 + $0x240] ss:$8 sps:$4 sm:$0xff]  }
  0x3e   :  { %781 = vmatpush1.bf16.msra.mxu0 %v2153_v18  ;;  %2136 = vmatpush1.bf16.msra.mxu1 %v2153_v18  ;;  %v2252_v18 = vld [vmem:[%s3217_s0 + $0x294] ss:$8 sps:$4 sm:$0xff]  }
  0x41   :  { %783 = vmatmul.mubr.bf16.vlgmr.msra.gmra.mrb[0].mxu0 %v2154_v19  ;;  %983 = vmatmul.mubr.bf16.vlgmr.msra.gmra.mrb[0].mxu1 %v2157_v20  ;;  %v2254_v19 = vld [vmem:[%s3217_s0 + $0x100] ss:$8 sps:$4 sm:$0xff]   ;;  %v2255_v20 = vld [vmem:[%s3217_s0 + $0x290] ss:$8 sps:$4 sm:$0xff]  }
  0x42   :  { %790 = vmatprep.mubr.bf16.mxu0 %v2160_v21  ;;  %990 = vmatprep.mubr.bf16.mxu1 %v2162_v22  ;;  %v2256_v21 = vld [vmem:[%s3217_s0 + $0x114] ss:$8 sps:$4 sm:$0xff]   ;;  %v2258_v22 = vld [vmem:[%s3217_s0 + $0x2a4] ss:$8 sps:$4 sm:$0xff]  }
  0x49   :  { %791 = vmatmul.mubr.bf16.gmra.mrb[4].mxu0 %v2164_v23  ;;  %991 = vmatmul.mubr.bf16.gmra.mrb[4].mxu1 %v2165_v24  ;;  %v2260_v23 = vld [vmem:[%s3217_s0 + $0x110] ss:$8 sps:$4 sm:$0xff]   ;;  %v2261_v24 = vld [vmem:[%s3217_s0 + $0x2a0] ss:$8 sps:$4 sm:$0xff]  }
  0x4a   :  { %798 = vmatprep.mubr.bf16.mxu0 %v2166_v25  ;;  %998 = vmatprep.mubr.bf16.mxu1 %v2168_v26  ;;  %v2262_v25 = vld [vmem:[%s3217_s0 + $0x124] ss:$8 sps:$4 sm:$0xff]   ;;  %v2264_v26 = vld [vmem:[%s3217_s0 + $0x2b4] ss:$8 sps:$4 sm:$0xff]  }
  0x51   :  { %799 = vmatmul.mubr.bf16.gmra.mrb[8].mxu0 %v2170_v27  ;;  %999 = vmatmul.mubr.bf16.gmra.mrb[8].mxu1 %v2171_v28  ;;  %v2266_v27 = vld [vmem:[%s3217_s0 + $0x120] ss:$8 sps:$4 sm:$0xff]   ;;  %v2267_v28 = vld [vmem:[%s3217_s0 + $0x2b0] ss:$8 sps:$4 sm:$0xff]  }
  0x52   :  { %806 = vmatprep.mubr.bf16.mxu0 %v2172_v29  ;;  %1006 = vmatprep.mubr.bf16.mxu1 %v2174_v30  ;;  %v2268_v29 = vld [vmem:[%s3217_s0 + $0x134] ss:$8 sps:$4 sm:$0xff]   ;;  %v2270_v30 = vld [vmem:[%s3217_s0 + $0x2c4] ss:$8 sps:$4 sm:$0xff]  }
  0x59   :  { %807 = vmatmul.mubr.bf16.gmra.mrb[12].mxu0 %v2176_v31  ;;  %1007 = vmatmul.mubr.bf16.gmra.mrb[12].mxu1 %v2177_v32  ;;  %v2272_v31 = vld [vmem:[%s3217_s0 + $0x130] ss:$8 sps:$4 sm:$0xff]   ;;  %v2273_v32 = vld [vmem:[%s3217_s0 + $0x2c0] ss:$8 sps:$4 sm:$0xff]  }
  0x5a   :  { %814 = vmatprep.mubr.bf16.mxu0 %v2178_v33  ;;  %1014 = vmatprep.mubr.bf16.mxu1 %v2180_v34  ;;  %v2274_v33 = vld [vmem:[%s3217_s0 + $0x144] ss:$8 sps:$4 sm:$0xff]   ;;  %v2276_v34 = vld [vmem:[%s3217_s0 + $0x2d4] ss:$8 sps:$4 sm:$0xff]  }
  0x61   :  { %815 = vmatmul.mubr.bf16.gmra.mrb[16].mxu0 %v2182_v35  ;;  %1015 = vmatmul.mubr.bf16.gmra.mrb[16].mxu1 %v2183_v36  ;;  %v2278_v35 = vld [vmem:[%s3217_s0 + $0x140] ss:$8 sps:$4 sm:$0xff]   ;;  %v2279_v36 = vld [vmem:[%s3217_s0 + $0x2d0] ss:$8 sps:$4 sm:$0xff]  }
  0x62   :  { %822 = vmatprep.mubr.bf16.mxu0 %v2184_v37  ;;  %1022 = vmatprep.mubr.bf16.mxu1 %v2186_v38  ;;  %v2280_v37 = vld [vmem:[%s3217_s0 + $0x154] ss:$8 sps:$4 sm:$0xff]   ;;  %v2282_v38 = vld [vmem:[%s3217_s0 + $0x2e4] ss:$8 sps:$4 sm:$0xff]  }
  0x69   :  { %823 = vmatmul.mubr.bf16.gmra.mrb[20].mxu0 %v2188_v39  ;;  %1023 = vmatmul.mubr.bf16.gmra.mrb[20].mxu1 %v2189_v40  ;;  %v2284_v39 = vld [vmem:[%s3217_s0 + $0x150] ss:$8 sps:$4 sm:$0xff]   ;;  %v2285_v40 = vld [vmem:[%s3217_s0 + $0x2e0] ss:$8 sps:$4 sm:$0xff]  }
  0x6a   :  { %830 = vmatprep.mubr.bf16.mxu0 %v2190_v41  ;;  %1030 = vmatprep.mubr.bf16.mxu1 %v2192_v42  ;;  %v2286_v41 = vld [vmem:[%s3217_s0 + $0x164] ss:$8 sps:$4 sm:$0xff]   ;;  %v2288_v42 = vld [vmem:[%s3217_s0 + $0x2f4] ss:$8 sps:$4 sm:$0xff]  }
  0x71   :  { %831 = vmatmul.mubr.bf16.gmra.mrb[24].mxu0 %v2194_v43  ;;  %1031 = vmatmul.mubr.bf16.gmra.mrb[24].mxu1 %v2195_v44  ;;  %v2290_v43 = vld [vmem:[%s3217_s0 + $0x160] ss:$8 sps:$4 sm:$0xff]   ;;  %v2291_v44 = vld [vmem:[%s3217_s0 + $0x2f0] ss:$8 sps:$4 sm:$0xff]  }
  0x72   :  { %838 = vmatprep.mubr.bf16.mxu0 %v2196_v45  ;;  %1038 = vmatprep.mubr.bf16.mxu1 %v2198_v46  ;;  %v2292_v45 = vld [vmem:[%s3217_s0 + $0x174] ss:$8 sps:$4 sm:$0xff]   ;;  %v2294_v46 = vld [vmem:[%s3217_s0 + $0x304] ss:$8 sps:$4 sm:$0xff]  }
  0x79   :  { %839 = vmatmul.mubr.bf16.gmra.mrb[28].mxu0 %v2200_v47  ;;  %1039 = vmatmul.mubr.bf16.gmra.mrb[28].mxu1 %v2201_v48  ;;  %v2296_v47 = vld [vmem:[%s3217_s0 + $0x170] ss:$8 sps:$4 sm:$0xff]   ;;  %v2297_v48 = vld [vmem:[%s3217_s0 + $0x300] ss:$8 sps:$4 sm:$0xff]  }
  0x7a   :  { %846 = vmatprep.mubr.bf16.mxu0 %v2202_v49  ;;  %1046 = vmatprep.mubr.bf16.mxu1 %v2204_v50  ;;  %v2298_v49 = vld [vmem:[%s3217_s0 + $0x184] ss:$8 sps:$4 sm:$0xff]   ;;  %v2300_v50 = vld [vmem:[%s3217_s0 + $0x314] ss:$8 sps:$4 sm:$0xff]  }
  0x81   :  { %847 = vmatmul.mubr.bf16.gmra.mrb[32].mxu0 %v2206_v51  ;;  %1047 = vmatmul.mubr.bf16.gmra.mrb[32].mxu1 %v2207_v52  ;;  %v2302_v51 = vld [vmem:[%s3217_s0 + $0x180] ss:$8 sps:$4 sm:$0xff]   ;;  %v2303_v52 = vld [vmem:[%s3217_s0 + $0x310] ss:$8 sps:$4 sm:$0xff]  }
  0x82   :  { %854 = vmatprep.mubr.bf16.mxu0 %v2208_v53  ;;  %1054 = vmatprep.mubr.bf16.mxu1 %v2210_v54  ;;  %v2709_v53 = vld [vmem:[%s3218_s2] ss:$0 sm:$0xff] }
  0x89   :  { %855 = vmatmul.mubr.bf16.gmra.mrb[36].mxu0 %v2212_v55  ;;  %1055 = vmatmul.mubr.bf16.gmra.mrb[36].mxu1 %v2213_v56 }
  0x8a   :  { %862 = vmatprep.mubr.bf16.mxu0 %v2214_v57  ;;  %1062 = vmatprep.mubr.bf16.mxu1 %v2216_v58 }
  0x91   :  { %863 = vmatmul.mubr.bf16.gmra.mrb[40].mxu0 %v2218_v59  ;;  %1063 = vmatmul.mubr.bf16.gmra.mrb[40].mxu1 %v2219_v60 }
  0x92   :  { %870 = vmatprep.mubr.bf16.mxu0 %v2220_v61  ;;  %1070 = vmatprep.mubr.bf16.mxu1 %v2222_v62 }
  0x99   :  { %871 = vmatmul.mubr.bf16.gmra.mrb[44].mxu0 %v2224_v63  ;;  %1071 = vmatmul.mubr.bf16.gmra.mrb[44].mxu1 %v2225_v0 }
  0x9a   :  { %878 = vmatprep.mubr.bf16.mxu0 %v2226_v1  ;;  %1078 = vmatprep.mubr.bf16.mxu1 %v2228_v2 }
  0xa1   :  { %879 = vmatmul.mubr.bf16.gmra.mrb[48].mxu0 %v2230_v3  ;;  %1079 = vmatmul.mubr.bf16.gmra.mrb[48].mxu1 %v2231_v4 }
  0xa2   :  { %886 = vmatprep.mubr.bf16.mxu0 %v2232_v5  ;;  %1086 = vmatprep.mubr.bf16.mxu1 %v2234_v6 }
  0xa9   :  { %887 = vmatmul.mubr.bf16.gmra.mrb[52].mxu0 %v2236_v7  ;;  %1087 = vmatmul.mubr.bf16.gmra.mrb[52].mxu1 %v2237_v8 }
  0xaa   :  { %894 = vmatprep.mubr.bf16.mxu0 %v2238_v9  ;;  %1094 = vmatprep.mubr.bf16.mxu1 %v2240_v10 }
  0xb1   :  { %895 = vmatmul.mubr.bf16.gmra.mrb[56].mxu0 %v2242_v11  ;;  %1095 = vmatmul.mubr.bf16.gmra.mrb[56].mxu1 %v2243_v12 }
  0xb2   :  { %902 = vmatprep.mubr.bf16.mxu0 %v2244_v13  ;;  %1102 = vmatprep.mubr.bf16.mxu1 %v2246_v14 }
  0xb9   :  { %903 = vmatmul.mubr.bf16.gmra.mrb[60].mxu0 %v2248_v15  ;;  %1103 = vmatmul.mubr.bf16.gmra.mrb[60].mxu1 %v2249_v16 }
  0xba   :  { %910 = vmatprep.mubr.bf16.mxu0 %v2250_v17  ;;  %1110 = vmatprep.mubr.bf16.mxu1 %v2252_v18 }
  0xc1   :  { %911 = vmatmul.mubr.bf16.gmra.mrb[64].mxu0 %v2254_v19  ;;  %1111 = vmatmul.mubr.bf16.gmra.mrb[64].mxu1 %v2255_v20 }
  0xc2   :  { %918 = vmatprep.mubr.bf16.mxu0 %v2256_v21  ;;  %1118 = vmatprep.mubr.bf16.mxu1 %v2258_v22 }
  0xc9   :  { %919 = vmatmul.mubr.bf16.gmra.mrb[68].mxu0 %v2260_v23  ;;  %1119 = vmatmul.mubr.bf16.gmra.mrb[68].mxu1 %v2261_v24 }
  0xca   :  { %926 = vmatprep.mubr.bf16.mxu0 %v2262_v25  ;;  %1126 = vmatprep.mubr.bf16.mxu1 %v2264_v26 }
  0xd1   :  { %927 = vmatmul.mubr.bf16.gmra.mrb[72].mxu0 %v2266_v27  ;;  %1127 = vmatmul.mubr.bf16.gmra.mrb[72].mxu1 %v2267_v28 }
  0xd2   :  { %934 = vmatprep.mubr.bf16.mxu0 %v2268_v29  ;;  %1134 = vmatprep.mubr.bf16.mxu1 %v2270_v30 }
  0xd9   :  { %935 = vmatmul.mubr.bf16.gmra.mrb[76].mxu0 %v2272_v31  ;;  %1135 = vmatmul.mubr.bf16.gmra.mrb[76].mxu1 %v2273_v32 }
  0xda   :  { %942 = vmatprep.mubr.bf16.mxu0 %v2274_v33  ;;  %1142 = vmatprep.mubr.bf16.mxu1 %v2276_v34 }
  0xe1   :  { %943 = vmatmul.mubr.bf16.gmra.mrb[80].mxu0 %v2278_v35  ;;  %1143 = vmatmul.mubr.bf16.gmra.mrb[80].mxu1 %v2279_v36 }
  0xe2   :  { %950 = vmatprep.mubr.bf16.mxu0 %v2280_v37  ;;  %1150 = vmatprep.mubr.bf16.mxu1 %v2282_v38 }
  0xe9   :  { %951 = vmatmul.mubr.bf16.gmra.mrb[84].mxu0 %v2284_v39  ;;  %1151 = vmatmul.mubr.bf16.gmra.mrb[84].mxu1 %v2285_v40 }
  0xea   :  { %958 = vmatprep.mubr.bf16.mxu0 %v2286_v41  ;;  %1158 = vmatprep.mubr.bf16.mxu1 %v2288_v42 }
  0xf1   :  { %959 = vmatmul.mubr.bf16.gmra.mrb[88].mxu0 %v2290_v43  ;;  %1159 = vmatmul.mubr.bf16.gmra.mrb[88].mxu1 %v2291_v44 }
  0xf2   :  { %966 = vmatprep.mubr.bf16.mxu0 %v2292_v45  ;;  %1166 = vmatprep.mubr.bf16.mxu1 %v2294_v46 }
  0xf9   :  { %967 = vmatmul.mubr.bf16.gmra.mrb[92].mxu0 %v2296_v47  ;;  %1167 = vmatmul.mubr.bf16.gmra.mrb[92].mxu1 %v2297_v48 }
  0xfa   :  { %974 = vmatprep.mubr.bf16.mxu0 %v2298_v49  ;;  %1174 = vmatprep.mubr.bf16.mxu1 %v2300_v50 }
 0x101   :  { %975 = vmatmul.mubr.bf16.gmra.mrb[96].mxu0 %v2302_v51  ;;  %1175 = vmatmul.mubr.bf16.gmra.mrb[96].mxu1 %v2303_v52 }
 0x114   :  { %v784_v54 = vpop.f32.mrb[0].mxu0  ;;  %v984_v55 = vpop.f32.mrb[0].mxu1 }
 0x115   :  { %v785_v56 = vadd.f32 %v2709_v53, %v784_v54  ;;  %v985_v57 = vadd.f32 %v2709_v53, %v984_v55  ;;  %v786_v58 = vpop.f32.mrb[1].mxu0  ;;  %v986_v59 = vpop.f32.mrb[1].mxu1 }
 0x116   :  { %v787_v60 = vpop.f32.mrb[2].mxu0  ;;  %v987_v61 = vpop.f32.mrb[2].mxu1 }
 0x117   :  { %v1183_v62 = vmax.f32 %v785_v56, 0.0  ;;  %v1233_v63 = vmax.f32 %v985_v57, 0.0  ;;  %v788_v0 = vadd.f32 %v2709_v53, %v787_v60  ;;  %v988_v1 = vadd.f32 %v2709_v53, %v987_v61  ;;  %v789_v2 = vpop.f32.mrb[3].mxu0  ;;  %v989_v3 = vpop.f32.mrb[3].mxu1 }
 0x119   :  { %v2005_v4 = vpack.c.bf16 %v1183_v62, %v1183_v62  ;;  %v2055_v5 = vpack.c.bf16 %v1233_v63, %v1233_v63  ;;  %v1184_v6 = vmax.f32 %v788_v0, 0.0  ;;  %v1234_v7 = vmax.f32 %v988_v1, 0.0 }
 0x11b   :  { %1684 = vst.msk [vmem:[%s3219_s3] sm:$0xf] %vm1683_vm0, %v2005_v4  ;;  %1734 = vst.msk [vmem:[%s3219_s3 + $0xc8] sm:$0xf] %vm1683_vm0, %v2055_v5  ;;  %v2006_v8 = vpack.c.bf16 %v1184_v6, %v1184_v6  ;;  %v2056_v9 = vpack.c.bf16 %v1234_v7, %v1234_v7 }
 0x11c   :  { %v792_v10 = vpop.f32.mrb[4].mxu0  ;;  %v992_v11 = vpop.f32.mrb[4].mxu1 }
 0x11d   :  { %1685 = vst.msk [vmem:[%s3219_s3 + $0x4] sm:$0xf] %vm1683_vm0, %v2006_v8  ;;  %1735 = vst.msk [vmem:[%s3219_s3 + $0xcc] sm:$0xf] %vm1683_vm0, %v2056_v9  ;;  %v793_v12 = vadd.f32 %v2709_v53, %v792_v10  ;;  %v993_v13 = vadd.f32 %v2709_v53, %v992_v11  ;;  %v794_v14 = vpop.f32.mrb[5].mxu0  ;;  %v994_v15 = vpop.f32.mrb[5].mxu1 }
 0x11e   :  { %v795_v16 = vpop.f32.mrb[6].mxu0  ;;  %v995_v17 = vpop.f32.mrb[6].mxu1 }
 0x11f   :  { %v1185_v18 = vmax.f32 %v793_v12, 0.0  ;;  %v1235_v19 = vmax.f32 %v993_v13, 0.0  ;;  %v796_v20 = vadd.f32 %v2709_v53, %v795_v16  ;;  %v996_v21 = vadd.f32 %v2709_v53, %v995_v17  ;;  %v797_v22 = vpop.f32.mrb[7].mxu0  ;;  %v997_v23 = vpop.f32.mrb[7].mxu1 }
 0x121   :  { %v2007_v24 = vpack.c.bf16 %v1185_v18, %v1185_v18  ;;  %v2057_v25 = vpack.c.bf16 %v1235_v19, %v1235_v19  ;;  %v1186_v26 = vmax.f32 %v796_v20, 0.0  ;;  %v1236_v27 = vmax.f32 %v996_v21, 0.0 }
 0x123   :  { %1686 = vst.msk [vmem:[%s3219_s3 + $0x8] sm:$0xf] %vm1683_vm0, %v2007_v24  ;;  %1736 = vst.msk [vmem:[%s3219_s3 + $0xd0] sm:$0xf] %vm1683_vm0, %v2057_v25  ;;  %v2008_v28 = vpack.c.bf16 %v1186_v26, %v1186_v26  ;;  %v2058_v29 = vpack.c.bf16 %v1236_v27, %v1236_v27 }
 0x124   :  { %v800_v30 = vpop.f32.mrb[8].mxu0  ;;  %v1000_v31 = vpop.f32.mrb[8].mxu1 }
 0x125   :  { %1687 = vst.msk [vmem:[%s3219_s3 + $0xc] sm:$0xf] %vm1683_vm0, %v2008_v28  ;;  %1737 = vst.msk [vmem:[%s3219_s3 + $0xd4] sm:$0xf] %vm1683_vm0, %v2058_v29  ;;  %v801_v32 = vadd.f32 %v2709_v53, %v800_v30  ;;  %v1001_v33 = vadd.f32 %v2709_v53, %v1000_v31  ;;  %v802_v34 = vpop.f32.mrb[9].mxu0  ;;  %v1002_v35 = vpop.f32.mrb[9].mxu1 }
 0x126   :  { %v803_v36 = vpop.f32.mrb[10].mxu0  ;;  %v1003_v37 = vpop.f32.mrb[10].mxu1 }
 0x127   :  { %v1187_v38 = vmax.f32 %v801_v32, 0.0  ;;  %v1237_v39 = vmax.f32 %v1001_v33, 0.0  ;;  %v804_v40 = vadd.f32 %v2709_v53, %v803_v36  ;;  %v1004_v41 = vadd.f32 %v2709_v53, %v1003_v37  ;;  %v805_v42 = vpop.f32.mrb[11].mxu0  ;;  %v1005_v43 = vpop.f32.mrb[11].mxu1 }
 0x129   :  { %v2009_v44 = vpack.c.bf16 %v1187_v38, %v1187_v38  ;;  %v2059_v45 = vpack.c.bf16 %v1237_v39, %v1237_v39  ;;  %v1188_v46 = vmax.f32 %v804_v40, 0.0  ;;  %v1238_v47 = vmax.f32 %v1004_v41, 0.0 }
 0x12b   :  { %1688 = vst.msk [vmem:[%s3219_s3 + $0x10] sm:$0xf] %vm1683_vm0, %v2009_v44  ;;  %1738 = vst.msk [vmem:[%s3219_s3 + $0xd8] sm:$0xf] %vm1683_vm0, %v2059_v45  ;;  %v2010_v48 = vpack.c.bf16 %v1188_v46, %v1188_v46  ;;  %v2060_v49 = vpack.c.bf16 %v1238_v47, %v1238_v47 }
 0x12c   :  { %v808_v50 = vpop.f32.mrb[12].mxu0  ;;  %v1008_v51 = vpop.f32.mrb[12].mxu1 }
 0x12d   :  { %1689 = vst.msk [vmem:[%s3219_s3 + $0x14] sm:$0xf] %vm1683_vm0, %v2010_v48  ;;  %1739 = vst.msk [vmem:[%s3219_s3 + $0xdc] sm:$0xf] %vm1683_vm0, %v2060_v49  ;;  %v809_v52 = vadd.f32 %v2709_v53, %v808_v50  ;;  %v1009_v54 = vadd.f32 %v2709_v53, %v1008_v51  ;;  %v810_v55 = vpop.f32.mrb[13].mxu0  ;;  %v1010_v56 = vpop.f32.mrb[13].mxu1 }
 0x12e   :  { %v811_v57 = vpop.f32.mrb[14].mxu0  ;;  %v1011_v58 = vpop.f32.mrb[14].mxu1 }
 0x12f   :  { %v1189_v59 = vmax.f32 %v809_v52, 0.0  ;;  %v1239_v60 = vmax.f32 %v1009_v54, 0.0  ;;  %v812_v61 = vadd.f32 %v2709_v53, %v811_v57  ;;  %v1012_v62 = vadd.f32 %v2709_v53, %v1011_v58  ;;  %v813_v63 = vpop.f32.mrb[15].mxu0  ;;  %v1013_v0 = vpop.f32.mrb[15].mxu1 }
 0x131   :  { %v2011_v1 = vpack.c.bf16 %v1189_v59, %v1189_v59  ;;  %v2061_v2 = vpack.c.bf16 %v1239_v60, %v1239_v60  ;;  %v1190_v3 = vmax.f32 %v812_v61, 0.0  ;;  %v1240_v4 = vmax.f32 %v1012_v62, 0.0 }
 0x133   :  { %1690 = vst.msk [vmem:[%s3219_s3 + $0x18] sm:$0xf] %vm1683_vm0, %v2011_v1  ;;  %1740 = vst.msk [vmem:[%s3219_s3 + $0xe0] sm:$0xf] %vm1683_vm0, %v2061_v2  ;;  %v2012_v5 = vpack.c.bf16 %v1190_v3, %v1190_v3  ;;  %v2062_v6 = vpack.c.bf16 %v1240_v4, %v1240_v4 }
 0x134   :  { %v816_v7 = vpop.f32.mrb[16].mxu0  ;;  %v1016_v8 = vpop.f32.mrb[16].mxu1 }
 0x135   :  { %1691 = vst.msk [vmem:[%s3219_s3 + $0x1c] sm:$0xf] %vm1683_vm0, %v2012_v5  ;;  %1741 = vst.msk [vmem:[%s3219_s3 + $0xe4] sm:$0xf] %vm1683_vm0, %v2062_v6  ;;  %v817_v9 = vadd.f32 %v2709_v53, %v816_v7  ;;  %v1017_v10 = vadd.f32 %v2709_v53, %v1016_v8  ;;  %v818_v11 = vpop.f32.mrb[17].mxu0  ;;  %v1018_v12 = vpop.f32.mrb[17].mxu1 }
 0x136   :  { %v819_v13 = vpop.f32.mrb[18].mxu0  ;;  %v1019_v14 = vpop.f32.mrb[18].mxu1 }
 0x137   :  { %v1191_v15 = vmax.f32 %v817_v9, 0.0  ;;  %v1241_v16 = vmax.f32 %v1017_v10, 0.0  ;;  %v820_v17 = vadd.f32 %v2709_v53, %v819_v13  ;;  %v1020_v18 = vadd.f32 %v2709_v53, %v1019_v14  ;;  %v821_v19 = vpop.f32.mrb[19].mxu0  ;;  %v1021_v20 = vpop.f32.mrb[19].mxu1 }
 0x139   :  { %v2013_v21 = vpack.c.bf16 %v1191_v15, %v1191_v15  ;;  %v2063_v22 = vpack.c.bf16 %v1241_v16, %v1241_v16  ;;  %v1192_v23 = vmax.f32 %v820_v17, 0.0  ;;  %v1242_v24 = vmax.f32 %v1020_v18, 0.0 }
 0x13b   :  { %1692 = vst.msk [vmem:[%s3219_s3 + $0x20] sm:$0xf] %vm1683_vm0, %v2013_v21  ;;  %1742 = vst.msk [vmem:[%s3219_s3 + $0xe8] sm:$0xf] %vm1683_vm0, %v2063_v22  ;;  %v2014_v25 = vpack.c.bf16 %v1192_v23, %v1192_v23  ;;  %v2064_v26 = vpack.c.bf16 %v1242_v24, %v1242_v24 }
 0x13c   :  { %v824_v27 = vpop.f32.mrb[20].mxu0  ;;  %v1024_v28 = vpop.f32.mrb[20].mxu1 }
 0x13d   :  { %1693 = vst.msk [vmem:[%s3219_s3 + $0x24] sm:$0xf] %vm1683_vm0, %v2014_v25  ;;  %1743 = vst.msk [vmem:[%s3219_s3 + $0xec] sm:$0xf] %vm1683_vm0, %v2064_v26  ;;  %v825_v29 = vadd.f32 %v2709_v53, %v824_v27  ;;  %v1025_v30 = vadd.f32 %v2709_v53, %v1024_v28  ;;  %v826_v31 = vpop.f32.mrb[21].mxu0  ;;  %v1026_v32 = vpop.f32.mrb[21].mxu1 }
 0x13e   :  { %v827_v33 = vpop.f32.mrb[22].mxu0  ;;  %v1027_v34 = vpop.f32.mrb[22].mxu1 }
 0x13f   :  { %v1193_v35 = vmax.f32 %v825_v29, 0.0  ;;  %v1243_v36 = vmax.f32 %v1025_v30, 0.0  ;;  %v828_v37 = vadd.f32 %v2709_v53, %v827_v33  ;;  %v1028_v38 = vadd.f32 %v2709_v53, %v1027_v34  ;;  %v829_v39 = vpop.f32.mrb[23].mxu0  ;;  %v1029_v40 = vpop.f32.mrb[23].mxu1 }
 0x141   :  { %v2015_v41 = vpack.c.bf16 %v1193_v35, %v1193_v35  ;;  %v2065_v42 = vpack.c.bf16 %v1243_v36, %v1243_v36  ;;  %v1194_v43 = vmax.f32 %v828_v37, 0.0  ;;  %v1244_v44 = vmax.f32 %v1028_v38, 0.0 }
 0x143   :  { %1694 = vst.msk [vmem:[%s3219_s3 + $0x28] sm:$0xf] %vm1683_vm0, %v2015_v41  ;;  %1744 = vst.msk [vmem:[%s3219_s3 + $0xf0] sm:$0xf] %vm1683_vm0, %v2065_v42  ;;  %v2016_v45 = vpack.c.bf16 %v1194_v43, %v1194_v43  ;;  %v2066_v46 = vpack.c.bf16 %v1244_v44, %v1244_v44 }
 0x144   :  { %v832_v47 = vpop.f32.mrb[24].mxu0  ;;  %v1032_v48 = vpop.f32.mrb[24].mxu1 }
 0x145   :  { %1695 = vst.msk [vmem:[%s3219_s3 + $0x2c] sm:$0xf] %vm1683_vm0, %v2016_v45  ;;  %1745 = vst.msk [vmem:[%s3219_s3 + $0xf4] sm:$0xf] %vm1683_vm0, %v2066_v46  ;;  %v833_v49 = vadd.f32 %v2709_v53, %v832_v47  ;;  %v1033_v50 = vadd.f32 %v2709_v53, %v1032_v48  ;;  %v834_v51 = vpop.f32.mrb[25].mxu0  ;;  %v1034_v52 = vpop.f32.mrb[25].mxu1 }
 0x146   :  { %v835_v54 = vpop.f32.mrb[26].mxu0  ;;  %v1035_v55 = vpop.f32.mrb[26].mxu1 }
 0x147   :  { %v1195_v56 = vmax.f32 %v833_v49, 0.0  ;;  %v1245_v57 = vmax.f32 %v1033_v50, 0.0  ;;  %v836_v58 = vadd.f32 %v2709_v53, %v835_v54  ;;  %v1036_v59 = vadd.f32 %v2709_v53, %v1035_v55  ;;  %v837_v60 = vpop.f32.mrb[27].mxu0  ;;  %v1037_v61 = vpop.f32.mrb[27].mxu1 }
 0x149   :  { %v2017_v62 = vpack.c.bf16 %v1195_v56, %v1195_v56  ;;  %v2067_v63 = vpack.c.bf16 %v1245_v57, %v1245_v57  ;;  %v1196_v0 = vmax.f32 %v836_v58, 0.0  ;;  %v1246_v1 = vmax.f32 %v1036_v59, 0.0 }
 0x14b   :  { %1696 = vst.msk [vmem:[%s3219_s3 + $0x30] sm:$0xf] %vm1683_vm0, %v2017_v62  ;;  %1746 = vst.msk [vmem:[%s3219_s3 + $0xf8] sm:$0xf] %vm1683_vm0, %v2067_v63  ;;  %v2018_v2 = vpack.c.bf16 %v1196_v0, %v1196_v0  ;;  %v2068_v3 = vpack.c.bf16 %v1246_v1, %v1246_v1 }
 0x14c   :  { %v840_v4 = vpop.f32.mrb[28].mxu0  ;;  %v1040_v5 = vpop.f32.mrb[28].mxu1 }
 0x14d   :  { %1697 = vst.msk [vmem:[%s3219_s3 + $0x34] sm:$0xf] %vm1683_vm0, %v2018_v2  ;;  %1747 = vst.msk [vmem:[%s3219_s3 + $0xfc] sm:$0xf] %vm1683_vm0, %v2068_v3  ;;  %v841_v6 = vadd.f32 %v2709_v53, %v840_v4  ;;  %v1041_v7 = vadd.f32 %v2709_v53, %v1040_v5  ;;  %v842_v8 = vpop.f32.mrb[29].mxu0  ;;  %v1042_v9 = vpop.f32.mrb[29].mxu1 }
 0x14e   :  { %v843_v10 = vpop.f32.mrb[30].mxu0  ;;  %v1043_v11 = vpop.f32.mrb[30].mxu1 }
 0x14f   :  { %v1197_v12 = vmax.f32 %v841_v6, 0.0  ;;  %v1247_v13 = vmax.f32 %v1041_v7, 0.0  ;;  %v844_v14 = vadd.f32 %v2709_v53, %v843_v10  ;;  %v1044_v15 = vadd.f32 %v2709_v53, %v1043_v11  ;;  %v845_v16 = vpop.f32.mrb[31].mxu0  ;;  %v1045_v17 = vpop.f32.mrb[31].mxu1 }
 0x151   :  { %v2019_v18 = vpack.c.bf16 %v1197_v12, %v1197_v12  ;;  %v2069_v19 = vpack.c.bf16 %v1247_v13, %v1247_v13  ;;  %v1198_v20 = vmax.f32 %v844_v14, 0.0  ;;  %v1248_v21 = vmax.f32 %v1044_v15, 0.0 }
 0x153   :  { %1698 = vst.msk [vmem:[%s3219_s3 + $0x38] sm:$0xf] %vm1683_vm0, %v2019_v18  ;;  %1748 = vst.msk [vmem:[%s3219_s3 + $0x100] sm:$0xf] %vm1683_vm0, %v2069_v19  ;;  %v2020_v22 = vpack.c.bf16 %v1198_v20, %v1198_v20  ;;  %v2070_v23 = vpack.c.bf16 %v1248_v21, %v1248_v21 }
 0x154   :  { %v848_v24 = vpop.f32.mrb[32].mxu0  ;;  %v1048_v25 = vpop.f32.mrb[32].mxu1 }
 0x155   :  { %1699 = vst.msk [vmem:[%s3219_s3 + $0x3c] sm:$0xf] %vm1683_vm0, %v2020_v22  ;;  %1749 = vst.msk [vmem:[%s3219_s3 + $0x104] sm:$0xf] %vm1683_vm0, %v2070_v23  ;;  %v849_v26 = vadd.f32 %v2709_v53, %v848_v24  ;;  %v1049_v27 = vadd.f32 %v2709_v53, %v1048_v25  ;;  %v850_v28 = vpop.f32.mrb[33].mxu0  ;;  %v1050_v29 = vpop.f32.mrb[33].mxu1 }
 0x156   :  { %v851_v30 = vpop.f32.mrb[34].mxu0  ;;  %v1051_v31 = vpop.f32.mrb[34].mxu1 }
 0x157   :  { %v1199_v32 = vmax.f32 %v849_v26, 0.0  ;;  %v1249_v33 = vmax.f32 %v1049_v27, 0.0  ;;  %v852_v34 = vadd.f32 %v2709_v53, %v851_v30  ;;  %v1052_v35 = vadd.f32 %v2709_v53, %v1051_v31  ;;  %v853_v36 = vpop.f32.mrb[35].mxu0  ;;  %v1053_v37 = vpop.f32.mrb[35].mxu1 }
 0x159   :  { %v2021_v38 = vpack.c.bf16 %v1199_v32, %v1199_v32  ;;  %v2071_v39 = vpack.c.bf16 %v1249_v33, %v1249_v33  ;;  %v1200_v40 = vmax.f32 %v852_v34, 0.0  ;;  %v1250_v41 = vmax.f32 %v1052_v35, 0.0 }
 0x15b   :  { %1700 = vst.msk [vmem:[%s3219_s3 + $0x40] sm:$0xf] %vm1683_vm0, %v2021_v38  ;;  %1750 = vst.msk [vmem:[%s3219_s3 + $0x108] sm:$0xf] %vm1683_vm0, %v2071_v39  ;;  %v2022_v42 = vpack.c.bf16 %v1200_v40, %v1200_v40  ;;  %v2072_v43 = vpack.c.bf16 %v1250_v41, %v1250_v41 }
 0x15c   :  { %v856_v44 = vpop.f32.mrb[36].mxu0  ;;  %v1056_v45 = vpop.f32.mrb[36].mxu1 }
 0x15d   :  { %1701 = vst.msk [vmem:[%s3219_s3 + $0x44] sm:$0xf] %vm1683_vm0, %v2022_v42  ;;  %1751 = vst.msk [vmem:[%s3219_s3 + $0x10c] sm:$0xf] %vm1683_vm0, %v2072_v43  ;;  %v857_v46 = vadd.f32 %v2709_v53, %v856_v44  ;;  %v1057_v47 = vadd.f32 %v2709_v53, %v1056_v45  ;;  %v858_v48 = vpop.f32.mrb[37].mxu0  ;;  %v1058_v49 = vpop.f32.mrb[37].mxu1 }
 0x15e   :  { %v859_v50 = vpop.f32.mrb[38].mxu0  ;;  %v1059_v51 = vpop.f32.mrb[38].mxu1 }
 0x15f   :  { %v1201_v52 = vmax.f32 %v857_v46, 0.0  ;;  %v1251_v54 = vmax.f32 %v1057_v47, 0.0  ;;  %v860_v55 = vadd.f32 %v2709_v53, %v859_v50  ;;  %v1060_v56 = vadd.f32 %v2709_v53, %v1059_v51  ;;  %v861_v57 = vpop.f32.mrb[39].mxu0  ;;  %v1061_v58 = vpop.f32.mrb[39].mxu1 }
 0x161   :  { %v2023_v59 = vpack.c.bf16 %v1201_v52, %v1201_v52  ;;  %v2073_v60 = vpack.c.bf16 %v1251_v54, %v1251_v54  ;;  %v1202_v61 = vmax.f32 %v860_v55, 0.0  ;;  %v1252_v62 = vmax.f32 %v1060_v56, 0.0 }
 0x163   :  { %1702 = vst.msk [vmem:[%s3219_s3 + $0x48] sm:$0xf] %vm1683_vm0, %v2023_v59  ;;  %1752 = vst.msk [vmem:[%s3219_s3 + $0x110] sm:$0xf] %vm1683_vm0, %v2073_v60  ;;  %v2024_v63 = vpack.c.bf16 %v1202_v61, %v1202_v61  ;;  %v2074_v0 = vpack.c.bf16 %v1252_v62, %v1252_v62 }
 0x164   :  { %v864_v1 = vpop.f32.mrb[40].mxu0  ;;  %v1064_v2 = vpop.f32.mrb[40].mxu1 }
 0x165   :  { %1703 = vst.msk [vmem:[%s3219_s3 + $0x4c] sm:$0xf] %vm1683_vm0, %v2024_v63  ;;  %1753 = vst.msk [vmem:[%s3219_s3 + $0x114] sm:$0xf] %vm1683_vm0, %v2074_v0  ;;  %v865_v3 = vadd.f32 %v2709_v53, %v864_v1  ;;  %v1065_v4 = vadd.f32 %v2709_v53, %v1064_v2  ;;  %v866_v5 = vpop.f32.mrb[41].mxu0  ;;  %v1066_v6 = vpop.f32.mrb[41].mxu1 }
 0x166   :  { %v867_v7 = vpop.f32.mrb[42].mxu0  ;;  %v1067_v8 = vpop.f32.mrb[42].mxu1 }
 0x167   :  { %v1203_v9 = vmax.f32 %v865_v3, 0.0  ;;  %v1253_v10 = vmax.f32 %v1065_v4, 0.0  ;;  %v868_v11 = vadd.f32 %v2709_v53, %v867_v7  ;;  %v1068_v12 = vadd.f32 %v2709_v53, %v1067_v8  ;;  %v869_v13 = vpop.f32.mrb[43].mxu0  ;;  %v1069_v14 = vpop.f32.mrb[43].mxu1 }
 0x169   :  { %v2025_v15 = vpack.c.bf16 %v1203_v9, %v1203_v9  ;;  %v2075_v16 = vpack.c.bf16 %v1253_v10, %v1253_v10  ;;  %v1204_v17 = vmax.f32 %v868_v11, 0.0  ;;  %v1254_v18 = vmax.f32 %v1068_v12, 0.0 }
 0x16b   :  { %1704 = vst.msk [vmem:[%s3219_s3 + $0x50] sm:$0xf] %vm1683_vm0, %v2025_v15  ;;  %1754 = vst.msk [vmem:[%s3219_s3 + $0x118] sm:$0xf] %vm1683_vm0, %v2075_v16  ;;  %v2026_v19 = vpack.c.bf16 %v1204_v17, %v1204_v17  ;;  %v2076_v20 = vpack.c.bf16 %v1254_v18, %v1254_v18 }
 0x16c   :  { %v872_v21 = vpop.f32.mrb[44].mxu0  ;;  %v1072_v22 = vpop.f32.mrb[44].mxu1 }
 0x16d   :  { %1705 = vst.msk [vmem:[%s3219_s3 + $0x54] sm:$0xf] %vm1683_vm0, %v2026_v19  ;;  %1755 = vst.msk [vmem:[%s3219_s3 + $0x11c] sm:$0xf] %vm1683_vm0, %v2076_v20  ;;  %v873_v23 = vadd.f32 %v2709_v53, %v872_v21  ;;  %v1073_v24 = vadd.f32 %v2709_v53, %v1072_v22  ;;  %v874_v25 = vpop.f32.mrb[45].mxu0  ;;  %v1074_v26 = vpop.f32.mrb[45].mxu1 }
 0x16e   :  { %v875_v27 = vpop.f32.mrb[46].mxu0  ;;  %v1075_v28 = vpop.f32.mrb[46].mxu1 }
 0x16f   :  { %v1205_v29 = vmax.f32 %v873_v23, 0.0  ;;  %v1255_v30 = vmax.f32 %v1073_v24, 0.0  ;;  %v876_v31 = vadd.f32 %v2709_v53, %v875_v27  ;;  %v1076_v32 = vadd.f32 %v2709_v53, %v1075_v28  ;;  %v877_v33 = vpop.f32.mrb[47].mxu0  ;;  %v1077_v34 = vpop.f32.mrb[47].mxu1 }
 0x171   :  { %v2027_v35 = vpack.c.bf16 %v1205_v29, %v1205_v29  ;;  %v2077_v36 = vpack.c.bf16 %v1255_v30, %v1255_v30  ;;  %v1206_v37 = vmax.f32 %v876_v31, 0.0  ;;  %v1256_v38 = vmax.f32 %v1076_v32, 0.0 }
 0x173   :  { %1706 = vst.msk [vmem:[%s3219_s3 + $0x58] sm:$0xf] %vm1683_vm0, %v2027_v35  ;;  %1756 = vst.msk [vmem:[%s3219_s3 + $0x120] sm:$0xf] %vm1683_vm0, %v2077_v36  ;;  %v2028_v39 = vpack.c.bf16 %v1206_v37, %v1206_v37  ;;  %v2078_v40 = vpack.c.bf16 %v1256_v38, %v1256_v38 }
 0x174   :  { %v880_v41 = vpop.f32.mrb[48].mxu0  ;;  %v1080_v42 = vpop.f32.mrb[48].mxu1 }
 0x175   :  { %1707 = vst.msk [vmem:[%s3219_s3 + $0x5c] sm:$0xf] %vm1683_vm0, %v2028_v39  ;;  %1757 = vst.msk [vmem:[%s3219_s3 + $0x124] sm:$0xf] %vm1683_vm0, %v2078_v40  ;;  %v881_v43 = vadd.f32 %v2709_v53, %v880_v41  ;;  %v1081_v44 = vadd.f32 %v2709_v53, %v1080_v42  ;;  %v882_v45 = vpop.f32.mrb[49].mxu0  ;;  %v1082_v46 = vpop.f32.mrb[49].mxu1 }
 0x176   :  { %v883_v47 = vpop.f32.mrb[50].mxu0  ;;  %v1083_v48 = vpop.f32.mrb[50].mxu1 }
 0x177   :  { %v1207_v49 = vmax.f32 %v881_v43, 0.0  ;;  %v1257_v50 = vmax.f32 %v1081_v44, 0.0  ;;  %v884_v51 = vadd.f32 %v2709_v53, %v883_v47  ;;  %v1084_v52 = vadd.f32 %v2709_v53, %v1083_v48  ;;  %v885_v54 = vpop.f32.mrb[51].mxu0  ;;  %v1085_v55 = vpop.f32.mrb[51].mxu1 }
 0x179   :  { %v2029_v56 = vpack.c.bf16 %v1207_v49, %v1207_v49  ;;  %v2079_v57 = vpack.c.bf16 %v1257_v50, %v1257_v50  ;;  %v1208_v58 = vmax.f32 %v884_v51, 0.0  ;;  %v1258_v59 = vmax.f32 %v1084_v52, 0.0 }
 0x17b   :  { %1708 = vst.msk [vmem:[%s3219_s3 + $0x60] sm:$0xf] %vm1683_vm0, %v2029_v56  ;;  %1758 = vst.msk [vmem:[%s3219_s3 + $0x128] sm:$0xf] %vm1683_vm0, %v2079_v57  ;;  %v2030_v60 = vpack.c.bf16 %v1208_v58, %v1208_v58  ;;  %v2080_v61 = vpack.c.bf16 %v1258_v59, %v1258_v59 }
 0x17c   :  { %v888_v62 = vpop.f32.mrb[52].mxu0  ;;  %v1088_v63 = vpop.f32.mrb[52].mxu1 }
 0x17d   :  { %1709 = vst.msk [vmem:[%s3219_s3 + $0x64] sm:$0xf] %vm1683_vm0, %v2030_v60  ;;  %1759 = vst.msk [vmem:[%s3219_s3 + $0x12c] sm:$0xf] %vm1683_vm0, %v2080_v61  ;;  %v889_v0 = vadd.f32 %v2709_v53, %v888_v62  ;;  %v1089_v1 = vadd.f32 %v2709_v53, %v1088_v63  ;;  %v890_v2 = vpop.f32.mrb[53].mxu0  ;;  %v1090_v3 = vpop.f32.mrb[53].mxu1 }
 0x17e   :  { %v891_v4 = vpop.f32.mrb[54].mxu0  ;;  %v1091_v5 = vpop.f32.mrb[54].mxu1 }
 0x17f   :  { %v1209_v6 = vmax.f32 %v889_v0, 0.0  ;;  %v1259_v7 = vmax.f32 %v1089_v1, 0.0  ;;  %v892_v8 = vadd.f32 %v2709_v53, %v891_v4  ;;  %v1092_v9 = vadd.f32 %v2709_v53, %v1091_v5  ;;  %v893_v10 = vpop.f32.mrb[55].mxu0  ;;  %v1093_v11 = vpop.f32.mrb[55].mxu1 }
 0x181   :  { %v2031_v12 = vpack.c.bf16 %v1209_v6, %v1209_v6  ;;  %v2081_v13 = vpack.c.bf16 %v1259_v7, %v1259_v7  ;;  %v1210_v14 = vmax.f32 %v892_v8, 0.0  ;;  %v1260_v15 = vmax.f32 %v1092_v9, 0.0 }
 0x183   :  { %1710 = vst.msk [vmem:[%s3219_s3 + $0x68] sm:$0xf] %vm1683_vm0, %v2031_v12  ;;  %1760 = vst.msk [vmem:[%s3219_s3 + $0x130] sm:$0xf] %vm1683_vm0, %v2081_v13  ;;  %v2032_v16 = vpack.c.bf16 %v1210_v14, %v1210_v14  ;;  %v2082_v17 = vpack.c.bf16 %v1260_v15, %v1260_v15 }
 0x184   :  { %v896_v18 = vpop.f32.mrb[56].mxu0  ;;  %v1096_v19 = vpop.f32.mrb[56].mxu1 }
 0x185   :  { %1711 = vst.msk [vmem:[%s3219_s3 + $0x6c] sm:$0xf] %vm1683_vm0, %v2032_v16  ;;  %1761 = vst.msk [vmem:[%s3219_s3 + $0x134] sm:$0xf] %vm1683_vm0, %v2082_v17  ;;  %v897_v20 = vadd.f32 %v2709_v53, %v896_v18  ;;  %v1097_v21 = vadd.f32 %v2709_v53, %v1096_v19  ;;  %v898_v22 = vpop.f32.mrb[57].mxu0  ;;  %v1098_v23 = vpop.f32.mrb[57].mxu1 }
 0x186   :  { %v899_v24 = vpop.f32.mrb[58].mxu0  ;;  %v1099_v25 = vpop.f32.mrb[58].mxu1 }
 0x187   :  { %v1211_v26 = vmax.f32 %v897_v20, 0.0  ;;  %v1261_v27 = vmax.f32 %v1097_v21, 0.0  ;;  %v900_v28 = vadd.f32 %v2709_v53, %v899_v24  ;;  %v1100_v29 = vadd.f32 %v2709_v53, %v1099_v25  ;;  %v901_v30 = vpop.f32.mrb[59].mxu0  ;;  %v1101_v31 = vpop.f32.mrb[59].mxu1 }
 0x189   :  { %v2033_v32 = vpack.c.bf16 %v1211_v26, %v1211_v26  ;;  %v2083_v33 = vpack.c.bf16 %v1261_v27, %v1261_v27  ;;  %v1212_v34 = vmax.f32 %v900_v28, 0.0  ;;  %v1262_v35 = vmax.f32 %v1100_v29, 0.0 }
 0x18b   :  { %1712 = vst.msk [vmem:[%s3219_s3 + $0x70] sm:$0xf] %vm1683_vm0, %v2033_v32  ;;  %1762 = vst.msk [vmem:[%s3219_s3 + $0x138] sm:$0xf] %vm1683_vm0, %v2083_v33  ;;  %v2034_v36 = vpack.c.bf16 %v1212_v34, %v1212_v34  ;;  %v2084_v37 = vpack.c.bf16 %v1262_v35, %v1262_v35 }
 0x18c   :  { %v904_v38 = vpop.f32.mrb[60].mxu0  ;;  %v1104_v39 = vpop.f32.mrb[60].mxu1 }
 0x18d   :  { %1713 = vst.msk [vmem:[%s3219_s3 + $0x74] sm:$0xf] %vm1683_vm0, %v2034_v36  ;;  %1763 = vst.msk [vmem:[%s3219_s3 + $0x13c] sm:$0xf] %vm1683_vm0, %v2084_v37  ;;  %v905_v40 = vadd.f32 %v2709_v53, %v904_v38  ;;  %v1105_v41 = vadd.f32 %v2709_v53, %v1104_v39  ;;  %v906_v42 = vpop.f32.mrb[61].mxu0  ;;  %v1106_v43 = vpop.f32.mrb[61].mxu1 }
 0x18e   :  { %v907_v44 = vpop.f32.mrb[62].mxu0  ;;  %v1107_v45 = vpop.f32.mrb[62].mxu1 }
 0x18f   :  { %v1213_v46 = vmax.f32 %v905_v40, 0.0  ;;  %v1263_v47 = vmax.f32 %v1105_v41, 0.0  ;;  %v908_v48 = vadd.f32 %v2709_v53, %v907_v44  ;;  %v1108_v49 = vadd.f32 %v2709_v53, %v1107_v45  ;;  %v909_v50 = vpop.f32.mrb[63].mxu0  ;;  %v1109_v51 = vpop.f32.mrb[63].mxu1 }
 0x191   :  { %v2035_v52 = vpack.c.bf16 %v1213_v46, %v1213_v46  ;;  %v2085_v54 = vpack.c.bf16 %v1263_v47, %v1263_v47  ;;  %v1214_v55 = vmax.f32 %v908_v48, 0.0  ;;  %v1264_v56 = vmax.f32 %v1108_v49, 0.0 }
 0x193   :  { %1714 = vst.msk [vmem:[%s3219_s3 + $0x78] sm:$0xf] %vm1683_vm0, %v2035_v52  ;;  %1764 = vst.msk [vmem:[%s3219_s3 + $0x140] sm:$0xf] %vm1683_vm0, %v2085_v54  ;;  %v2036_v57 = vpack.c.bf16 %v1214_v55, %v1214_v55  ;;  %v2086_v58 = vpack.c.bf16 %v1264_v56, %v1264_v56 }
 0x194   :  { %v912_v59 = vpop.f32.mrb[64].mxu0  ;;  %v1112_v60 = vpop.f32.mrb[64].mxu1 }
 0x195   :  { %1715 = vst.msk [vmem:[%s3219_s3 + $0x7c] sm:$0xf] %vm1683_vm0, %v2036_v57  ;;  %1765 = vst.msk [vmem:[%s3219_s3 + $0x144] sm:$0xf] %vm1683_vm0, %v2086_v58  ;;  %v913_v61 = vadd.f32 %v2709_v53, %v912_v59  ;;  %v1113_v62 = vadd.f32 %v2709_v53, %v1112_v60  ;;  %v914_v63 = vpop.f32.mrb[65].mxu0  ;;  %v1114_v0 = vpop.f32.mrb[65].mxu1 }
 0x196   :  { %v915_v1 = vpop.f32.mrb[66].mxu0  ;;  %v1115_v2 = vpop.f32.mrb[66].mxu1 }
 0x197   :  { %v1215_v3 = vmax.f32 %v913_v61, 0.0  ;;  %v1265_v4 = vmax.f32 %v1113_v62, 0.0  ;;  %v916_v5 = vadd.f32 %v2709_v53, %v915_v1  ;;  %v1116_v6 = vadd.f32 %v2709_v53, %v1115_v2  ;;  %v917_v7 = vpop.f32.mrb[67].mxu0  ;;  %v1117_v8 = vpop.f32.mrb[67].mxu1 }
 0x199   :  { %v2037_v9 = vpack.c.bf16 %v1215_v3, %v1215_v3  ;;  %v2087_v10 = vpack.c.bf16 %v1265_v4, %v1265_v4  ;;  %v1216_v11 = vmax.f32 %v916_v5, 0.0  ;;  %v1266_v12 = vmax.f32 %v1116_v6, 0.0 }
 0x19b   :  { %1716 = vst.msk [vmem:[%s3219_s3 + $0x80] sm:$0xf] %vm1683_vm0, %v2037_v9  ;;  %1766 = vst.msk [vmem:[%s3219_s3 + $0x148] sm:$0xf] %vm1683_vm0, %v2087_v10  ;;  %v2038_v13 = vpack.c.bf16 %v1216_v11, %v1216_v11  ;;  %v2088_v14 = vpack.c.bf16 %v1266_v12, %v1266_v12 }
 0x19c   :  { %v920_v15 = vpop.f32.mrb[68].mxu0  ;;  %v1120_v16 = vpop.f32.mrb[68].mxu1 }
 0x19d   :  { %1717 = vst.msk [vmem:[%s3219_s3 + $0x84] sm:$0xf] %vm1683_vm0, %v2038_v13  ;;  %1767 = vst.msk [vmem:[%s3219_s3 + $0x14c] sm:$0xf] %vm1683_vm0, %v2088_v14  ;;  %v921_v17 = vadd.f32 %v2709_v53, %v920_v15  ;;  %v1121_v18 = vadd.f32 %v2709_v53, %v1120_v16  ;;  %v922_v19 = vpop.f32.mrb[69].mxu0  ;;  %v1122_v20 = vpop.f32.mrb[69].mxu1 }
 0x19e   :  { %v923_v21 = vpop.f32.mrb[70].mxu0  ;;  %v1123_v22 = vpop.f32.mrb[70].mxu1 }
 0x19f   :  { %v1217_v23 = vmax.f32 %v921_v17, 0.0  ;;  %v1267_v24 = vmax.f32 %v1121_v18, 0.0  ;;  %v924_v25 = vadd.f32 %v2709_v53, %v923_v21  ;;  %v1124_v26 = vadd.f32 %v2709_v53, %v1123_v22  ;;  %v925_v27 = vpop.f32.mrb[71].mxu0  ;;  %v1125_v28 = vpop.f32.mrb[71].mxu1 }
 0x1a1   :  { %v2039_v29 = vpack.c.bf16 %v1217_v23, %v1217_v23  ;;  %v2089_v30 = vpack.c.bf16 %v1267_v24, %v1267_v24  ;;  %v1218_v31 = vmax.f32 %v924_v25, 0.0  ;;  %v1268_v32 = vmax.f32 %v1124_v26, 0.0 }
 0x1a3   :  { %1718 = vst.msk [vmem:[%s3219_s3 + $0x88] sm:$0xf] %vm1683_vm0, %v2039_v29  ;;  %1768 = vst.msk [vmem:[%s3219_s3 + $0x150] sm:$0xf] %vm1683_vm0, %v2089_v30  ;;  %v2040_v33 = vpack.c.bf16 %v1218_v31, %v1218_v31  ;;  %v2090_v34 = vpack.c.bf16 %v1268_v32, %v1268_v32 }
 0x1a4   :  { %v928_v35 = vpop.f32.mrb[72].mxu0  ;;  %v1128_v36 = vpop.f32.mrb[72].mxu1 }
 0x1a5   :  { %1719 = vst.msk [vmem:[%s3219_s3 + $0x8c] sm:$0xf] %vm1683_vm0, %v2040_v33  ;;  %1769 = vst.msk [vmem:[%s3219_s3 + $0x154] sm:$0xf] %vm1683_vm0, %v2090_v34  ;;  %v929_v37 = vadd.f32 %v2709_v53, %v928_v35  ;;  %v1129_v38 = vadd.f32 %v2709_v53, %v1128_v36  ;;  %v930_v39 = vpop.f32.mrb[73].mxu0  ;;  %v1130_v40 = vpop.f32.mrb[73].mxu1 }
 0x1a6   :  { %v931_v41 = vpop.f32.mrb[74].mxu0  ;;  %v1131_v42 = vpop.f32.mrb[74].mxu1 }
 0x1a7   :  { %v1219_v43 = vmax.f32 %v929_v37, 0.0  ;;  %v1269_v44 = vmax.f32 %v1129_v38, 0.0  ;;  %v932_v45 = vadd.f32 %v2709_v53, %v931_v41  ;;  %v1132_v46 = vadd.f32 %v2709_v53, %v1131_v42  ;;  %v933_v47 = vpop.f32.mrb[75].mxu0  ;;  %v1133_v48 = vpop.f32.mrb[75].mxu1  ;;  %v3136_v42 = vld [vmem:[%s3218_s2] ss:$0 sm:$0xff] }
 0x1a9   :  { %v2041_v49 = vpack.c.bf16 %v1219_v43, %v1219_v43  ;;  %v2091_v50 = vpack.c.bf16 %v1269_v44, %v1269_v44  ;;  %v1220_v51 = vmax.f32 %v932_v45, 0.0  ;;  %v1270_v52 = vmax.f32 %v1132_v46, 0.0 }
 0x1ab   :  { %1720 = vst.msk [vmem:[%s3219_s3 + $0x90] sm:$0xf] %vm1683_vm0, %v2041_v49  ;;  %1770 = vst.msk [vmem:[%s3219_s3 + $0x158] sm:$0xf] %vm1683_vm0, %v2091_v50  ;;  %v2042_v54 = vpack.c.bf16 %v1220_v51, %v1220_v51  ;;  %v2092_v55 = vpack.c.bf16 %v1270_v52, %v1270_v52 }
 0x1ac   :  { %v936_v56 = vpop.f32.mrb[76].mxu0  ;;  %v1136_v57 = vpop.f32.mrb[76].mxu1 }
 0x1ad   :  { %1721 = vst.msk [vmem:[%s3219_s3 + $0x94] sm:$0xf] %vm1683_vm0, %v2042_v54  ;;  %1771 = vst.msk [vmem:[%s3219_s3 + $0x15c] sm:$0xf] %vm1683_vm0, %v2092_v55  ;;  %v937_v58 = vadd.f32 %v2709_v53, %v936_v56  ;;  %v1137_v59 = vadd.f32 %v2709_v53, %v1136_v57  ;;  %v938_v60 = vpop.f32.mrb[77].mxu0  ;;  %v1138_v61 = vpop.f32.mrb[77].mxu1 }
 0x1ae   :  { %v939_v62 = vpop.f32.mrb[78].mxu0  ;;  %v1139_v63 = vpop.f32.mrb[78].mxu1 }
 0x1af   :  { %v1221_v0 = vmax.f32 %v937_v58, 0.0  ;;  %v1271_v1 = vmax.f32 %v1137_v59, 0.0  ;;  %v940_v2 = vadd.f32 %v2709_v53, %v939_v62  ;;  %v1140_v3 = vadd.f32 %v2709_v53, %v1139_v63  ;;  %v941_v4 = vpop.f32.mrb[79].mxu0  ;;  %v1141_v5 = vpop.f32.mrb[79].mxu1 }
 0x1b1   :  { %v2043_v6 = vpack.c.bf16 %v1221_v0, %v1221_v0  ;;  %v2093_v7 = vpack.c.bf16 %v1271_v1, %v1271_v1  ;;  %v1222_v8 = vmax.f32 %v940_v2, 0.0  ;;  %v1272_v9 = vmax.f32 %v1140_v3, 0.0 }
 0x1b3   :  { %1722 = vst.msk [vmem:[%s3219_s3 + $0x98] sm:$0xf] %vm1683_vm0, %v2043_v6  ;;  %1772 = vst.msk [vmem:[%s3219_s3 + $0x160] sm:$0xf] %vm1683_vm0, %v2093_v7  ;;  %v2044_v10 = vpack.c.bf16 %v1222_v8, %v1222_v8  ;;  %v2094_v11 = vpack.c.bf16 %v1272_v9, %v1272_v9 }
 0x1b4   :  { %v944_v12 = vpop.f32.mrb[80].mxu0  ;;  %v1144_v13 = vpop.f32.mrb[80].mxu1 }
 0x1b5   :  { %1723 = vst.msk [vmem:[%s3219_s3 + $0x9c] sm:$0xf] %vm1683_vm0, %v2044_v10  ;;  %1773 = vst.msk [vmem:[%s3219_s3 + $0x164] sm:$0xf] %vm1683_vm0, %v2094_v11  ;;  %v945_v14 = vadd.f32 %v2709_v53, %v944_v12  ;;  %v1145_v15 = vadd.f32 %v2709_v53, %v1144_v13  ;;  %v946_v16 = vpop.f32.mrb[81].mxu0  ;;  %v1146_v17 = vpop.f32.mrb[81].mxu1 }
 0x1b6   :  { %v947_v18 = vpop.f32.mrb[82].mxu0  ;;  %v1147_v19 = vpop.f32.mrb[82].mxu1 }
 0x1b7   :  { %v1223_v20 = vmax.f32 %v945_v14, 0.0  ;;  %v1273_v21 = vmax.f32 %v1145_v15, 0.0  ;;  %v948_v22 = vadd.f32 %v2709_v53, %v947_v18  ;;  %v1148_v23 = vadd.f32 %v2709_v53, %v1147_v19  ;;  %v949_v24 = vpop.f32.mrb[83].mxu0  ;;  %v1149_v25 = vpop.f32.mrb[83].mxu1 }
 0x1b9   :  { %v2045_v26 = vpack.c.bf16 %v1223_v20, %v1223_v20  ;;  %v2095_v27 = vpack.c.bf16 %v1273_v21, %v1273_v21  ;;  %v1224_v28 = vmax.f32 %v948_v22, 0.0  ;;  %v1274_v29 = vmax.f32 %v1148_v23, 0.0 }
 0x1bb   :  { %1724 = vst.msk [vmem:[%s3219_s3 + $0xa0] sm:$0xf] %vm1683_vm0, %v2045_v26  ;;  %1774 = vst.msk [vmem:[%s3219_s3 + $0x168] sm:$0xf] %vm1683_vm0, %v2095_v27  ;;  %v2046_v30 = vpack.c.bf16 %v1224_v28, %v1224_v28  ;;  %v2096_v31 = vpack.c.bf16 %v1274_v29, %v1274_v29 }
 0x1bc   :  { %v952_v32 = vpop.f32.mrb[84].mxu0  ;;  %v1152_v33 = vpop.f32.mrb[84].mxu1 }
 0x1bd   :  { %1725 = vst.msk [vmem:[%s3219_s3 + $0xa4] sm:$0xf] %vm1683_vm0, %v2046_v30  ;;  %1775 = vst.msk [vmem:[%s3219_s3 + $0x16c] sm:$0xf] %vm1683_vm0, %v2096_v31  ;;  %v953_v34 = vadd.f32 %v2709_v53, %v952_v32  ;;  %v1153_v35 = vadd.f32 %v2709_v53, %v1152_v33  ;;  %v954_v36 = vpop.f32.mrb[85].mxu0  ;;  %v1154_v37 = vpop.f32.mrb[85].mxu1 }
 0x1be   :  { %v955_v38 = vpop.f32.mrb[86].mxu0  ;;  %v1155_v39 = vpop.f32.mrb[86].mxu1 }
 0x1bf   :  { %v1225_v40 = vmax.f32 %v953_v34, 0.0  ;;  %v1275_v41 = vmax.f32 %v1153_v35, 0.0  ;;  %v956_v43 = vadd.f32 %v3136_v42, %v955_v38  ;;  %v1156_v44 = vadd.f32 %v3136_v42, %v1155_v39  ;;  %v957_v45 = vpop.f32.mrb[87].mxu0  ;;  %v1157_v46 = vpop.f32.mrb[87].mxu1 }
 0x1c1   :  { %v2047_v47 = vpack.c.bf16 %v1225_v40, %v1225_v40  ;;  %v2097_v48 = vpack.c.bf16 %v1275_v41, %v1275_v41  ;;  %v1226_v53 = vmax.f32 %v956_v43, 0.0  ;;  %v1276_v49 = vmax.f32 %v1156_v44, 0.0 }
 0x1c3   :  { %1726 = vst.msk [vmem:[%s3219_s3 + $0xa8] sm:$0xf] %vm1683_vm0, %v2047_v47  ;;  %1776 = vst.msk [vmem:[%s3219_s3 + $0x170] sm:$0xf] %vm1683_vm0, %v2097_v48  ;;  %v2048_v50 = vpack.c.bf16 %v1226_v53, %v1226_v53  ;;  %v2098_v51 = vpack.c.bf16 %v1276_v49, %v1276_v49 }
 0x1c4   :  { %v960_v52 = vpop.f32.mrb[88].mxu0  ;;  %v1160_v54 = vpop.f32.mrb[88].mxu1 }
 0x1c5   :  { %1727 = vst.msk [vmem:[%s3219_s3 + $0xac] sm:$0xf] %vm1683_vm0, %v2048_v50  ;;  %1777 = vst.msk [vmem:[%s3219_s3 + $0x174] sm:$0xf] %vm1683_vm0, %v2098_v51  ;;  %v961_v55 = vadd.f32 %v3136_v42, %v960_v52  ;;  %v1161_v56 = vadd.f32 %v3136_v42, %v1160_v54  ;;  %v962_v57 = vpop.f32.mrb[89].mxu0  ;;  %v1162_v58 = vpop.f32.mrb[89].mxu1 }
 0x1c6   :  { %v963_v59 = vpop.f32.mrb[90].mxu0  ;;  %v1163_v60 = vpop.f32.mrb[90].mxu1 }
 0x1c7   :  { %v1227_v61 = vmax.f32 %v961_v55, 0.0  ;;  %v1277_v62 = vmax.f32 %v1161_v56, 0.0  ;;  %v964_v63 = vadd.f32 %v3136_v42, %v963_v59  ;;  %v1164_v0 = vadd.f32 %v3136_v42, %v1163_v60  ;;  %v965_v1 = vpop.f32.mrb[91].mxu0  ;;  %v1165_v2 = vpop.f32.mrb[91].mxu1 }
 0x1c9   :  { %v2049_v3 = vpack.c.bf16 %v1227_v61, %v1227_v61  ;;  %v2099_v4 = vpack.c.bf16 %v1277_v62, %v1277_v62  ;;  %v1228_v5 = vmax.f32 %v964_v63, 0.0  ;;  %v1278_v6 = vmax.f32 %v1164_v0, 0.0 }
 0x1cb   :  { %1728 = vst.msk [vmem:[%s3219_s3 + $0xb0] sm:$0xf] %vm1683_vm0, %v2049_v3  ;;  %1778 = vst.msk [vmem:[%s3219_s3 + $0x178] sm:$0xf] %vm1683_vm0, %v2099_v4  ;;  %v2050_v7 = vpack.c.bf16 %v1228_v5, %v1228_v5  ;;  %v2100_v8 = vpack.c.bf16 %v1278_v6, %v1278_v6 }
 0x1cc   :  { %v968_v9 = vpop.f32.mrb[92].mxu0  ;;  %v1168_v10 = vpop.f32.mrb[92].mxu1 }
 0x1cd   :  { %1729 = vst.msk [vmem:[%s3219_s3 + $0xb4] sm:$0xf] %vm1683_vm0, %v2050_v7  ;;  %1779 = vst.msk [vmem:[%s3219_s3 + $0x17c] sm:$0xf] %vm1683_vm0, %v2100_v8  ;;  %v969_v11 = vadd.f32 %v3136_v42, %v968_v9  ;;  %v1169_v12 = vadd.f32 %v3136_v42, %v1168_v10  ;;  %v970_v13 = vpop.f32.mrb[93].mxu0  ;;  %v1170_v14 = vpop.f32.mrb[93].mxu1 }
 0x1ce   :  { %v971_v15 = vpop.f32.mrb[94].mxu0  ;;  %v1171_v16 = vpop.f32.mrb[94].mxu1 }
 0x1cf   :  { %v1229_v17 = vmax.f32 %v969_v11, 0.0  ;;  %v1279_v18 = vmax.f32 %v1169_v12, 0.0  ;;  %v972_v19 = vadd.f32 %v3136_v42, %v971_v15  ;;  %v1172_v20 = vadd.f32 %v3136_v42, %v1171_v16  ;;  %v973_v21 = vpop.f32.mrb[95].mxu0  ;;  %v1173_v22 = vpop.f32.mrb[95].mxu1 }
 0x1d1   :  { %v2051_v23 = vpack.c.bf16 %v1229_v17, %v1229_v17  ;;  %v2101_v24 = vpack.c.bf16 %v1279_v18, %v1279_v18  ;;  %v1230_v25 = vmax.f32 %v972_v19, 0.0  ;;  %v1280_v26 = vmax.f32 %v1172_v20, 0.0 }
 0x1d3   :  { %1730 = vst.msk [vmem:[%s3219_s3 + $0xb8] sm:$0xf] %vm1683_vm0, %v2051_v23  ;;  %1780 = vst.msk [vmem:[%s3219_s3 + $0x180] sm:$0xf] %vm1683_vm0, %v2101_v24  ;;  %v2052_v27 = vpack.c.bf16 %v1230_v25, %v1230_v25  ;;  %v2102_v28 = vpack.c.bf16 %v1280_v26, %v1280_v26 }
 0x1d4   :  { %v976_v29 = vpop.f32.mrb[96].mxu0  ;;  %v1176_v30 = vpop.f32.mrb[96].mxu1 }
 0x1d5   :  { %1731 = vst.msk [vmem:[%s3219_s3 + $0xbc] sm:$0xf] %vm1683_vm0, %v2052_v27  ;;  %1781 = vst.msk [vmem:[%s3219_s3 + $0x184] sm:$0xf] %vm1683_vm0, %v2102_v28  ;;  %v977_v31 = vadd.f32 %v3136_v42, %v976_v29  ;;  %v1177_v32 = vadd.f32 %v3136_v42, %v1176_v30  ;;  %v978_v33 = vpop.f32.mrb[97].mxu0  ;;  %v1178_v34 = vpop.f32.mrb[97].mxu1 }
 0x1d6   :  { %v979_v35 = vpop.f32.mrb[98].mxu0  ;;  %v1179_v36 = vpop.f32.mrb[98].mxu1 }
 0x1d7   :  { %v1231_v37 = vmax.f32 %v977_v31, 0.0  ;;  %v1281_v38 = vmax.f32 %v1177_v32, 0.0  ;;  %v980_v39 = vadd.f32 %v3136_v42, %v979_v35  ;;  %v1180_v40 = vadd.f32 %v3136_v42, %v1179_v36  ;;  %v981_v41 = vpop.f32.mrb[99].mxu0  ;;  %v1181_v43 = vpop.f32.mrb[99].mxu1 }
 0x1d9   :  { %v2053_v44 = vpack.c.bf16 %v1231_v37, %v1231_v37  ;;  %v2103_v45 = vpack.c.bf16 %v1281_v38, %v1281_v38  ;;  %v1232_v46 = vmax.f32 %v980_v39, 0.0  ;;  %v1282_v47 = vmax.f32 %v1180_v40, 0.0 }
 0x1db   :  { %1732 = vst.msk [vmem:[%s3219_s3 + $0xc0] sm:$0xf] %vm1683_vm0, %v2053_v44  ;;  %1782 = vst.msk [vmem:[%s3219_s3 + $0x188] sm:$0xf] %vm1683_vm0, %v2103_v45  ;;  %v2054_v48 = vpack.c.bf16 %v1232_v46, %v1232_v46  ;;  %v2104_v53 = vpack.c.bf16 %v1282_v47, %v1282_v47 }
 0x1dd   :  { %1733 = vst.msk [vmem:[%s3219_s3 + $0xc4] sm:$0xf] %vm1683_vm0, %v2054_v48  ;;  %1783 = vst.msk [vmem:[%s3219_s3 + $0x18c] sm:$0xf] %vm1683_vm0, %v2104_v53 }

// kernel: network_forward.5
= control target key start
LH: loop header
LB: loop body
LE: loop exit
PB: predicated region body
PF: predicated region fallthrough
CT: control target
= control target key end

     0   :  { %vm880_vm0 = vcmask 519168   ;;  %s1637_s1 = inlined_call_operand.vmem [shape: bf16[512,64], index: 1, kind: input, shape index: {}]   ;;  %s1638_s0 = inlined_call_operand.vmem [shape: bf16[168,512], index: 0, kind: input, shape index: {}]   ;;  %s1639_s2 = inlined_call_operand.vmem [shape: f32[1,64], index: 2, kind: input, shape index: {}]   ;;  %s1640_s3 = inlined_call_operand.vmem [shape: bf16[168,64], index: 3, kind: output, shape index: {}]  }
   0x1   :  { %v1189_v0 = vld [vmem:[%s1637_s1 + $0x40] sm:$0xff]   ;;  %v1193_v4 = vld [vmem:[%s1637_s1 + $0x48] sm:$0xff]   ;;  %v1197_v8 = vld [vmem:[%s1637_s1 + $0x50] sm:$0xff]  }
   0x2   :  { %v1190_v1 = vld [vmem:[%s1637_s1 + $0xc0] sm:$0xff]   ;;  %1025 = vmatprep.subr.bf16.mxu0 %v1189_v0  ;;  %v1194_v5 = vld [vmem:[%s1637_s1 + $0xc8] sm:$0xff]   ;;  %v1198_v9 = vld [vmem:[%s1637_s1 + $0xd0] sm:$0xff]  }
   0x3   :  { %v1191_v2 = vld [vmem:[%s1637_s1] sm:$0xff]   ;;  %1107 = vmatprep.subr.bf16.mxu1 %v1190_v1  ;;  %v1195_v6 = vld [vmem:[%s1637_s1 + $0x8] sm:$0xff]   ;;  %v1199_v10 = vld [vmem:[%s1637_s1 + $0x10] sm:$0xff]  }
   0x4   :  { %v1192_v3 = vld [vmem:[%s1637_s1 + $0x80] sm:$0xff]   ;;  %1026 = vmatpush3.bf16.msra.mxu0 %v1191_v2  ;;  %v1196_v7 = vld [vmem:[%s1637_s1 + $0x88] sm:$0xff]   ;;  %v1200_v11 = vld [vmem:[%s1637_s1 + $0x90] sm:$0xff]  }
   0x5   :  { %1108 = vmatpush3.bf16.msra.mxu1 %v1192_v3  ;;  %1027 = vmatprep.subr.bf16.mxu0 %v1193_v4  ;;  %v1201_v12 = vld [vmem:[%s1637_s1 + $0x58] sm:$0xff]   ;;  %v1205_v16 = vld [vmem:[%s1637_s1 + $0x60] sm:$0xff]   ;;  %v1209_v20 = vld [vmem:[%s1637_s1 + $0x68] sm:$0xff]  }
   0x6   :  { %1109 = vmatprep.subr.bf16.mxu1 %v1194_v5  ;;  %v1202_v13 = vld [vmem:[%s1637_s1 + $0xd8] sm:$0xff]   ;;  %v1206_v17 = vld [vmem:[%s1637_s1 + $0xe0] sm:$0xff]   ;;  %v1210_v21 = vld [vmem:[%s1637_s1 + $0xe8] sm:$0xff]  }
   0x7   :  { %v1203_v14 = vld [vmem:[%s1637_s1 + $0x18] sm:$0xff]   ;;  %v1207_v18 = vld [vmem:[%s1637_s1 + $0x20] sm:$0xff]   ;;  %v1211_v22 = vld [vmem:[%s1637_s1 + $0x28] sm:$0xff]  }
   0x8   :  { %1028 = vmatpush3.bf16.msra.mxu0 %v1195_v6  ;;  %v1204_v15 = vld [vmem:[%s1637_s1 + $0x98] sm:$0xff]   ;;  %v1208_v19 = vld [vmem:[%s1637_s1 + $0xa0] sm:$0xff]   ;;  %v1212_v23 = vld [vmem:[%s1637_s1 + $0xa8] sm:$0xff]  }
   0x9   :  { %1110 = vmatpush3.bf16.msra.mxu1 %v1196_v7  ;;  %1029 = vmatprep.subr.bf16.mxu0 %v1197_v8  ;;  %v1213_v24 = vld [vmem:[%s1637_s1 + $0x70] sm:$0xff]   ;;  %v1217_v28 = vld [vmem:[%s1637_s1 + $0x78] sm:$0xff]   ;;  %v55_v6 = vld [vmem:[%s1638_s0 + $0x140] sm:$0xff] }
   0xa   :  { %1111 = vmatprep.subr.bf16.mxu1 %v1198_v9  ;;  %v1214_v25 = vld [vmem:[%s1637_s1 + $0xf0] sm:$0xff]   ;;  %v1218_v29 = vld [vmem:[%s1637_s1 + $0xf8] sm:$0xff]   ;;  %v56_v7 = vld [vmem:[%s1638_s0 + $0x148] sm:$0xff] }
   0xb   :  { %v1215_v26 = vld [vmem:[%s1637_s1 + $0x30] sm:$0xff]   ;;  %v1219_v30 = vld [vmem:[%s1637_s1 + $0x38] sm:$0xff]  }
   0xc   :  { %1030 = vmatpush3.bf16.msra.mxu0 %v1199_v10  ;;  %v1216_v27 = vld [vmem:[%s1637_s1 + $0xb0] sm:$0xff]   ;;  %v1220_v31 = vld [vmem:[%s1637_s1 + $0xb8] sm:$0xff]   ;;  %v948_v10 = vcombine.high %v55_v6, %v55_v6 }
   0xd   :  { %1112 = vmatpush3.bf16.msra.mxu1 %v1200_v11  ;;  %1031 = vmatprep.subr.bf16.mxu0 %v1201_v12  ;;  %v1221_v32 = vld [vmem:[%s1638_s0] ss:$16 sps:$4 sm:$0xff]   ;;  %v1223_v33 = vld [vmem:[%s1638_s0 + $0x4] ss:$16 sps:$4 sm:$0xff]   ;;  %v1224_v34 = vld [vmem:[%s1638_s0 + $0x8] ss:$16 sps:$4 sm:$0xff]   ;;  %v950_v11 = vcombine.high %v56_v7, %v56_v7  ;;  %v947_v12 = vcombine.low %v55_v6, %v55_v6 }
   0xe   :  { %1113 = vmatprep.subr.bf16.mxu1 %v1202_v13  ;;  %v1226_v35 = vld [vmem:[%s1638_s0 + $0xc] ss:$16 sps:$4 sm:$0xff]   ;;  %566 = vmatprep.mubr.bf16.mxu0 %v1223_v33  ;;  %v1227_v36 = vld [vmem:[%s1638_s0 + $0x24] ss:$16 sps:$4 sm:$0xff]   ;;  %v1231_v38 = vld [vmem:[%s1638_s0 + $0x20] ss:$16 sps:$4 sm:$0xff]   ;;  %v949_v13 = vcombine.low %v56_v7, %v56_v7 }
   0xf   :  { %686 = vmatprep.mubr.bf16.mxu1 %v1226_v35  ;;  %v1229_v37 = vld [vmem:[%s1638_s0 + $0x2c] ss:$16 sps:$4 sm:$0xff]   ;;  %v1232_v39 = vld [vmem:[%s1638_s0 + $0x28] ss:$16 sps:$4 sm:$0xff]   ;;  %v1233_v40 = vld [vmem:[%s1638_s0 + $0x44] ss:$16 sps:$4 sm:$0xff]  }
  0x10   :  { %1032 = vmatpush3.bf16.msra.mxu0 %v1203_v14  ;;  %v1235_v41 = vld [vmem:[%s1638_s0 + $0x4c] ss:$16 sps:$4 sm:$0xff]   ;;  %v1237_v42 = vld [vmem:[%s1638_s0 + $0x40] ss:$16 sps:$4 sm:$0xff]   ;;  %v1238_v43 = vld [vmem:[%s1638_s0 + $0x48] ss:$16 sps:$4 sm:$0xff]  }
  0x11   :  { %1114 = vmatpush3.bf16.msra.mxu1 %v1204_v15  ;;  %1033 = vmatprep.subr.bf16.mxu0 %v1205_v16  ;;  %v1239_v44 = vld [vmem:[%s1638_s0 + $0x64] ss:$16 sps:$4 sm:$0xff]   ;;  %v1241_v45 = vld [vmem:[%s1638_s0 + $0x6c] ss:$16 sps:$4 sm:$0xff]   ;;  %v1243_v46 = vld [vmem:[%s1638_s0 + $0x60] ss:$16 sps:$4 sm:$0xff]  }
  0x12   :  { %1115 = vmatprep.subr.bf16.mxu1 %v1206_v17  ;;  %v1244_v47 = vld [vmem:[%s1638_s0 + $0x68] ss:$16 sps:$4 sm:$0xff]   ;;  %v1245_v48 = vld [vmem:[%s1638_s0 + $0x84] ss:$16 sps:$4 sm:$0xff]   ;;  %v1247_v49 = vld [vmem:[%s1638_s0 + $0x8c] ss:$16 sps:$4 sm:$0xff]  }
  0x13   :  { %v1249_v50 = vld [vmem:[%s1638_s0 + $0x80] ss:$16 sps:$4 sm:$0xff]   ;;  %v1250_v51 = vld [vmem:[%s1638_s0 + $0x88] ss:$16 sps:$4 sm:$0xff]   ;;  %v1251_v52 = vld [vmem:[%s1638_s0 + $0xa4] ss:$16 sps:$4 sm:$0xff]  }
  0x14   :  { %1034 = vmatpush3.bf16.msra.mxu0 %v1207_v18  ;;  %v1253_v53 = vld [vmem:[%s1638_s0 + $0xac] ss:$16 sps:$4 sm:$0xff]   ;;  %v1255_v54 = vld [vmem:[%s1638_s0 + $0xa0] ss:$16 sps:$4 sm:$0xff]   ;;  %v1256_v55 = vld [vmem:[%s1638_s0 + $0xa8] ss:$16 sps:$4 sm:$0xff]  }
  0x15   :  { %1116 = vmatpush3.bf16.msra.mxu1 %v1208_v19  ;;  %1035 = vmatprep.subr.bf16.mxu0 %v1209_v20  ;;  %v1257_v56 = vld [vmem:[%s1638_s0 + $0xc4] ss:$16 sps:$4 sm:$0xff]   ;;  %v1259_v57 = vld [vmem:[%s1638_s0 + $0xcc] ss:$16 sps:$4 sm:$0xff]   ;;  %v1261_v58 = vld [vmem:[%s1638_s0 + $0xc0] ss:$16 sps:$4 sm:$0xff]  }
  0x16   :  { %1117 = vmatprep.subr.bf16.mxu1 %v1210_v21  ;;  %v1262_v59 = vld [vmem:[%s1638_s0 + $0xc8] ss:$16 sps:$4 sm:$0xff]   ;;  %v1263_v60 = vld [vmem:[%s1638_s0 + $0xe4] ss:$16 sps:$4 sm:$0xff]   ;;  %v1265_v61 = vld [vmem:[%s1638_s0 + $0xec] ss:$16 sps:$4 sm:$0xff]  }
  0x17   :  { %v1267_v62 = vld [vmem:[%s1638_s0 + $0xe0] ss:$16 sps:$4 sm:$0xff]   ;;  %v1268_v63 = vld [vmem:[%s1638_s0 + $0xe8] ss:$16 sps:$4 sm:$0xff]   ;;  %v1269_v0 = vld [vmem:[%s1638_s0 + $0x104] ss:$16 sps:$4 sm:$0xff]  }
  0x18   :  { %1036 = vmatpush3.bf16.msra.mxu0 %v1211_v22  ;;  %v1271_v1 = vld [vmem:[%s1638_s0 + $0x10c] ss:$16 sps:$4 sm:$0xff]   ;;  %v1273_v2 = vld [vmem:[%s1638_s0 + $0x100] ss:$16 sps:$4 sm:$0xff]   ;;  %v1274_v3 = vld [vmem:[%s1638_s0 + $0x108] ss:$16 sps:$4 sm:$0xff]  }
  0x19   :  { %1118 = vmatpush3.bf16.msra.mxu1 %v1212_v23  ;;  %1037 = vmatprep.subr.bf16.mxu0 %v1213_v24  ;;  %v1275_v4 = vld [vmem:[%s1638_s0 + $0x124] ss:$16 sps:$4 sm:$0xff]   ;;  %v1277_v5 = vld [vmem:[%s1638_s0 + $0x12c] ss:$16 sps:$4 sm:$0xff]   ;;  %v1279_v8 = vld [vmem:[%s1638_s0 + $0x120] ss:$16 sps:$4 sm:$0xff]  }
  0x1a   :  { %1119 = vmatprep.subr.bf16.mxu1 %v1214_v25  ;;  %v1280_v9 = vld [vmem:[%s1638_s0 + $0x128] ss:$16 sps:$4 sm:$0xff]   ;;  %v1530_v16 = vld [vmem:[%s1639_s2] ss:$0 sm:$0xff] }
  0x1c   :  { %1038 = vmatpush3.bf16.msra.mxu0 %v1215_v26 }
  0x1d   :  { %1120 = vmatpush3.bf16.msra.mxu1 %v1216_v27  ;;  %1039 = vmatprep.subr.bf16.mxu0 %v1217_v28 }
  0x1e   :  { %1121 = vmatprep.subr.bf16.mxu1 %v1218_v29 }
  0x20   :  { %1040 = vmatpush3.bf16.msra.mxu0 %v1219_v30 }
  0x21   :  { %1122 = vmatpush3.bf16.msra.mxu1 %v1220_v31 }
  0x23   :  { %567 = vmatmul.mubr.bf16.vlgmr.msra.gmra.mrb[0].mxu0 %v1221_v32 }
  0x24   :  { %687 = vmatmul.mubr.bf16.vlgmr.msra.gmra.mrb[0].mxu1 %v1224_v34  ;;  %574 = vmatprep.mubr.bf16.mxu0 %v1227_v36 }
  0x25   :  { %694 = vmatprep.mubr.bf16.mxu1 %v1229_v37 }
  0x2b   :  { %575 = vmatmul.mubr.bf16.gmra.mrb[4].mxu0 %v1231_v38 }
  0x2c   :  { %695 = vmatmul.mubr.bf16.gmra.mrb[4].mxu1 %v1232_v39  ;;  %582 = vmatprep.mubr.bf16.mxu0 %v1233_v40 }
  0x2d   :  { %702 = vmatprep.mubr.bf16.mxu1 %v1235_v41 }
  0x33   :  { %583 = vmatmul.mubr.bf16.gmra.mrb[8].mxu0 %v1237_v42 }
  0x34   :  { %703 = vmatmul.mubr.bf16.gmra.mrb[8].mxu1 %v1238_v43  ;;  %590 = vmatprep.mubr.bf16.mxu0 %v1239_v44 }
  0x35   :  { %710 = vmatprep.mubr.bf16.mxu1 %v1241_v45 }
  0x3b   :  { %591 = vmatmul.mubr.bf16.gmra.mrb[12].mxu0 %v1243_v46 }
  0x3c   :  { %711 = vmatmul.mubr.bf16.gmra.mrb[12].mxu1 %v1244_v47  ;;  %598 = vmatprep.mubr.bf16.mxu0 %v1245_v48 }
  0x3d   :  { %718 = vmatprep.mubr.bf16.mxu1 %v1247_v49 }
  0x43   :  { %599 = vmatmul.mubr.bf16.gmra.mrb[16].mxu0 %v1249_v50 }
  0x44   :  { %719 = vmatmul.mubr.bf16.gmra.mrb[16].mxu1 %v1250_v51  ;;  %606 = vmatprep.mubr.bf16.mxu0 %v1251_v52 }
  0x45   :  { %726 = vmatprep.mubr.bf16.mxu1 %v1253_v53 }
  0x4b   :  { %607 = vmatmul.mubr.bf16.gmra.mrb[20].mxu0 %v1255_v54 }
  0x4c   :  { %727 = vmatmul.mubr.bf16.gmra.mrb[20].mxu1 %v1256_v55  ;;  %614 = vmatprep.mubr.bf16.mxu0 %v1257_v56 }
  0x4d   :  { %734 = vmatprep.mubr.bf16.mxu1 %v1259_v57 }
  0x53   :  { %615 = vmatmul.mubr.bf16.gmra.mrb[24].mxu0 %v1261_v58 }
  0x54   :  { %735 = vmatmul.mubr.bf16.gmra.mrb[24].mxu1 %v1262_v59  ;;  %622 = vmatprep.mubr.bf16.mxu0 %v1263_v60 }
  0x55   :  { %742 = vmatprep.mubr.bf16.mxu1 %v1265_v61 }
  0x5b   :  { %623 = vmatmul.mubr.bf16.gmra.mrb[28].mxu0 %v1267_v62 }
  0x5c   :  { %743 = vmatmul.mubr.bf16.gmra.mrb[28].mxu1 %v1268_v63  ;;  %630 = vmatprep.mubr.bf16.mxu0 %v1269_v0 }
  0x5d   :  { %750 = vmatprep.mubr.bf16.mxu1 %v1271_v1 }
  0x63   :  { %631 = vmatmul.mubr.bf16.gmra.mrb[32].mxu0 %v1273_v2 }
  0x64   :  { %751 = vmatmul.mubr.bf16.gmra.mrb[32].mxu1 %v1274_v3  ;;  %638 = vmatprep.mubr.bf16.mxu0 %v1275_v4 }
  0x65   :  { %758 = vmatprep.mubr.bf16.mxu1 %v1277_v5 }
  0x6b   :  { %639 = vmatmul.mubr.bf16.gmra.mrb[36].mxu0 %v1279_v8 }
  0x6c   :  { %759 = vmatmul.mubr.bf16.gmra.mrb[36].mxu1 %v1280_v9  ;;  %646 = vmatprep.mubr.bf16.mxu0 %v948_v10 }
  0x6d   :  { %766 = vmatprep.mubr.bf16.mxu1 %v950_v11 }
  0x73   :  { %647 = vmatmul.mubr.bf16.gmra.mrb[40].mxu0 %v947_v12 }
  0x74   :  { %767 = vmatmul.mubr.bf16.gmra.mrb[40].mxu1 %v949_v13 }
  0xf6   :  { %v1041_v14 = vpop.f32.mrb[0].mxu0 }
  0xf7   :  { %v1123_v15 = vpop.f32.mrb[0].mxu1  ;;  %v1042_v17 = vpop.f32.mrb[1].mxu0 }
  0xf8   :  { %v1043_v18 = vadd.f32 %v1042_v17, %v1041_v14  ;;  %v1124_v19 = vpop.f32.mrb[1].mxu1  ;;  %v1044_v20 = vpop.f32.mrb[2].mxu0 }
  0xf9   :  { %v1125_v21 = vadd.f32 %v1124_v19, %v1123_v15  ;;  %v1126_v22 = vpop.f32.mrb[2].mxu1  ;;  %v1045_v23 = vpop.f32.mrb[3].mxu0 }
  0xfa   :  { %v569_v24 = vadd.f32 %v1043_v18, %v1530_v16  ;;  %v1046_v25 = vadd.f32 %v1045_v23, %v1044_v20  ;;  %v1127_v26 = vpop.f32.mrb[3].mxu1 }
  0xfb   :  { %v1128_v27 = vadd.f32 %v1127_v26, %v1126_v22 }
  0xfc   :  { %v689_v28 = vadd.f32 %v1125_v21, %v569_v24  ;;  %v572_v29 = vadd.f32 %v1046_v25, %v1530_v16 }
  0xfe   :  { %v774_v30 = vmax.f32 %v689_v28, 0.0  ;;  %v692_v31 = vadd.f32 %v1128_v27, %v572_v29  ;;  %v1047_v32 = vpop.f32.mrb[4].mxu0 }
  0xff   :  { %v1129_v33 = vpop.f32.mrb[4].mxu1  ;;  %v1048_v34 = vpop.f32.mrb[5].mxu0 }
 0x100   :  { %v1004_v35 = vpack.c.bf16 %v774_v30, %v774_v30  ;;  %v775_v36 = vmax.f32 %v692_v31, 0.0  ;;  %v1049_v37 = vadd.f32 %v1048_v34, %v1047_v32  ;;  %v1130_v38 = vpop.f32.mrb[5].mxu1  ;;  %v1050_v39 = vpop.f32.mrb[6].mxu0 }
 0x101   :  { %v1131_v40 = vadd.f32 %v1130_v38, %v1129_v33  ;;  %v1132_v41 = vpop.f32.mrb[6].mxu1  ;;  %v1051_v42 = vpop.f32.mrb[7].mxu0 }
 0x102   :  { %881 = vst.msk [vmem:[%s1640_s3] sm:$0xf] %vm880_vm0, %v1004_v35  ;;  %v1005_v43 = vpack.c.bf16 %v775_v36, %v775_v36  ;;  %v577_v44 = vadd.f32 %v1049_v37, %v1530_v16  ;;  %v1052_v45 = vadd.f32 %v1051_v42, %v1050_v39  ;;  %v1133_v46 = vpop.f32.mrb[7].mxu1 }
 0x103   :  { %v1134_v47 = vadd.f32 %v1133_v46, %v1132_v41 }
 0x104   :  { %882 = vst.msk [vmem:[%s1640_s3 + $0x4] sm:$0xf] %vm880_vm0, %v1005_v43  ;;  %v697_v48 = vadd.f32 %v1131_v40, %v577_v44  ;;  %v580_v49 = vadd.f32 %v1052_v45, %v1530_v16 }
 0x106   :  { %v776_v50 = vmax.f32 %v697_v48, 0.0  ;;  %v700_v51 = vadd.f32 %v1134_v47, %v580_v49  ;;  %v1053_v52 = vpop.f32.mrb[8].mxu0 }
 0x107   :  { %v1135_v53 = vpop.f32.mrb[8].mxu1  ;;  %v1054_v54 = vpop.f32.mrb[9].mxu0 }
 0x108   :  { %v1006_v55 = vpack.c.bf16 %v776_v50, %v776_v50  ;;  %v777_v56 = vmax.f32 %v700_v51, 0.0  ;;  %v1055_v57 = vadd.f32 %v1054_v54, %v1053_v52  ;;  %v1136_v58 = vpop.f32.mrb[9].mxu1  ;;  %v1056_v59 = vpop.f32.mrb[10].mxu0 }
 0x109   :  { %v1137_v60 = vadd.f32 %v1136_v58, %v1135_v53  ;;  %v1138_v61 = vpop.f32.mrb[10].mxu1  ;;  %v1057_v62 = vpop.f32.mrb[11].mxu0 }
 0x10a   :  { %883 = vst.msk [vmem:[%s1640_s3 + $0x8] sm:$0xf] %vm880_vm0, %v1006_v55  ;;  %v1007_v63 = vpack.c.bf16 %v777_v56, %v777_v56  ;;  %v585_v0 = vadd.f32 %v1055_v57, %v1530_v16  ;;  %v1058_v1 = vadd.f32 %v1057_v62, %v1056_v59  ;;  %v1139_v2 = vpop.f32.mrb[11].mxu1 }
 0x10b   :  { %v1140_v3 = vadd.f32 %v1139_v2, %v1138_v61 }
 0x10c   :  { %884 = vst.msk [vmem:[%s1640_s3 + $0xc] sm:$0xf] %vm880_vm0, %v1007_v63  ;;  %v705_v4 = vadd.f32 %v1137_v60, %v585_v0  ;;  %v588_v5 = vadd.f32 %v1058_v1, %v1530_v16 }
 0x10e   :  { %v778_v6 = vmax.f32 %v705_v4, 0.0  ;;  %v708_v7 = vadd.f32 %v1140_v3, %v588_v5  ;;  %v1059_v8 = vpop.f32.mrb[12].mxu0 }
 0x10f   :  { %v1141_v9 = vpop.f32.mrb[12].mxu1  ;;  %v1060_v10 = vpop.f32.mrb[13].mxu0 }
 0x110   :  { %v1008_v11 = vpack.c.bf16 %v778_v6, %v778_v6  ;;  %v779_v12 = vmax.f32 %v708_v7, 0.0  ;;  %v1061_v13 = vadd.f32 %v1060_v10, %v1059_v8  ;;  %v1142_v14 = vpop.f32.mrb[13].mxu1  ;;  %v1062_v15 = vpop.f32.mrb[14].mxu0 }
 0x111   :  { %v1143_v17 = vadd.f32 %v1142_v14, %v1141_v9  ;;  %v1144_v18 = vpop.f32.mrb[14].mxu1  ;;  %v1063_v19 = vpop.f32.mrb[15].mxu0 }
 0x112   :  { %885 = vst.msk [vmem:[%s1640_s3 + $0x10] sm:$0xf] %vm880_vm0, %v1008_v11  ;;  %v1009_v20 = vpack.c.bf16 %v779_v12, %v779_v12  ;;  %v593_v21 = vadd.f32 %v1061_v13, %v1530_v16  ;;  %v1064_v22 = vadd.f32 %v1063_v19, %v1062_v15  ;;  %v1145_v23 = vpop.f32.mrb[15].mxu1 }
 0x113   :  { %v1146_v24 = vadd.f32 %v1145_v23, %v1144_v18 }
 0x114   :  { %886 = vst.msk [vmem:[%s1640_s3 + $0x14] sm:$0xf] %vm880_vm0, %v1009_v20  ;;  %v713_v25 = vadd.f32 %v1143_v17, %v593_v21  ;;  %v596_v26 = vadd.f32 %v1064_v22, %v1530_v16 }
 0x116   :  { %v780_v27 = vmax.f32 %v713_v25, 0.0  ;;  %v716_v28 = vadd.f32 %v1146_v24, %v596_v26  ;;  %v1065_v29 = vpop.f32.mrb[16].mxu0 }
 0x117   :  { %v1147_v30 = vpop.f32.mrb[16].mxu1  ;;  %v1066_v31 = vpop.f32.mrb[17].mxu0 }
 0x118   :  { %v1010_v32 = vpack.c.bf16 %v780_v27, %v780_v27  ;;  %v781_v33 = vmax.f32 %v716_v28, 0.0  ;;  %v1067_v34 = vadd.f32 %v1066_v31, %v1065_v29  ;;  %v1148_v35 = vpop.f32.mrb[17].mxu1  ;;  %v1068_v36 = vpop.f32.mrb[18].mxu0 }
 0x119   :  { %v1149_v37 = vadd.f32 %v1148_v35, %v1147_v30  ;;  %v1150_v38 = vpop.f32.mrb[18].mxu1  ;;  %v1069_v39 = vpop.f32.mrb[19].mxu0 }
 0x11a   :  { %887 = vst.msk [vmem:[%s1640_s3 + $0x18] sm:$0xf] %vm880_vm0, %v1010_v32  ;;  %v1011_v40 = vpack.c.bf16 %v781_v33, %v781_v33  ;;  %v601_v41 = vadd.f32 %v1067_v34, %v1530_v16  ;;  %v1070_v42 = vadd.f32 %v1069_v39, %v1068_v36  ;;  %v1151_v43 = vpop.f32.mrb[19].mxu1 }
 0x11b   :  { %v1152_v44 = vadd.f32 %v1151_v43, %v1150_v38 }
 0x11c   :  { %888 = vst.msk [vmem:[%s1640_s3 + $0x1c] sm:$0xf] %vm880_vm0, %v1011_v40  ;;  %v721_v45 = vadd.f32 %v1149_v37, %v601_v41  ;;  %v604_v46 = vadd.f32 %v1070_v42, %v1530_v16 }
 0x11e   :  { %v782_v47 = vmax.f32 %v721_v45, 0.0  ;;  %v724_v48 = vadd.f32 %v1152_v44, %v604_v46  ;;  %v1071_v49 = vpop.f32.mrb[20].mxu0 }
 0x11f   :  { %v1153_v50 = vpop.f32.mrb[20].mxu1  ;;  %v1072_v51 = vpop.f32.mrb[21].mxu0 }
 0x120   :  { %v1012_v52 = vpack.c.bf16 %v782_v47, %v782_v47  ;;  %v783_v53 = vmax.f32 %v724_v48, 0.0  ;;  %v1073_v54 = vadd.f32 %v1072_v51, %v1071_v49  ;;  %v1154_v55 = vpop.f32.mrb[21].mxu1  ;;  %v1074_v56 = vpop.f32.mrb[22].mxu0 }
 0x121   :  { %v1155_v57 = vadd.f32 %v1154_v55, %v1153_v50  ;;  %v1156_v58 = vpop.f32.mrb[22].mxu1  ;;  %v1075_v59 = vpop.f32.mrb[23].mxu0 }
 0x122   :  { %889 = vst.msk [vmem:[%s1640_s3 + $0x20] sm:$0xf] %vm880_vm0, %v1012_v52  ;;  %v1013_v60 = vpack.c.bf16 %v783_v53, %v783_v53  ;;  %v609_v61 = vadd.f32 %v1073_v54, %v1530_v16  ;;  %v1076_v62 = vadd.f32 %v1075_v59, %v1074_v56  ;;  %v1157_v63 = vpop.f32.mrb[23].mxu1 }
 0x123   :  { %v1158_v0 = vadd.f32 %v1157_v63, %v1156_v58 }
 0x124   :  { %890 = vst.msk [vmem:[%s1640_s3 + $0x24] sm:$0xf] %vm880_vm0, %v1013_v60  ;;  %v729_v1 = vadd.f32 %v1155_v57, %v609_v61  ;;  %v612_v2 = vadd.f32 %v1076_v62, %v1530_v16 }
 0x126   :  { %v784_v3 = vmax.f32 %v729_v1, 0.0  ;;  %v732_v4 = vadd.f32 %v1158_v0, %v612_v2  ;;  %v1077_v5 = vpop.f32.mrb[24].mxu0 }
 0x127   :  { %v1159_v6 = vpop.f32.mrb[24].mxu1  ;;  %v1078_v7 = vpop.f32.mrb[25].mxu0 }
 0x128   :  { %v1014_v8 = vpack.c.bf16 %v784_v3, %v784_v3  ;;  %v785_v9 = vmax.f32 %v732_v4, 0.0  ;;  %v1079_v10 = vadd.f32 %v1078_v7, %v1077_v5  ;;  %v1160_v11 = vpop.f32.mrb[25].mxu1  ;;  %v1080_v12 = vpop.f32.mrb[26].mxu0 }
 0x129   :  { %v1161_v13 = vadd.f32 %v1160_v11, %v1159_v6  ;;  %v1162_v14 = vpop.f32.mrb[26].mxu1  ;;  %v1081_v15 = vpop.f32.mrb[27].mxu0 }
 0x12a   :  { %891 = vst.msk [vmem:[%s1640_s3 + $0x28] sm:$0xf] %vm880_vm0, %v1014_v8  ;;  %v1015_v17 = vpack.c.bf16 %v785_v9, %v785_v9  ;;  %v617_v18 = vadd.f32 %v1079_v10, %v1530_v16  ;;  %v1082_v19 = vadd.f32 %v1081_v15, %v1080_v12  ;;  %v1163_v20 = vpop.f32.mrb[27].mxu1 }
 0x12b   :  { %v1164_v21 = vadd.f32 %v1163_v20, %v1162_v14 }
 0x12c   :  { %892 = vst.msk [vmem:[%s1640_s3 + $0x2c] sm:$0xf] %vm880_vm0, %v1015_v17  ;;  %v737_v22 = vadd.f32 %v1161_v13, %v617_v18  ;;  %v620_v23 = vadd.f32 %v1082_v19, %v1530_v16 }
 0x12e   :  { %v786_v24 = vmax.f32 %v737_v22, 0.0  ;;  %v740_v25 = vadd.f32 %v1164_v21, %v620_v23  ;;  %v1083_v26 = vpop.f32.mrb[28].mxu0 }
 0x12f   :  { %v1165_v27 = vpop.f32.mrb[28].mxu1  ;;  %v1084_v28 = vpop.f32.mrb[29].mxu0 }
 0x130   :  { %v1016_v29 = vpack.c.bf16 %v786_v24, %v786_v24  ;;  %v787_v30 = vmax.f32 %v740_v25, 0.0  ;;  %v1085_v31 = vadd.f32 %v1084_v28, %v1083_v26  ;;  %v1166_v32 = vpop.f32.mrb[29].mxu1  ;;  %v1086_v33 = vpop.f32.mrb[30].mxu0 }
 0x131   :  { %v1167_v34 = vadd.f32 %v1166_v32, %v1165_v27  ;;  %v1168_v35 = vpop.f32.mrb[30].mxu1  ;;  %v1087_v36 = vpop.f32.mrb[31].mxu0 }
 0x132   :  { %893 = vst.msk [vmem:[%s1640_s3 + $0x30] sm:$0xf] %vm880_vm0, %v1016_v29  ;;  %v1017_v37 = vpack.c.bf16 %v787_v30, %v787_v30  ;;  %v625_v38 = vadd.f32 %v1085_v31, %v1530_v16  ;;  %v1088_v39 = vadd.f32 %v1087_v36, %v1086_v33  ;;  %v1169_v40 = vpop.f32.mrb[31].mxu1 }
 0x133   :  { %v1170_v41 = vadd.f32 %v1169_v40, %v1168_v35 }
 0x134   :  { %894 = vst.msk [vmem:[%s1640_s3 + $0x34] sm:$0xf] %vm880_vm0, %v1017_v37  ;;  %v745_v42 = vadd.f32 %v1167_v34, %v625_v38  ;;  %v628_v43 = vadd.f32 %v1088_v39, %v1530_v16 }
 0x136   :  { %v788_v44 = vmax.f32 %v745_v42, 0.0  ;;  %v748_v45 = vadd.f32 %v1170_v41, %v628_v43  ;;  %v1089_v46 = vpop.f32.mrb[32].mxu0 }
 0x137   :  { %v1171_v47 = vpop.f32.mrb[32].mxu1  ;;  %v1090_v48 = vpop.f32.mrb[33].mxu0 }
 0x138   :  { %v1018_v49 = vpack.c.bf16 %v788_v44, %v788_v44  ;;  %v789_v50 = vmax.f32 %v748_v45, 0.0  ;;  %v1091_v51 = vadd.f32 %v1090_v48, %v1089_v46  ;;  %v1172_v52 = vpop.f32.mrb[33].mxu1  ;;  %v1092_v53 = vpop.f32.mrb[34].mxu0 }
 0x139   :  { %v1173_v54 = vadd.f32 %v1172_v52, %v1171_v47  ;;  %v1174_v55 = vpop.f32.mrb[34].mxu1  ;;  %v1093_v56 = vpop.f32.mrb[35].mxu0 }
 0x13a   :  { %895 = vst.msk [vmem:[%s1640_s3 + $0x38] sm:$0xf] %vm880_vm0, %v1018_v49  ;;  %v1019_v57 = vpack.c.bf16 %v789_v50, %v789_v50  ;;  %v633_v58 = vadd.f32 %v1091_v51, %v1530_v16  ;;  %v1094_v59 = vadd.f32 %v1093_v56, %v1092_v53  ;;  %v1175_v60 = vpop.f32.mrb[35].mxu1 }
 0x13b   :  { %v1176_v61 = vadd.f32 %v1175_v60, %v1174_v55 }
 0x13c   :  { %896 = vst.msk [vmem:[%s1640_s3 + $0x3c] sm:$0xf] %vm880_vm0, %v1019_v57  ;;  %v753_v62 = vadd.f32 %v1173_v54, %v633_v58  ;;  %v636_v63 = vadd.f32 %v1094_v59, %v1530_v16 }
 0x13e   :  { %v790_v0 = vmax.f32 %v753_v62, 0.0  ;;  %v756_v1 = vadd.f32 %v1176_v61, %v636_v63  ;;  %v1095_v2 = vpop.f32.mrb[36].mxu0 }
 0x13f   :  { %v1177_v3 = vpop.f32.mrb[36].mxu1  ;;  %v1096_v4 = vpop.f32.mrb[37].mxu0 }
 0x140   :  { %v1020_v5 = vpack.c.bf16 %v790_v0, %v790_v0  ;;  %v791_v6 = vmax.f32 %v756_v1, 0.0  ;;  %v1097_v7 = vadd.f32 %v1096_v4, %v1095_v2  ;;  %v1178_v8 = vpop.f32.mrb[37].mxu1  ;;  %v1098_v9 = vpop.f32.mrb[38].mxu0 }
 0x141   :  { %v1179_v10 = vadd.f32 %v1178_v8, %v1177_v3  ;;  %v1180_v11 = vpop.f32.mrb[38].mxu1  ;;  %v1099_v12 = vpop.f32.mrb[39].mxu0 }
 0x142   :  { %897 = vst.msk [vmem:[%s1640_s3 + $0x40] sm:$0xf] %vm880_vm0, %v1020_v5  ;;  %v1021_v13 = vpack.c.bf16 %v791_v6, %v791_v6  ;;  %v641_v14 = vadd.f32 %v1097_v7, %v1530_v16  ;;  %v1100_v15 = vadd.f32 %v1099_v12, %v1098_v9  ;;  %v1181_v17 = vpop.f32.mrb[39].mxu1 }
 0x143   :  { %v1182_v18 = vadd.f32 %v1181_v17, %v1180_v11 }
 0x144   :  { %898 = vst.msk [vmem:[%s1640_s3 + $0x44] sm:$0xf] %vm880_vm0, %v1021_v13  ;;  %v761_v19 = vadd.f32 %v1179_v10, %v641_v14  ;;  %v644_v20 = vadd.f32 %v1100_v15, %v1530_v16 }
 0x146   :  { %v792_v21 = vmax.f32 %v761_v19, 0.0  ;;  %v764_v22 = vadd.f32 %v1182_v18, %v644_v20  ;;  %v1101_v23 = vpop.f32.mrb[40].mxu0 }
 0x147   :  { %v1183_v24 = vpop.f32.mrb[40].mxu1  ;;  %v1102_v25 = vpop.f32.mrb[41].mxu0 }
 0x148   :  { %v1022_v26 = vpack.c.bf16 %v792_v21, %v792_v21  ;;  %v793_v27 = vmax.f32 %v764_v22, 0.0  ;;  %v1103_v28 = vadd.f32 %v1102_v25, %v1101_v23  ;;  %v1184_v29 = vpop.f32.mrb[41].mxu1  ;;  %v1104_v30 = vpop.f32.mrb[42].mxu0 }
 0x149   :  { %v1185_v31 = vadd.f32 %v1184_v29, %v1183_v24  ;;  %v1186_v32 = vpop.f32.mrb[42].mxu1  ;;  %v1105_v33 = vpop.f32.mrb[43].mxu0 }
 0x14a   :  { %899 = vst.msk [vmem:[%s1640_s3 + $0x48] sm:$0xf] %vm880_vm0, %v1022_v26  ;;  %v1023_v34 = vpack.c.bf16 %v793_v27, %v793_v27  ;;  %v649_v35 = vadd.f32 %v1103_v28, %v1530_v16  ;;  %v1187_v36 = vpop.f32.mrb[43].mxu1 }
 0x14c   :  { %900 = vst.msk [vmem:[%s1640_s3 + $0x4c] sm:$0xf] %vm880_vm0, %v1023_v34  ;;  %v769_v37 = vadd.f32 %v1185_v31, %v649_v35 }
 0x14e   :  { %v794_v38 = vmax.f32 %v769_v37, 0.0 }
 0x150   :  { %v1024_v39 = vpack.c.bf16 %v794_v38, %v794_v38 }
 0x152   :  { %901 = vst.msk [vmem:[%s1640_s3 + $0x50] sm:$0xf] %vm880_vm0, %v1024_v39 }

// kernel: network_forward.6
= control target key start
LH: loop header
LB: loop body
LE: loop exit
PB: predicated region body
PF: predicated region fallthrough
CT: control target
= control target key end

     0   :  { %v1247_v34 = vmov 0.0   ;;  %vm1248_vm0 = vmmov 0   ;;  %vm516_vm1 = vcmask 523264   ;;  %vm868_vm2 = vcmask 519168   ;;  %s1599_s1 = inlined_call_operand.vmem [shape: bf16[576,64], index: 1, kind: input, shape index: {}]   ;;  %s1600_s0 = inlined_call_operand.vmem [shape: bf16[104,576], index: 0, kind: input, shape index: {}]   ;;  %s1601_s2 = inlined_call_operand.vmem [shape: f32[1,64], index: 2, kind: input, shape index: {}]   ;;  %s1602_s3 = inlined_call_operand.vmem [shape: bf16[104,64], index: 3, kind: output, shape index: {}]  }
   0x1   :  { %v1164_v0 = vld [vmem:[%s1599_s1 + $0x40] sm:$0xff]   ;;  %v1168_v4 = vld [vmem:[%s1599_s1 + $0x48] sm:$0xff]   ;;  %v1172_v8 = vld [vmem:[%s1599_s1 + $0x50] sm:$0xff]  }
   0x2   :  { %v1165_v1 = vld [vmem:[%s1599_s1 + $0xc0] sm:$0xff]   ;;  %991 = vmatprep.subr.bf16.mxu0 %v1164_v0  ;;  %v1169_v5 = vld [vmem:[%s1599_s1 + $0xc8] sm:$0xff]   ;;  %v1173_v9 = vld [vmem:[%s1599_s1 + $0xd0] sm:$0xff]  }
   0x3   :  { %v1166_v2 = vld [vmem:[%s1599_s1] sm:$0xff]   ;;  %1049 = vmatprep.subr.bf16.mxu1 %v1165_v1  ;;  %v1170_v6 = vld [vmem:[%s1599_s1 + $0x8] sm:$0xff]   ;;  %v1174_v10 = vld [vmem:[%s1599_s1 + $0x10] sm:$0xff]  }
   0x4   :  { %v1167_v3 = vld [vmem:[%s1599_s1 + $0x80] sm:$0xff]   ;;  %992 = vmatpush3.bf16.msra.mxu0 %v1166_v2  ;;  %v1171_v7 = vld [vmem:[%s1599_s1 + $0x88] sm:$0xff]   ;;  %v1175_v11 = vld [vmem:[%s1599_s1 + $0x90] sm:$0xff]  }
   0x5   :  { %1050 = vmatpush3.bf16.msra.mxu1 %v1167_v3  ;;  %993 = vmatprep.subr.bf16.mxu0 %v1168_v4  ;;  %v1176_v12 = vld [vmem:[%s1599_s1 + $0x58] sm:$0xff]   ;;  %v1180_v16 = vld [vmem:[%s1599_s1 + $0x60] sm:$0xff]   ;;  %v1184_v20 = vld [vmem:[%s1599_s1 + $0x68] sm:$0xff]  }
   0x6   :  { %1051 = vmatprep.subr.bf16.mxu1 %v1169_v5  ;;  %v1177_v13 = vld [vmem:[%s1599_s1 + $0xd8] sm:$0xff]   ;;  %v1181_v17 = vld [vmem:[%s1599_s1 + $0xe0] sm:$0xff]   ;;  %v1185_v21 = vld [vmem:[%s1599_s1 + $0xe8] sm:$0xff]  }
   0x7   :  { %v1178_v14 = vld [vmem:[%s1599_s1 + $0x18] sm:$0xff]   ;;  %v1182_v18 = vld [vmem:[%s1599_s1 + $0x20] sm:$0xff]   ;;  %v1186_v22 = vld [vmem:[%s1599_s1 + $0x28] sm:$0xff]  }
   0x8   :  { %994 = vmatpush3.bf16.msra.mxu0 %v1170_v6  ;;  %v1179_v15 = vld [vmem:[%s1599_s1 + $0x98] sm:$0xff]   ;;  %v1183_v19 = vld [vmem:[%s1599_s1 + $0xa0] sm:$0xff]   ;;  %v1187_v23 = vld [vmem:[%s1599_s1 + $0xa8] sm:$0xff]  }
   0x9   :  { %1052 = vmatpush3.bf16.msra.mxu1 %v1171_v7  ;;  %995 = vmatprep.subr.bf16.mxu0 %v1172_v8  ;;  %v1188_v24 = vld [vmem:[%s1599_s1 + $0x70] sm:$0xff]   ;;  %v1192_v28 = vld [vmem:[%s1599_s1 + $0x78] sm:$0xff]   ;;  %v1201_v36 = vld [vmem:[%s1600_s0 + $0xc] ss:$20 sps:$4 sm:$0xff]  }
   0xa   :  { %1053 = vmatprep.subr.bf16.mxu1 %v1173_v9  ;;  %v1189_v25 = vld [vmem:[%s1599_s1 + $0xf0] sm:$0xff]   ;;  %v1193_v29 = vld [vmem:[%s1599_s1 + $0xf8] sm:$0xff]   ;;  %v1202_v37 = vld [vmem:[%s1599_s1 + $0x100] sm:$0xff]   ;;  %658 = vmatprep.mubr.bf16.mxu1 %v1201_v36 }
   0xb   :  { %v1190_v26 = vld [vmem:[%s1599_s1 + $0x30] sm:$0xff]   ;;  %v1194_v30 = vld [vmem:[%s1599_s1 + $0x38] sm:$0xff]   ;;  %v1203_v38 = vld [vmem:[%s1600_s0 + $0x2c] ss:$20 sps:$4 sm:$0xff]  }
   0xc   :  { %996 = vmatpush3.bf16.msra.mxu0 %v1174_v10  ;;  %v1191_v27 = vld [vmem:[%s1599_s1 + $0xb0] sm:$0xff]   ;;  %v1195_v31 = vld [vmem:[%s1599_s1 + $0xb8] sm:$0xff]   ;;  %v1213_v43 = vld [vmem:[%s1599_s1 + $0x108] sm:$0xff]  }
   0xd   :  { %1054 = vmatpush3.bf16.msra.mxu1 %v1175_v11  ;;  %997 = vmatprep.subr.bf16.mxu0 %v1176_v12  ;;  %v1196_v32 = vld [vmem:[%s1600_s0] ss:$20 sps:$4 sm:$0xff]   ;;  %v1198_v33 = vld [vmem:[%s1600_s0 + $0x4] ss:$20 sps:$4 sm:$0xff]   ;;  %v1199_v35 = vld [vmem:[%s1600_s0 + $0x8] ss:$20 sps:$4 sm:$0xff]  }
   0xe   :  { %1055 = vmatprep.subr.bf16.mxu1 %v1177_v13  ;;  %570 = vmatprep.mubr.bf16.mxu0 %v1198_v33  ;;  %v1205_v39 = vld [vmem:[%s1600_s0 + $0x34] ss:$20 sps:$4 sm:$0xff]   ;;  %v1208_v41 = vld [vmem:[%s1600_s0 + $0x30] ss:$20 sps:$4 sm:$0xff]   ;;  %v1215_v47 = vld [vmem:[%s1600_s0 + $0x58] ss:$20 sps:$4 sm:$0xff]  }
   0xf   :  { %v1207_v40 = vld [vmem:[%s1600_s0 + $0x28] ss:$20 sps:$4 sm:$0xff]   ;;  %v1222_v45 = vld [vmem:[%s1599_s1 + $0x110] sm:$0xff]   ;;  %v1218_v49 = vld [vmem:[%s1600_s0 + $0x84] ss:$20 sps:$4 sm:$0xff]  }
  0x10   :  { %998 = vmatpush3.bf16.msra.mxu0 %v1178_v14  ;;  %v1209_v42 = vld [vmem:[%s1600_s0 + $0x54] ss:$20 sps:$4 sm:$0xff]   ;;  %v1211_v44 = vld [vmem:[%s1600_s0 + $0x5c] ss:$20 sps:$4 sm:$0xff]   ;;  %v1220_v51 = vld [vmem:[%s1600_s0 + $0x78] ss:$20 sps:$4 sm:$0xff]  }
  0x11   :  { %1056 = vmatpush3.bf16.msra.mxu1 %v1179_v15  ;;  %999 = vmatprep.subr.bf16.mxu0 %v1180_v16  ;;  %v1214_v46 = vld [vmem:[%s1600_s0 + $0x50] ss:$20 sps:$4 sm:$0xff]   ;;  %v1235_v50 = vld [vmem:[%s1599_s1 + $0x118] sm:$0xff]   ;;  %v1221_v52 = vld [vmem:[%s1600_s0 + $0x80] ss:$20 sps:$4 sm:$0xff]  }
  0x12   :  { %1057 = vmatprep.subr.bf16.mxu1 %v1181_v17  ;;  %v1216_v48 = vld [vmem:[%s1600_s0 + $0x7c] ss:$20 sps:$4 sm:$0xff]   ;;  %v1223_v53 = vld [vmem:[%s1600_s0 + $0xa4] ss:$20 sps:$4 sm:$0xff]   ;;  %v1225_v54 = vld [vmem:[%s1600_s0 + $0xac] ss:$20 sps:$4 sm:$0xff]  }
  0x13   :  { %v1227_v55 = vld [vmem:[%s1600_s0 + $0xa0] ss:$20 sps:$4 sm:$0xff]   ;;  %v1228_v56 = vld [vmem:[%s1600_s0 + $0xa8] ss:$20 sps:$4 sm:$0xff]   ;;  %v1234_v62 = vld [vmem:[%s1600_s0 + $0xd0] ss:$20 sps:$4 sm:$0xff]  }
  0x14   :  { %1000 = vmatpush3.bf16.msra.mxu0 %v1182_v18  ;;  %v1229_v57 = vld [vmem:[%s1600_s0 + $0xcc] ss:$20 sps:$4 sm:$0xff]   ;;  %v1231_v58 = vld [vmem:[%s1600_s0 + $0xd4] ss:$20 sps:$4 sm:$0xff]   ;;  %v52_v60 = vld [vmem:[%s1600_s0 + $0xf8] sm:$0xff] }
  0x15   :  { %1058 = vmatpush3.bf16.msra.mxu1 %v1183_v19  ;;  %1001 = vmatprep.subr.bf16.mxu0 %v1184_v20  ;;  %v51_v59 = vld [vmem:[%s1600_s0 + $0xf0] sm:$0xff]  ;;  %v1233_v61 = vld [vmem:[%s1600_s0 + $0xc8] ss:$20 sps:$4 sm:$0xff]   ;;  %v920_v0 = vcombine.high %v52_v60, %v52_v60  ;;  %v919_v2 = vcombine.low %v52_v60, %v52_v60  ;;  %v1242_v5 = vld [vmem:[%s1600_s0 + $0x38] ss:$20 sps:$4 sm:$0xff]  }
  0x16   :  { %1059 = vmatprep.subr.bf16.mxu1 %v1185_v21  ;;  %v918_v63 = vcombine.high %v51_v59, %v51_v59  ;;  %v917_v1 = vcombine.low %v51_v59, %v51_v59  ;;  %v1240_v3 = vld [vmem:[%s1600_s0 + $0x10] ss:$20 sps:$4 sm:$0xff]   ;;  %v1243_v6 = vld [vmem:[%s1600_s0 + $0xd8] ss:$20 sps:$4 sm:$0xff]   ;;  %v1244_v7 = vld [vmem:[%s1600_s0 + $0x60] ss:$20 sps:$4 sm:$0xff]  }
  0x17   :  { %v1241_v4 = vld [vmem:[%s1600_s0 + $0xb0] ss:$20 sps:$4 sm:$0xff]   ;;  %v1245_v8 = vld [vmem:[%s1600_s0 + $0x100] ss:$0 sps:$4 sm:$0xff]   ;;  %v1246_v9 = vld [vmem:[%s1600_s0 + $0x88] ss:$20 sps:$4 sm:$0xff]  }
  0x18   :  { %1002 = vmatpush3.bf16.msra.mxu0 %v1186_v22  ;;  %v1508_v11 = vld [vmem:[%s1601_s2] ss:$0 sm:$0xff] }
  0x19   :  { %1060 = vmatpush3.bf16.msra.mxu1 %v1187_v23  ;;  %1003 = vmatprep.subr.bf16.mxu0 %v1188_v24 }
  0x1a   :  { %1061 = vmatprep.subr.bf16.mxu1 %v1189_v25 }
  0x1c   :  { %1004 = vmatpush3.bf16.msra.mxu0 %v1190_v26 }
  0x1d   :  { %1062 = vmatpush3.bf16.msra.mxu1 %v1191_v27  ;;  %1005 = vmatprep.subr.bf16.mxu0 %v1192_v28 }
  0x1e   :  { %1063 = vmatprep.subr.bf16.mxu1 %v1193_v29 }
  0x20   :  { %1006 = vmatpush3.bf16.msra.mxu0 %v1194_v30 }
  0x21   :  { %1064 = vmatpush3.bf16.msra.mxu1 %v1195_v31  ;;  %1118 = vmatprep.subr.bf16.mxu0 %v1247_v34 }
  0x22   :  { %1154 = vmatprep.subr.bf16.mxu1 %v1247_v34 }
  0x23   :  { %571 = vmatmul.mubr.bf16.vlgmr.msra.gmra.mrb[0].mxu0 %v1196_v32 }
  0x24   :  { %659 = vmatmul.mubr.bf16.vlgmr.msra.gmra.mrb[0].mxu1 %v1199_v35  ;;  %1119 = vmatpush3.bf16.msra.mxu0 %v1202_v37 }
  0x25   :  { %578 = vmatprep.mubr.bf16.mxu0 %v1203_v38  ;;  %1158 = vmatpush3.bf16.msra.mxu1 %v1202_v37 }
  0x26   :  { %666 = vmatprep.mubr.bf16.mxu1 %v1205_v39  ;;  %1120 = vmatprep.subr.bf16.mxu0 %v1247_v34 }
  0x27   :  { %1155 = vmatprep.subr.bf16.mxu1 %v1247_v34 }
  0x28   :  { %1121 = vmatpush3.bf16.msra.mxu0 %v1213_v43 }
  0x29   :  { %1159 = vmatpush3.bf16.msra.mxu1 %v1213_v43  ;;  %1122 = vmatprep.subr.bf16.mxu0 %v1247_v34 }
  0x2a   :  { %1156 = vmatprep.subr.bf16.mxu1 %v1247_v34 }
  0x2b   :  { %579 = vmatmul.mubr.bf16.gmra.mrb[4].mxu0 %v1207_v40 }
  0x2c   :  { %667 = vmatmul.mubr.bf16.gmra.mrb[4].mxu1 %v1208_v41  ;;  %586 = vmatprep.mubr.bf16.mxu0 %v1209_v42 }
  0x2d   :  { %674 = vmatprep.mubr.bf16.mxu1 %v1211_v44  ;;  %1123 = vmatpush3.bf16.msra.mxu0 %v1222_v45 }
  0x2e   :  { %1160 = vmatpush3.bf16.msra.mxu1 %v1222_v45  ;;  %1124 = vmatprep.subr.bf16.mxu0 %v1247_v34 }
  0x2f   :  { %1157 = vmatprep.subr.bf16.mxu1 %v1247_v34 }
  0x31   :  { %1125 = vmatpush3.bf16.msra.mxu0 %v1235_v50 }
  0x32   :  { %1161 = vmatpush3.bf16.msra.mxu1 %v1235_v50 }
  0x33   :  { %587 = vmatmul.mubr.bf16.gmra.mrb[8].mxu0 %v1214_v46 }
  0x34   :  { %675 = vmatmul.mubr.bf16.gmra.mrb[8].mxu1 %v1215_v47  ;;  %594 = vmatprep.mubr.bf16.mxu0 %v1216_v48 }
  0x35   :  { %682 = vmatprep.mubr.bf16.mxu1 %v1218_v49 }
  0x3b   :  { %595 = vmatmul.mubr.bf16.gmra.mrb[12].mxu0 %v1220_v51 }
  0x3c   :  { %683 = vmatmul.mubr.bf16.gmra.mrb[12].mxu1 %v1221_v52  ;;  %602 = vmatprep.mubr.bf16.mxu0 %v1223_v53 }
  0x3d   :  { %690 = vmatprep.mubr.bf16.mxu1 %v1225_v54 }
  0x43   :  { %603 = vmatmul.mubr.bf16.gmra.mrb[16].mxu0 %v1227_v55 }
  0x44   :  { %691 = vmatmul.mubr.bf16.gmra.mrb[16].mxu1 %v1228_v56  ;;  %610 = vmatprep.mubr.bf16.mxu0 %v1229_v57 }
  0x45   :  { %698 = vmatprep.mubr.bf16.mxu1 %v1231_v58 }
  0x4b   :  { %611 = vmatmul.mubr.bf16.gmra.mrb[20].mxu0 %v1233_v61 }
  0x4c   :  { %699 = vmatmul.mubr.bf16.gmra.mrb[20].mxu1 %v1234_v62  ;;  %618 = vmatprep.mubr.bf16.mxu0 %v918_v63 }
  0x4d   :  { %706 = vmatprep.mubr.bf16.mxu1 %v920_v0 }
  0x53   :  { %619 = vmatmul.mubr.bf16.gmra.mrb[24].mxu0 %v917_v1 }
  0x54   :  { %707 = vmatmul.mubr.bf16.gmra.mrb[24].mxu1 %v919_v2  ;;  %1126 = vmatprep.mubr.msk.bf16.mxu0 %vm1248_vm0, %v1247_v34 }
  0x55   :  { %1142 = vmatprep.mubr.msk.bf16.mxu1 %vm1248_vm0, %v1247_v34 }
  0x5b   :  { %1127 = vmatmul.mubr.msk.bf16.vlgmr.msra.gmra.mrb[28].mxu0 %vm516_vm1, %v1240_v3 }
  0x5c   :  { %1143 = vmatmul.mubr.msk.bf16.vlgmr.msra.gmra.mrb[28].mxu1 %vm516_vm1, %v1241_v4  ;;  %1130 = vmatprep.mubr.msk.bf16.mxu0 %vm1248_vm0, %v1247_v34 }
  0x5d   :  { %1146 = vmatprep.mubr.msk.bf16.mxu1 %vm1248_vm0, %v1247_v34 }
  0x63   :  { %1131 = vmatmul.mubr.msk.bf16.gmra.mrb[32].mxu0 %vm516_vm1, %v1242_v5 }
  0x64   :  { %1147 = vmatmul.mubr.msk.bf16.gmra.mrb[32].mxu1 %vm516_vm1, %v1243_v6  ;;  %1134 = vmatprep.mubr.msk.bf16.mxu0 %vm1248_vm0, %v1247_v34 }
  0x65   :  { %1150 = vmatprep.mubr.msk.bf16.mxu1 %vm1248_vm0, %v1247_v34 }
  0x6b   :  { %1135 = vmatmul.mubr.msk.bf16.gmra.mrb[36].mxu0 %vm516_vm1, %v1244_v7 }
  0x6c   :  { %1151 = vmatmul.mubr.msk.bf16.gmra.mrb[36].mxu1 %vm516_vm1, %v1245_v8  ;;  %1138 = vmatprep.mubr.msk.bf16.mxu0 %vm1248_vm0, %v1247_v34 }
  0x73   :  { %1139 = vmatmul.mubr.msk.bf16.gmra.mrb[40].mxu0 %vm516_vm1, %v1246_v9 }
  0xf6   :  { %v1007_v10 = vpop.f32.mrb[0].mxu0 }
  0xf7   :  { %v1008_v12 = vpop.f32.mrb[1].mxu0  ;;  %v1065_v13 = vpop.f32.mrb[0].mxu1 }
  0xf8   :  { %v1009_v14 = vadd.f32 %v1008_v12, %v1007_v10  ;;  %v1010_v15 = vpop.f32.mrb[2].mxu0  ;;  %v1066_v16 = vpop.f32.mrb[1].mxu1 }
  0xf9   :  { %v1011_v17 = vpop.f32.mrb[3].mxu0  ;;  %v1067_v18 = vadd.f32 %v1066_v16, %v1065_v13  ;;  %v1068_v19 = vpop.f32.mrb[2].mxu1 }
  0xfa   :  { %v573_v20 = vadd.f32 %v1009_v14, %v1508_v11  ;;  %v1012_v21 = vadd.f32 %v1011_v17, %v1010_v15  ;;  %v1069_v22 = vpop.f32.mrb[3].mxu1 }
  0xfb   :  { %v1070_v23 = vadd.f32 %v1069_v22, %v1068_v19 }
  0xfc   :  { %v576_v24 = vadd.f32 %v1012_v21, %v1508_v11  ;;  %v1512_v25 = vadd.f32 %v1067_v18, %v573_v20 }
  0xfe   :  { %v1013_v26 = vpop.f32.mrb[4].mxu0  ;;  %v1514_v27 = vadd.f32 %v1070_v23, %v576_v24 }
  0xff   :  { %v1014_v28 = vpop.f32.mrb[5].mxu0  ;;  %v1071_v29 = vpop.f32.mrb[4].mxu1 }
 0x100   :  { %v1015_v30 = vadd.f32 %v1014_v28, %v1013_v26  ;;  %v1016_v31 = vpop.f32.mrb[6].mxu0  ;;  %v1072_v32 = vpop.f32.mrb[5].mxu1 }
 0x101   :  { %v1017_v33 = vpop.f32.mrb[7].mxu0  ;;  %v1073_v34 = vadd.f32 %v1072_v32, %v1071_v29  ;;  %v1074_v35 = vpop.f32.mrb[6].mxu1 }
 0x102   :  { %v581_v36 = vadd.f32 %v1015_v30, %v1508_v11  ;;  %v1018_v37 = vadd.f32 %v1017_v33, %v1016_v31  ;;  %v1075_v38 = vpop.f32.mrb[7].mxu1 }
 0x103   :  { %v1076_v39 = vadd.f32 %v1075_v38, %v1074_v35 }
 0x104   :  { %v584_v40 = vadd.f32 %v1018_v37, %v1508_v11  ;;  %v1518_v41 = vadd.f32 %v1073_v34, %v581_v36 }
 0x106   :  { %v1019_v42 = vpop.f32.mrb[8].mxu0  ;;  %v1520_v43 = vadd.f32 %v1076_v39, %v584_v40 }
 0x107   :  { %v1020_v44 = vpop.f32.mrb[9].mxu0  ;;  %v1077_v45 = vpop.f32.mrb[8].mxu1 }
 0x108   :  { %v1021_v46 = vadd.f32 %v1020_v44, %v1019_v42  ;;  %v1022_v47 = vpop.f32.mrb[10].mxu0  ;;  %v1078_v48 = vpop.f32.mrb[9].mxu1 }
 0x109   :  { %v1023_v49 = vpop.f32.mrb[11].mxu0  ;;  %v1079_v50 = vadd.f32 %v1078_v48, %v1077_v45  ;;  %v1080_v51 = vpop.f32.mrb[10].mxu1 }
 0x10a   :  { %v589_v52 = vadd.f32 %v1021_v46, %v1508_v11  ;;  %v1024_v53 = vadd.f32 %v1023_v49, %v1022_v47  ;;  %v1081_v54 = vpop.f32.mrb[11].mxu1 }
 0x10b   :  { %v1082_v55 = vadd.f32 %v1081_v54, %v1080_v51 }
 0x10c   :  { %v592_v56 = vadd.f32 %v1024_v53, %v1508_v11  ;;  %v1524_v57 = vadd.f32 %v1079_v50, %v589_v52 }
 0x10e   :  { %v1025_v58 = vpop.f32.mrb[12].mxu0  ;;  %v1526_v59 = vadd.f32 %v1082_v55, %v592_v56 }
 0x10f   :  { %v1026_v60 = vpop.f32.mrb[13].mxu0  ;;  %v1083_v61 = vpop.f32.mrb[12].mxu1 }
 0x110   :  { %v1027_v62 = vadd.f32 %v1026_v60, %v1025_v58  ;;  %v1028_v63 = vpop.f32.mrb[14].mxu0  ;;  %v1084_v0 = vpop.f32.mrb[13].mxu1 }
 0x111   :  { %v1029_v1 = vpop.f32.mrb[15].mxu0  ;;  %v1085_v2 = vadd.f32 %v1084_v0, %v1083_v61  ;;  %v1086_v3 = vpop.f32.mrb[14].mxu1 }
 0x112   :  { %v597_v4 = vadd.f32 %v1027_v62, %v1508_v11  ;;  %v1030_v5 = vadd.f32 %v1029_v1, %v1028_v63  ;;  %v1087_v6 = vpop.f32.mrb[15].mxu1 }
 0x113   :  { %v1088_v7 = vadd.f32 %v1087_v6, %v1086_v3 }
 0x114   :  { %v600_v8 = vadd.f32 %v1030_v5, %v1508_v11  ;;  %v1530_v9 = vadd.f32 %v1085_v2, %v597_v4 }
 0x116   :  { %v1031_v10 = vpop.f32.mrb[16].mxu0  ;;  %v1532_v12 = vadd.f32 %v1088_v7, %v600_v8 }
 0x117   :  { %v1032_v13 = vpop.f32.mrb[17].mxu0  ;;  %v1089_v14 = vpop.f32.mrb[16].mxu1 }
 0x118   :  { %v1033_v15 = vadd.f32 %v1032_v13, %v1031_v10  ;;  %v1034_v16 = vpop.f32.mrb[18].mxu0  ;;  %v1090_v17 = vpop.f32.mrb[17].mxu1 }
 0x119   :  { %v1035_v18 = vpop.f32.mrb[19].mxu0  ;;  %v1091_v19 = vadd.f32 %v1090_v17, %v1089_v14  ;;  %v1092_v20 = vpop.f32.mrb[18].mxu1 }
 0x11a   :  { %v605_v21 = vadd.f32 %v1033_v15, %v1508_v11  ;;  %v1036_v22 = vadd.f32 %v1035_v18, %v1034_v16  ;;  %v1093_v23 = vpop.f32.mrb[19].mxu1 }
 0x11b   :  { %v1094_v24 = vadd.f32 %v1093_v23, %v1092_v20 }
 0x11c   :  { %v608_v26 = vadd.f32 %v1036_v22, %v1508_v11  ;;  %v693_v28 = vadd.f32 %v1091_v19, %v605_v21 }
 0x11e   :  { %v1037_v29 = vpop.f32.mrb[20].mxu0  ;;  %v696_v30 = vadd.f32 %v1094_v24, %v608_v26 }
 0x11f   :  { %v1038_v31 = vpop.f32.mrb[21].mxu0  ;;  %v1095_v32 = vpop.f32.mrb[20].mxu1 }
 0x120   :  { %v1039_v33 = vadd.f32 %v1038_v31, %v1037_v29  ;;  %v1040_v34 = vpop.f32.mrb[22].mxu0  ;;  %v1096_v35 = vpop.f32.mrb[21].mxu1 }
 0x121   :  { %v1041_v36 = vpop.f32.mrb[23].mxu0  ;;  %v1097_v37 = vadd.f32 %v1096_v35, %v1095_v32  ;;  %v1098_v38 = vpop.f32.mrb[22].mxu1 }
 0x122   :  { %v613_v39 = vadd.f32 %v1039_v33, %v1508_v11  ;;  %v1042_v40 = vadd.f32 %v1041_v36, %v1040_v34  ;;  %v1099_v42 = vpop.f32.mrb[23].mxu1 }
 0x123   :  { %v1100_v44 = vadd.f32 %v1099_v42, %v1098_v38 }
 0x124   :  { %v616_v45 = vadd.f32 %v1042_v40, %v1508_v11  ;;  %v701_v46 = vadd.f32 %v1097_v37, %v613_v39 }
 0x126   :  { %v1043_v47 = vpop.f32.mrb[24].mxu0  ;;  %v704_v48 = vadd.f32 %v1100_v44, %v616_v45 }
 0x127   :  { %v1044_v49 = vpop.f32.mrb[25].mxu0  ;;  %v1101_v50 = vpop.f32.mrb[24].mxu1 }
 0x128   :  { %v1045_v51 = vadd.f32 %v1044_v49, %v1043_v47  ;;  %v1046_v52 = vpop.f32.mrb[26].mxu0  ;;  %v1102_v53 = vpop.f32.mrb[25].mxu1 }
 0x129   :  { %v1047_v54 = vpop.f32.mrb[27].mxu0  ;;  %v1103_v55 = vadd.f32 %v1102_v53, %v1101_v50  ;;  %v1104_v56 = vpop.f32.mrb[26].mxu1 }
 0x12a   :  { %v621_v58 = vadd.f32 %v1045_v51, %v1508_v11  ;;  %v1105_v60 = vpop.f32.mrb[27].mxu1 }
 0x12c   :  { %v709_v61 = vadd.f32 %v1103_v55, %v621_v58 }
 0x12e   :  { %v748_v62 = vpop.f32.mrb[28].mxu0 }
 0x12f   :  { %v749_v63 = vadd.f32 %v748_v62, %v1512_v25  ;;  %v780_v0 = vpop.f32.mrb[28].mxu1  ;;  %v1128_v1 = vpop.f32.mrb[29].mxu0 }
 0x130   :  { %v781_v2 = vadd.f32 %v780_v0, %v693_v28  ;;  %v1144_v3 = vpop.f32.mrb[29].mxu1  ;;  %v751_v4 = vpop.f32.mrb[30].mxu0 }
 0x131   :  { %v802_v5 = vmax.f32 %v749_v63, 0.0  ;;  %v752_v6 = vadd.f32 %v751_v4, %v1514_v27  ;;  %v783_v7 = vpop.f32.mrb[30].mxu1  ;;  %v1129_v8 = vpop.f32.mrb[31].mxu0 }
 0x132   :  { %v810_v10 = vmax.f32 %v781_v2, 0.0  ;;  %v784_v13 = vadd.f32 %v783_v7, %v696_v30  ;;  %v1145_v14 = vpop.f32.mrb[31].mxu1 }
 0x133   :  { %v978_v11 = vpack.c.bf16 %v802_v5, %v802_v5  ;;  %v803_v15 = vmax.f32 %v752_v6, 0.0 }
 0x134   :  { %v986_v16 = vpack.c.bf16 %v810_v10, %v810_v10  ;;  %v811_v17 = vmax.f32 %v784_v13, 0.0 }
 0x135   :  { %869 = vst.msk [vmem:[%s1602_s3] sm:$0xf] %vm868_vm2, %v978_v11  ;;  %v979_v25 = vpack.c.bf16 %v803_v15, %v803_v15 }
 0x136   :  { %877 = vst.msk [vmem:[%s1602_s3 + $0x20] sm:$0xf] %vm868_vm2, %v986_v16  ;;  %v987_v27 = vpack.c.bf16 %v811_v17, %v811_v17  ;;  %v756_v18 = vpop.f32.mrb[32].mxu0 }
 0x137   :  { %870 = vst.msk [vmem:[%s1602_s3 + $0x4] sm:$0xf] %vm868_vm2, %v979_v25  ;;  %v757_v19 = vadd.f32 %v756_v18, %v1518_v41  ;;  %v788_v20 = vpop.f32.mrb[32].mxu1  ;;  %v1132_v21 = vpop.f32.mrb[33].mxu0 }
 0x138   :  { %878 = vst.msk [vmem:[%s1602_s3 + $0x24] sm:$0xf] %vm868_vm2, %v987_v27  ;;  %v789_v22 = vadd.f32 %v788_v20, %v701_v46  ;;  %v1148_v23 = vpop.f32.mrb[33].mxu1  ;;  %v759_v24 = vpop.f32.mrb[34].mxu0 }
 0x139   :  { %v804_v26 = vmax.f32 %v757_v19, 0.0  ;;  %v760_v28 = vadd.f32 %v759_v24, %v1520_v43  ;;  %v791_v29 = vpop.f32.mrb[34].mxu1  ;;  %v1133_v30 = vpop.f32.mrb[35].mxu0 }
 0x13a   :  { %v812_v31 = vmax.f32 %v789_v22, 0.0  ;;  %v792_v32 = vadd.f32 %v791_v29, %v704_v48  ;;  %v1149_v33 = vpop.f32.mrb[35].mxu1 }
 0x13b   :  { %v980_v34 = vpack.c.bf16 %v804_v26, %v804_v26  ;;  %v805_v41 = vmax.f32 %v760_v28, 0.0 }
 0x13c   :  { %v988_v35 = vpack.c.bf16 %v812_v31, %v812_v31  ;;  %v813_v36 = vmax.f32 %v792_v32, 0.0 }
 0x13d   :  { %871 = vst.msk [vmem:[%s1602_s3 + $0x8] sm:$0xf] %vm868_vm2, %v980_v34  ;;  %v981_v37 = vpack.c.bf16 %v805_v41, %v805_v41 }
 0x13e   :  { %879 = vst.msk [vmem:[%s1602_s3 + $0x28] sm:$0xf] %vm868_vm2, %v988_v35  ;;  %v989_v43 = vpack.c.bf16 %v813_v36, %v813_v36  ;;  %v764_v38 = vpop.f32.mrb[36].mxu0 }
 0x13f   :  { %872 = vst.msk [vmem:[%s1602_s3 + $0xc] sm:$0xf] %vm868_vm2, %v981_v37  ;;  %v765_v39 = vadd.f32 %v764_v38, %v1524_v57  ;;  %v796_v40 = vpop.f32.mrb[36].mxu1  ;;  %v1136_v42 = vpop.f32.mrb[37].mxu0 }
 0x140   :  { %880 = vst.msk [vmem:[%s1602_s3 + $0x2c] sm:$0xf] %vm868_vm2, %v989_v43  ;;  %v797_v44 = vadd.f32 %v796_v40, %v709_v61  ;;  %v767_v45 = vpop.f32.mrb[38].mxu0  ;;  %v1152_v46 = vpop.f32.mrb[37].mxu1 }
 0x141   :  { %v806_v47 = vmax.f32 %v765_v39, 0.0  ;;  %v768_v48 = vadd.f32 %v767_v45, %v1526_v59  ;;  %v1137_v49 = vpop.f32.mrb[39].mxu0  ;;  %v799_v50 = vpop.f32.mrb[38].mxu1 }
 0x142   :  { %v814_v51 = vmax.f32 %v797_v44, 0.0  ;;  %v1153_v52 = vpop.f32.mrb[39].mxu1 }
 0x143   :  { %v982_v53 = vpack.c.bf16 %v806_v47, %v806_v47  ;;  %v807_v54 = vmax.f32 %v768_v48, 0.0 }
 0x144   :  { %v990_v57 = vpack.c.bf16 %v814_v51, %v814_v51 }
 0x145   :  { %873 = vst.msk [vmem:[%s1602_s3 + $0x10] sm:$0xf] %vm868_vm2, %v982_v53  ;;  %v983_v55 = vpack.c.bf16 %v807_v54, %v807_v54 }
 0x146   :  { %881 = vst.msk [vmem:[%s1602_s3 + $0x30] sm:$0xf] %vm868_vm2, %v990_v57  ;;  %v772_v56 = vpop.f32.mrb[40].mxu0 }
 0x147   :  { %874 = vst.msk [vmem:[%s1602_s3 + $0x14] sm:$0xf] %vm868_vm2, %v983_v55  ;;  %v773_v59 = vadd.f32 %v772_v56, %v1530_v9  ;;  %v1140_v58 = vpop.f32.mrb[41].mxu0 }
 0x148   :  { %v775_v60 = vpop.f32.mrb[42].mxu0 }
 0x149   :  { %v808_v61 = vmax.f32 %v773_v59, 0.0  ;;  %v776_v62 = vadd.f32 %v775_v60, %v1532_v12  ;;  %v1141_v63 = vpop.f32.mrb[43].mxu0 }
 0x14b   :  { %v984_v0 = vpack.c.bf16 %v808_v61, %v808_v61  ;;  %v809_v1 = vmax.f32 %v776_v62, 0.0 }
 0x14d   :  { %875 = vst.msk [vmem:[%s1602_s3 + $0x18] sm:$0xf] %vm868_vm2, %v984_v0  ;;  %v985_v2 = vpack.c.bf16 %v809_v1, %v809_v1 }
 0x14f   :  { %876 = vst.msk [vmem:[%s1602_s3 + $0x1c] sm:$0xf] %vm868_vm2, %v985_v2 }

// kernel: network_forward.7
= control target key start
LH: loop header
LB: loop body
LE: loop exit
PB: predicated region body
PF: predicated region fallthrough
CT: control target
= control target key end

     0   :  { %vm4847_vm0 = vcmask 523264   ;;  %vm6268_vm1 = vcmask 48128   ;;  %s11089_s1 = inlined_call_operand.vmem [shape: bf16[3136,512], index: 1, kind: input, shape index: {}]   ;;  %s11090_s0 = inlined_call_operand.vmem [shape: bf16[8,3136], index: 0, kind: input, shape index: {}]   ;;  %s11091_s3 = inlined_call_operand.vmem [shape: bf16[512,6], index: 3, kind: input, shape index: {}]   ;;  %s11092_s2 = inlined_call_operand.vmem [shape: f32[1,512], index: 2, kind: input, shape index: {}]   ;;  %s11093_s4 = inlined_call_operand.vmem [shape: f32[1,6], index: 4, kind: input, shape index: {}]   ;;  %s11094_s5 = inlined_call_operand.vmem [shape: f32[8,6], index: 5, kind: output, shape index: {}]  }
   0x1   :  { %v7263_v0 = vld [vmem:[%s11089_s1 + $0x4] ss:$16 sps:$4 sm:$0xff]   ;;  %v7265_v1 = vld [vmem:[%s11089_s1 + $0xc] ss:$16 sps:$4 sm:$0xff]   ;;  %v7267_v2 = vld [vmem:[%s11089_s1] ss:$16 sps:$4 sm:$0xff]  }
   0x2   :  { %4851 = vmatprep.subr.bf16.mxu0 %v7263_v0  ;;  %v7268_v3 = vld [vmem:[%s11089_s1 + $0x8] ss:$16 sps:$4 sm:$0xff]   ;;  %5384 = vmatprep.subr.bf16.mxu1 %v7265_v1  ;;  %v7269_v4 = vld [vmem:[%s11089_s1 + $0x24] ss:$16 sps:$4 sm:$0xff]   ;;  %v7271_v5 = vld [vmem:[%s11089_s1 + $0x2c] ss:$16 sps:$4 sm:$0xff]  }
   0x3   :  { %4852 = vmatpush1.bf16.msra.mxu0 %v7267_v2  ;;  %5385 = vmatpush1.bf16.msra.mxu1 %v7268_v3  ;;  %v7273_v6 = vld [vmem:[%s11089_s1 + $0x20] ss:$16 sps:$4 sm:$0xff]   ;;  %v7274_v7 = vld [vmem:[%s11089_s1 + $0x28] ss:$16 sps:$4 sm:$0xff]   ;;  %v7275_v8 = vld [vmem:[%s11089_s1 + $0x44] ss:$16 sps:$4 sm:$0xff]  }
   0x4   :  { %4853 = vmatprep.subr.bf16.mxu0 %v7269_v4  ;;  %5386 = vmatprep.subr.bf16.mxu1 %v7271_v5  ;;  %v7277_v9 = vld [vmem:[%s11089_s1 + $0x4c] ss:$16 sps:$4 sm:$0xff]   ;;  %v7279_v10 = vld [vmem:[%s11089_s1 + $0x40] ss:$16 sps:$4 sm:$0xff]   ;;  %v7280_v11 = vld [vmem:[%s11089_s1 + $0x48] ss:$16 sps:$4 sm:$0xff]  }
   0x5   :  { %v7281_v12 = vld [vmem:[%s11089_s1 + $0x64] ss:$16 sps:$4 sm:$0xff]   ;;  %v7283_v13 = vld [vmem:[%s11089_s1 + $0x6c] ss:$16 sps:$4 sm:$0xff]   ;;  %v7285_v14 = vld [vmem:[%s11089_s1 + $0x60] ss:$16 sps:$4 sm:$0xff]  }
   0x6   :  { %v7286_v15 = vld [vmem:[%s11089_s1 + $0x68] ss:$16 sps:$4 sm:$0xff]   ;;  %v7287_v16 = vld [vmem:[%s11089_s1 + $0x84] ss:$16 sps:$4 sm:$0xff]   ;;  %v7289_v17 = vld [vmem:[%s11089_s1 + $0x8c] ss:$16 sps:$4 sm:$0xff]  }
   0x7   :  { %4854 = vmatpush1.bf16.msra.mxu0 %v7273_v6  ;;  %5387 = vmatpush1.bf16.msra.mxu1 %v7274_v7  ;;  %v7291_v18 = vld [vmem:[%s11089_s1 + $0x80] ss:$16 sps:$4 sm:$0xff]   ;;  %v7292_v19 = vld [vmem:[%s11089_s1 + $0x88] ss:$16 sps:$4 sm:$0xff]   ;;  %v7293_v20 = vld [vmem:[%s11089_s1 + $0xa4] ss:$16 sps:$4 sm:$0xff]  }
   0x8   :  { %4855 = vmatprep.subr.bf16.mxu0 %v7275_v8  ;;  %5388 = vmatprep.subr.bf16.mxu1 %v7277_v9  ;;  %v7295_v21 = vld [vmem:[%s11089_s1 + $0xac] ss:$16 sps:$4 sm:$0xff]   ;;  %v7297_v22 = vld [vmem:[%s11089_s1 + $0xa0] ss:$16 sps:$4 sm:$0xff]   ;;  %v7298_v23 = vld [vmem:[%s11089_s1 + $0xa8] ss:$16 sps:$4 sm:$0xff]  }
   0x9   :  { %v7299_v24 = vld [vmem:[%s11089_s1 + $0xc4] ss:$16 sps:$4 sm:$0xff]   ;;  %v7301_v25 = vld [vmem:[%s11089_s1 + $0xcc] ss:$16 sps:$4 sm:$0xff]   ;;  %v7303_v26 = vld [vmem:[%s11089_s1 + $0xc0] ss:$16 sps:$4 sm:$0xff]  }
   0xa   :  { %v7304_v27 = vld [vmem:[%s11089_s1 + $0xc8] ss:$16 sps:$4 sm:$0xff]   ;;  %v7305_v28 = vld [vmem:[%s11089_s1 + $0xe4] ss:$16 sps:$4 sm:$0xff]   ;;  %v7307_v29 = vld [vmem:[%s11089_s1 + $0xec] ss:$16 sps:$4 sm:$0xff]  }
   0xb   :  { %4856 = vmatpush1.bf16.msra.mxu0 %v7279_v10  ;;  %5389 = vmatpush1.bf16.msra.mxu1 %v7280_v11  ;;  %v7309_v30 = vld [vmem:[%s11089_s1 + $0xe0] ss:$16 sps:$4 sm:$0xff]   ;;  %v7310_v31 = vld [vmem:[%s11089_s1 + $0xe8] ss:$16 sps:$4 sm:$0xff]   ;;  %v7311_v32 = vld [vmem:[%s11089_s1 + $0x104] ss:$16 sps:$4 sm:$0xff]  }
   0xc   :  { %4857 = vmatprep.subr.bf16.mxu0 %v7281_v12  ;;  %5390 = vmatprep.subr.bf16.mxu1 %v7283_v13  ;;  %v7313_v33 = vld [vmem:[%s11089_s1 + $0x10c] ss:$16 sps:$4 sm:$0xff]   ;;  %v7315_v34 = vld [vmem:[%s11089_s1 + $0x100] ss:$16 sps:$4 sm:$0xff]   ;;  %v7316_v35 = vld [vmem:[%s11089_s1 + $0x108] ss:$16 sps:$4 sm:$0xff]  }
   0xd   :  { %v7317_v36 = vld [vmem:[%s11089_s1 + $0x124] ss:$16 sps:$4 sm:$0xff]   ;;  %v7319_v37 = vld [vmem:[%s11089_s1 + $0x12c] ss:$16 sps:$4 sm:$0xff]   ;;  %v7321_v38 = vld [vmem:[%s11089_s1 + $0x120] ss:$16 sps:$4 sm:$0xff]  }
   0xe   :  { %v7322_v39 = vld [vmem:[%s11089_s1 + $0x128] ss:$16 sps:$4 sm:$0xff]   ;;  %v7323_v40 = vld [vmem:[%s11089_s1 + $0x144] ss:$16 sps:$4 sm:$0xff]   ;;  %v7325_v41 = vld [vmem:[%s11089_s1 + $0x14c] ss:$16 sps:$4 sm:$0xff]  }
   0xf   :  { %4858 = vmatpush1.bf16.msra.mxu0 %v7285_v14  ;;  %5391 = vmatpush1.bf16.msra.mxu1 %v7286_v15  ;;  %v7327_v42 = vld [vmem:[%s11089_s1 + $0x140] ss:$16 sps:$4 sm:$0xff]   ;;  %v7328_v43 = vld [vmem:[%s11089_s1 + $0x148] ss:$16 sps:$4 sm:$0xff]   ;;  %v7329_v44 = vld [vmem:[%s11089_s1 + $0x164] ss:$16 sps:$4 sm:$0xff]  }
  0x10   :  { %4859 = vmatprep.subr.bf16.mxu0 %v7287_v16  ;;  %5392 = vmatprep.subr.bf16.mxu1 %v7289_v17  ;;  %v7331_v45 = vld [vmem:[%s11089_s1 + $0x16c] ss:$16 sps:$4 sm:$0xff]   ;;  %v21_v46 = vld [vmem:[%s11090_s0] sm:$0xff]  ;;  %v7334_v49 = vld [vmem:[%s11089_s1 + $0x168] ss:$16 sps:$4 sm:$0xff]  }
  0x11   :  { %v7333_v47 = vld [vmem:[%s11089_s1 + $0x160] ss:$16 sps:$4 sm:$0xff]   ;;  %v6275_v48 = vcombine.high %v21_v46, %v21_v46  ;;  %v7335_v50 = vld [vmem:[%s11089_s1 + $0x184] ss:$16 sps:$4 sm:$0xff]   ;;  %v7337_v51 = vld [vmem:[%s11089_s1 + $0x18c] ss:$16 sps:$4 sm:$0xff]   ;;  %v6274_v4 = vcombine.low %v21_v46, %v21_v46 }
  0x12   :  { %v7339_v52 = vld [vmem:[%s11089_s1 + $0x180] ss:$16 sps:$4 sm:$0xff]   ;;  %v7340_v53 = vld [vmem:[%s11089_s1 + $0x188] ss:$16 sps:$4 sm:$0xff]   ;;  %v7341_v54 = vld [vmem:[%s11089_s1 + $0x1a4] ss:$16 sps:$4 sm:$0xff]  }
  0x13   :  { %4860 = vmatpush1.bf16.msra.mxu0 %v7291_v18  ;;  %5393 = vmatpush1.bf16.msra.mxu1 %v7292_v19  ;;  %v7343_v55 = vld [vmem:[%s11089_s1 + $0x1ac] ss:$16 sps:$4 sm:$0xff]   ;;  %v7345_v56 = vld [vmem:[%s11089_s1 + $0x1a0] ss:$16 sps:$4 sm:$0xff]   ;;  %v7346_v57 = vld [vmem:[%s11089_s1 + $0x1a8] ss:$16 sps:$4 sm:$0xff]  }
  0x14   :  { %4861 = vmatprep.subr.bf16.mxu0 %v7293_v20  ;;  %5394 = vmatprep.subr.bf16.mxu1 %v7295_v21  ;;  %v7347_v58 = vld [vmem:[%s11089_s1 + $0x1c4] ss:$16 sps:$4 sm:$0xff]   ;;  %v7349_v59 = vld [vmem:[%s11089_s1 + $0x1cc] ss:$16 sps:$4 sm:$0xff]   ;;  %v7351_v60 = vld [vmem:[%s11089_s1 + $0x1c0] ss:$16 sps:$4 sm:$0xff]  }
  0x15   :  { %4883 = vmatprep.mubr.bf16.mxu0 %v6275_v48  ;;  %5416 = vmatprep.mubr.bf16.mxu1 %v6275_v48  ;;  %v7352_v61 = vld [vmem:[%s11089_s1 + $0x1c8] ss:$16 sps:$4 sm:$0xff]   ;;  %v7353_v62 = vld [vmem:[%s11089_s1 + $0x1e4] ss:$16 sps:$4 sm:$0xff]   ;;  %v7355_v63 = vld [vmem:[%s11089_s1 + $0x1ec] ss:$16 sps:$4 sm:$0xff]  }
  0x16   :  { %v7357_v0 = vld [vmem:[%s11089_s1 + $0x1e0] ss:$16 sps:$4 sm:$0xff]   ;;  %v7358_v1 = vld [vmem:[%s11089_s1 + $0x1e8] ss:$16 sps:$4 sm:$0xff]   ;;  %v7363_v2 = vld [vmem:[%s11089_s1 + $0x204] ss:$16 sps:$4 sm:$0xff]  }
  0x17   :  { %4862 = vmatpush1.bf16.msra.mxu0 %v7297_v22  ;;  %5395 = vmatpush1.bf16.msra.mxu1 %v7298_v23  ;;  %v7366_v3 = vld [vmem:[%s11089_s1 + $0x20c] ss:$16 sps:$4 sm:$0xff]   ;;  %v7361_v5 = vld [vmem:[%s11089_s1 + $0x200] ss:$16 sps:$4 sm:$0xff]   ;;  %v7364_v6 = vld [vmem:[%s11089_s1 + $0x208] ss:$16 sps:$4 sm:$0xff]  }
  0x18   :  { %4863 = vmatprep.subr.bf16.mxu0 %v7299_v24  ;;  %5396 = vmatprep.subr.bf16.mxu1 %v7301_v25  ;;  %v7369_v7 = vld [vmem:[%s11089_s1 + $0x224] ss:$16 sps:$4 sm:$0xff]   ;;  %v7372_v8 = vld [vmem:[%s11089_s1 + $0x22c] ss:$16 sps:$4 sm:$0xff]   ;;  %v7367_v9 = vld [vmem:[%s11089_s1 + $0x220] ss:$16 sps:$4 sm:$0xff]  }
  0x19   :  { %v7370_v10 = vld [vmem:[%s11089_s1 + $0x228] ss:$16 sps:$4 sm:$0xff]   ;;  %v7375_v11 = vld [vmem:[%s11089_s1 + $0x244] ss:$16 sps:$4 sm:$0xff]   ;;  %v7378_v12 = vld [vmem:[%s11089_s1 + $0x24c] ss:$16 sps:$4 sm:$0xff]  }
  0x1a   :  { %v7373_v13 = vld [vmem:[%s11089_s1 + $0x240] ss:$16 sps:$4 sm:$0xff]   ;;  %v7376_v14 = vld [vmem:[%s11089_s1 + $0x248] ss:$16 sps:$4 sm:$0xff]   ;;  %v7381_v15 = vld [vmem:[%s11089_s1 + $0x264] ss:$16 sps:$4 sm:$0xff]  }
  0x1b   :  { %4864 = vmatpush1.bf16.msra.mxu0 %v7303_v26  ;;  %5397 = vmatpush1.bf16.msra.mxu1 %v7304_v27  ;;  %v7384_v16 = vld [vmem:[%s11089_s1 + $0x26c] ss:$16 sps:$4 sm:$0xff]   ;;  %v7379_v17 = vld [vmem:[%s11089_s1 + $0x260] ss:$16 sps:$4 sm:$0xff]   ;;  %v7382_v18 = vld [vmem:[%s11089_s1 + $0x268] ss:$16 sps:$4 sm:$0xff]  }
  0x1c   :  { %4865 = vmatprep.subr.bf16.mxu0 %v7305_v28  ;;  %5398 = vmatprep.subr.bf16.mxu1 %v7307_v29  ;;  %v7387_v19 = vld [vmem:[%s11089_s1 + $0x284] ss:$16 sps:$4 sm:$0xff]   ;;  %v7390_v20 = vld [vmem:[%s11089_s1 + $0x28c] ss:$16 sps:$4 sm:$0xff]   ;;  %v7385_v21 = vld [vmem:[%s11089_s1 + $0x280] ss:$16 sps:$4 sm:$0xff]  }
  0x1d   :  { %v7388_v22 = vld [vmem:[%s11089_s1 + $0x288] ss:$16 sps:$4 sm:$0xff]   ;;  %v7393_v23 = vld [vmem:[%s11089_s1 + $0x2a4] ss:$16 sps:$4 sm:$0xff]   ;;  %v7396_v24 = vld [vmem:[%s11089_s1 + $0x2ac] ss:$16 sps:$4 sm:$0xff]  }
  0x1e   :  { %v7391_v25 = vld [vmem:[%s11089_s1 + $0x2a0] ss:$16 sps:$4 sm:$0xff]   ;;  %v7394_v26 = vld [vmem:[%s11089_s1 + $0x2a8] ss:$16 sps:$4 sm:$0xff]   ;;  %v7399_v27 = vld [vmem:[%s11089_s1 + $0x2c4] ss:$16 sps:$4 sm:$0xff]  }
  0x1f   :  { %4866 = vmatpush1.bf16.msra.mxu0 %v7309_v30  ;;  %5399 = vmatpush1.bf16.msra.mxu1 %v7310_v31  ;;  %v7402_v28 = vld [vmem:[%s11089_s1 + $0x2cc] ss:$16 sps:$4 sm:$0xff]   ;;  %v7397_v31 = vld [vmem:[%s11089_s1 + $0x2c0] ss:$16 sps:$4 sm:$0xff]   ;;  %v7424_v48 = vld [vmem:[%s11089_s1 + $0x348] ss:$16 sps:$4 sm:$0xff]  }
  0x20   :  { %4867 = vmatprep.subr.bf16.mxu0 %v7311_v32  ;;  %5400 = vmatprep.subr.bf16.mxu1 %v7313_v33  ;;  %v8803_v29 = vld [vmem:[%s11090_s0 + $0x8] sm:$0xff]  ;;  %v7405_v33 = vld [vmem:[%s11089_s1 + $0x2e4] ss:$16 sps:$4 sm:$0xff]  }
  0x21   :  { %v6277_v30 = vcombine.high %v8803_v29, %v8803_v29  ;;  %v7400_v32 = vld [vmem:[%s11089_s1 + $0x2c8] ss:$16 sps:$4 sm:$0xff]   ;;  %v7426_v46 = vld [vmem:[%s11089_s1 + $0x34c] ss:$16 sps:$4 sm:$0xff]  }
  0x23   :  { %4868 = vmatpush1.bf16.msra.mxu0 %v7315_v34  ;;  %5401 = vmatpush1.bf16.msra.mxu1 %v7316_v35  ;;  %v7408_v34 = vld [vmem:[%s11089_s1 + $0x2ec] ss:$16 sps:$4 sm:$0xff]   ;;  %v7403_v35 = vld [vmem:[%s11089_s1 + $0x2e0] ss:$16 sps:$4 sm:$0xff]  }
  0x24   :  { %4869 = vmatprep.subr.bf16.mxu0 %v7317_v36  ;;  %5402 = vmatprep.subr.bf16.mxu1 %v7319_v37  ;;  %v7406_v36 = vld [vmem:[%s11089_s1 + $0x2e8] ss:$16 sps:$4 sm:$0xff]   ;;  %v7411_v37 = vld [vmem:[%s11089_s1 + $0x304] ss:$16 sps:$4 sm:$0xff]  }
  0x27   :  { %4870 = vmatpush1.bf16.msra.mxu0 %v7321_v38  ;;  %5403 = vmatpush1.bf16.msra.mxu1 %v7322_v39  ;;  %v7414_v38 = vld [vmem:[%s11089_s1 + $0x30c] ss:$16 sps:$4 sm:$0xff]   ;;  %v7409_v39 = vld [vmem:[%s11089_s1 + $0x300] ss:$16 sps:$4 sm:$0xff]  }
  0x28   :  { %4871 = vmatprep.subr.bf16.mxu0 %v7323_v40  ;;  %5404 = vmatprep.subr.bf16.mxu1 %v7325_v41  ;;  %v7412_v40 = vld [vmem:[%s11089_s1 + $0x308] ss:$16 sps:$4 sm:$0xff]   ;;  %v7417_v41 = vld [vmem:[%s11089_s1 + $0x324] ss:$16 sps:$4 sm:$0xff]  }
  0x2b   :  { %4872 = vmatpush1.bf16.msra.mxu0 %v7327_v42  ;;  %5405 = vmatpush1.bf16.msra.mxu1 %v7328_v43  ;;  %v7420_v42 = vld [vmem:[%s11089_s1 + $0x32c] ss:$16 sps:$4 sm:$0xff]   ;;  %v7415_v43 = vld [vmem:[%s11089_s1 + $0x320] ss:$16 sps:$4 sm:$0xff]  }
  0x2c   :  { %4873 = vmatprep.subr.bf16.mxu0 %v7329_v44  ;;  %5406 = vmatprep.subr.bf16.mxu1 %v7331_v45  ;;  %v7418_v44 = vld [vmem:[%s11089_s1 + $0x328] ss:$16 sps:$4 sm:$0xff]   ;;  %v7423_v45 = vld [vmem:[%s11089_s1 + $0x344] ss:$16 sps:$4 sm:$0xff]  }
  0x2f   :  { %4874 = vmatpush1.bf16.msra.mxu0 %v7333_v47  ;;  %5407 = vmatpush1.bf16.msra.mxu1 %v7334_v49  ;;  %v7421_v47 = vld [vmem:[%s11089_s1 + $0x340] ss:$16 sps:$4 sm:$0xff]   ;;  %v7429_v49 = vld [vmem:[%s11089_s1 + $0x364] ss:$16 sps:$4 sm:$0xff]  }
  0x30   :  { %4875 = vmatprep.subr.bf16.mxu0 %v7335_v50  ;;  %5408 = vmatprep.subr.bf16.mxu1 %v7337_v51  ;;  %v7432_v50 = vld [vmem:[%s11089_s1 + $0x36c] ss:$16 sps:$4 sm:$0xff]   ;;  %v7427_v51 = vld [vmem:[%s11089_s1 + $0x360] ss:$16 sps:$4 sm:$0xff]  }
  0x33   :  { %4876 = vmatpush1.bf16.msra.mxu0 %v7339_v52  ;;  %5409 = vmatpush1.bf16.msra.mxu1 %v7340_v53  ;;  %v7430_v52 = vld [vmem:[%s11089_s1 + $0x368] ss:$16 sps:$4 sm:$0xff]   ;;  %v7435_v53 = vld [vmem:[%s11089_s1 + $0x384] ss:$16 sps:$4 sm:$0xff]  }
  0x34   :  { %4877 = vmatprep.subr.bf16.mxu0 %v7341_v54  ;;  %5410 = vmatprep.subr.bf16.mxu1 %v7343_v55  ;;  %v7438_v54 = vld [vmem:[%s11089_s1 + $0x38c] ss:$16 sps:$4 sm:$0xff]   ;;  %v7433_v55 = vld [vmem:[%s11089_s1 + $0x380] ss:$16 sps:$4 sm:$0xff]  }
  0x37   :  { %4878 = vmatpush1.bf16.msra.mxu0 %v7345_v56  ;;  %5411 = vmatpush1.bf16.msra.mxu1 %v7346_v57  ;;  %v7436_v56 = vld [vmem:[%s11089_s1 + $0x388] ss:$16 sps:$4 sm:$0xff]   ;;  %v7441_v57 = vld [vmem:[%s11089_s1 + $0x3a4] ss:$16 sps:$4 sm:$0xff]  }
  0x38   :  { %4879 = vmatprep.subr.bf16.mxu0 %v7347_v58  ;;  %5412 = vmatprep.subr.bf16.mxu1 %v7349_v59  ;;  %v7444_v58 = vld [vmem:[%s11089_s1 + $0x3ac] ss:$16 sps:$4 sm:$0xff]   ;;  %v7439_v59 = vld [vmem:[%s11089_s1 + $0x3a0] ss:$16 sps:$4 sm:$0xff]  }
  0x3b   :  { %4880 = vmatpush1.bf16.msra.mxu0 %v7351_v60  ;;  %5413 = vmatpush1.bf16.msra.mxu1 %v7352_v61  ;;  %v7442_v60 = vld [vmem:[%s11089_s1 + $0x3a8] ss:$16 sps:$4 sm:$0xff]   ;;  %v7447_v61 = vld [vmem:[%s11089_s1 + $0x3c4] ss:$16 sps:$4 sm:$0xff]  }
  0x3c   :  { %4881 = vmatprep.subr.bf16.mxu0 %v7353_v62  ;;  %5414 = vmatprep.subr.bf16.mxu1 %v7355_v63  ;;  %v7450_v62 = vld [vmem:[%s11089_s1 + $0x3cc] ss:$16 sps:$4 sm:$0xff]   ;;  %v7445_v63 = vld [vmem:[%s11089_s1 + $0x3c0] ss:$16 sps:$4 sm:$0xff]  }
  0x3f   :  { %4882 = vmatpush1.bf16.msra.mxu0 %v7357_v0  ;;  %5415 = vmatpush1.bf16.msra.mxu1 %v7358_v1  ;;  %v7448_v0 = vld [vmem:[%s11089_s1 + $0x3c8] ss:$16 sps:$4 sm:$0xff]   ;;  %v7453_v1 = vld [vmem:[%s11089_s1 + $0x3e4] ss:$16 sps:$4 sm:$0xff]  }
  0x40   :  { %4892 = vmatprep.subr.bf16.mxu0 %v7363_v2  ;;  %5425 = vmatprep.subr.bf16.mxu1 %v7366_v3  ;;  %v7456_v2 = vld [vmem:[%s11089_s1 + $0x3ec] ss:$16 sps:$4 sm:$0xff]   ;;  %v7451_v3 = vld [vmem:[%s11089_s1 + $0x3e0] ss:$16 sps:$4 sm:$0xff]  }
  0x42   :  { %4884 = vmatmul.mubr.bf16.vlgmr.msra.gmra.mrb[0].mxu0 %v6274_v4  ;;  %5417 = vmatmul.mubr.bf16.vlgmr.msra.gmra.mrb[0].mxu1 %v6274_v4  ;;  %v7454_v4 = vld [vmem:[%s11089_s1 + $0x3e8] ss:$16 sps:$4 sm:$0xff]  }
  0x43   :  { %4893 = vmatpush1.bf16.msra.mxu0 %v7361_v5  ;;  %5426 = vmatpush1.bf16.msra.mxu1 %v7364_v6  ;;  %v7461_v5 = vld [vmem:[%s11089_s1 + $0x404] ss:$16 sps:$4 sm:$0xff]   ;;  %v7464_v6 = vld [vmem:[%s11089_s1 + $0x40c] ss:$16 sps:$4 sm:$0xff]  }
  0x44   :  { %4894 = vmatprep.subr.bf16.mxu0 %v7369_v7  ;;  %5427 = vmatprep.subr.bf16.mxu1 %v7372_v8  ;;  %v6276_v7 = vcombine.low %v8803_v29, %v8803_v29  ;;  %v7459_v8 = vld [vmem:[%s11089_s1 + $0x400] ss:$16 sps:$4 sm:$0xff]   ;;  %v7494_v29 = vld [vmem:[%s11089_s1 + $0x4ac] ss:$16 sps:$4 sm:$0xff]  }
  0x45   :  { %4924 = vmatprep.mubr.bf16.mxu0 %v6277_v30  ;;  %5457 = vmatprep.mubr.bf16.mxu1 %v6277_v30  ;;  %v7489_v30 = vld [vmem:[%s11089_s1 + $0x4a0] ss:$16 sps:$4 sm:$0xff]  }
  0x47   :  { %4895 = vmatpush1.bf16.msra.mxu0 %v7367_v9  ;;  %5428 = vmatpush1.bf16.msra.mxu1 %v7370_v10  ;;  %v7462_v9 = vld [vmem:[%s11089_s1 + $0x408] ss:$16 sps:$4 sm:$0xff]   ;;  %v7467_v10 = vld [vmem:[%s11089_s1 + $0x424] ss:$16 sps:$4 sm:$0xff]  }
  0x48   :  { %4896 = vmatprep.subr.bf16.mxu0 %v7375_v11  ;;  %5429 = vmatprep.subr.bf16.mxu1 %v7378_v12  ;;  %v8941_v11 = vld [vmem:[%s11090_s0 + $0x10] sm:$0xff]  ;;  %v7470_v12 = vld [vmem:[%s11089_s1 + $0x42c] ss:$16 sps:$4 sm:$0xff]  }
  0x4b   :  { %4897 = vmatpush1.bf16.msra.mxu0 %v7373_v13  ;;  %5430 = vmatpush1.bf16.msra.mxu1 %v7376_v14  ;;  %v6279_v13 = vcombine.high %v8941_v11, %v8941_v11  ;;  %v7465_v14 = vld [vmem:[%s11089_s1 + $0x420] ss:$16 sps:$4 sm:$0xff]  }
  0x4c   :  { %4898 = vmatprep.subr.bf16.mxu0 %v7381_v15  ;;  %5431 = vmatprep.subr.bf16.mxu1 %v7384_v16  ;;  %v7468_v15 = vld [vmem:[%s11089_s1 + $0x428] ss:$16 sps:$4 sm:$0xff]   ;;  %v7473_v16 = vld [vmem:[%s11089_s1 + $0x444] ss:$16 sps:$4 sm:$0xff]  }
  0x4f   :  { %4899 = vmatpush1.bf16.msra.mxu0 %v7379_v17  ;;  %5432 = vmatpush1.bf16.msra.mxu1 %v7382_v18  ;;  %v7476_v17 = vld [vmem:[%s11089_s1 + $0x44c] ss:$16 sps:$4 sm:$0xff]   ;;  %v7471_v18 = vld [vmem:[%s11089_s1 + $0x440] ss:$16 sps:$4 sm:$0xff]  }
  0x50   :  { %4900 = vmatprep.subr.bf16.mxu0 %v7387_v19  ;;  %5433 = vmatprep.subr.bf16.mxu1 %v7390_v20  ;;  %v7474_v19 = vld [vmem:[%s11089_s1 + $0x448] ss:$16 sps:$4 sm:$0xff]   ;;  %v7479_v20 = vld [vmem:[%s11089_s1 + $0x464] ss:$16 sps:$4 sm:$0xff]  }
  0x53   :  { %4901 = vmatpush1.bf16.msra.mxu0 %v7385_v21  ;;  %5434 = vmatpush1.bf16.msra.mxu1 %v7388_v22  ;;  %v7482_v21 = vld [vmem:[%s11089_s1 + $0x46c] ss:$16 sps:$4 sm:$0xff]   ;;  %v7477_v22 = vld [vmem:[%s11089_s1 + $0x460] ss:$16 sps:$4 sm:$0xff]  }
  0x54   :  { %4902 = vmatprep.subr.bf16.mxu0 %v7393_v23  ;;  %5435 = vmatprep.subr.bf16.mxu1 %v7396_v24  ;;  %v7480_v23 = vld [vmem:[%s11089_s1 + $0x468] ss:$16 sps:$4 sm:$0xff]   ;;  %v7485_v24 = vld [vmem:[%s11089_s1 + $0x484] ss:$16 sps:$4 sm:$0xff]  }
  0x57   :  { %4903 = vmatpush1.bf16.msra.mxu0 %v7391_v25  ;;  %5436 = vmatpush1.bf16.msra.mxu1 %v7394_v26  ;;  %v7488_v25 = vld [vmem:[%s11089_s1 + $0x48c] ss:$16 sps:$4 sm:$0xff]   ;;  %v7483_v26 = vld [vmem:[%s11089_s1 + $0x480] ss:$16 sps:$4 sm:$0xff]  }
  0x58   :  { %4904 = vmatprep.subr.bf16.mxu0 %v7399_v27  ;;  %5437 = vmatprep.subr.bf16.mxu1 %v7402_v28  ;;  %v7486_v27 = vld [vmem:[%s11089_s1 + $0x488] ss:$16 sps:$4 sm:$0xff]   ;;  %v7491_v28 = vld [vmem:[%s11089_s1 + $0x4a4] ss:$16 sps:$4 sm:$0xff]  }
  0x5b   :  { %4905 = vmatpush1.bf16.msra.mxu0 %v7397_v31  ;;  %5438 = vmatpush1.bf16.msra.mxu1 %v7400_v32  ;;  %v7492_v31 = vld [vmem:[%s11089_s1 + $0x4a8] ss:$16 sps:$4 sm:$0xff]   ;;  %v7497_v32 = vld [vmem:[%s11089_s1 + $0x4c4] ss:$16 sps:$4 sm:$0xff]  }
  0x5c   :  { %4906 = vmatprep.subr.bf16.mxu0 %v7405_v33  ;;  %5439 = vmatprep.subr.bf16.mxu1 %v7408_v34  ;;  %v7500_v33 = vld [vmem:[%s11089_s1 + $0x4cc] ss:$16 sps:$4 sm:$0xff]   ;;  %v7495_v34 = vld [vmem:[%s11089_s1 + $0x4c0] ss:$16 sps:$4 sm:$0xff]  }
  0x5f   :  { %4907 = vmatpush1.bf16.msra.mxu0 %v7403_v35  ;;  %5440 = vmatpush1.bf16.msra.mxu1 %v7406_v36  ;;  %v7498_v35 = vld [vmem:[%s11089_s1 + $0x4c8] ss:$16 sps:$4 sm:$0xff]   ;;  %v7503_v36 = vld [vmem:[%s11089_s1 + $0x4e4] ss:$16 sps:$4 sm:$0xff]  }
  0x60   :  { %4908 = vmatprep.subr.bf16.mxu0 %v7411_v37  ;;  %5441 = vmatprep.subr.bf16.mxu1 %v7414_v38  ;;  %v7506_v37 = vld [vmem:[%s11089_s1 + $0x4ec] ss:$16 sps:$4 sm:$0xff]   ;;  %v7501_v38 = vld [vmem:[%s11089_s1 + $0x4e0] ss:$16 sps:$4 sm:$0xff]  }
  0x63   :  { %4909 = vmatpush1.bf16.msra.mxu0 %v7409_v39  ;;  %5442 = vmatpush1.bf16.msra.mxu1 %v7412_v40  ;;  %v7504_v39 = vld [vmem:[%s11089_s1 + $0x4e8] ss:$16 sps:$4 sm:$0xff]   ;;  %v7509_v40 = vld [vmem:[%s11089_s1 + $0x504] ss:$16 sps:$4 sm:$0xff]  }
  0x64   :  { %4910 = vmatprep.subr.bf16.mxu0 %v7417_v41  ;;  %5443 = vmatprep.subr.bf16.mxu1 %v7420_v42  ;;  %v7512_v41 = vld [vmem:[%s11089_s1 + $0x50c] ss:$16 sps:$4 sm:$0xff]   ;;  %v7507_v42 = vld [vmem:[%s11089_s1 + $0x500] ss:$16 sps:$4 sm:$0xff]  }
  0x67   :  { %4911 = vmatpush1.bf16.msra.mxu0 %v7415_v43  ;;  %5444 = vmatpush1.bf16.msra.mxu1 %v7418_v44  ;;  %v7510_v43 = vld [vmem:[%s11089_s1 + $0x508] ss:$16 sps:$4 sm:$0xff]   ;;  %v7515_v44 = vld [vmem:[%s11089_s1 + $0x524] ss:$16 sps:$4 sm:$0xff]  }
  0x68   :  { %4912 = vmatprep.subr.bf16.mxu0 %v7423_v45  ;;  %5445 = vmatprep.subr.bf16.mxu1 %v7426_v46  ;;  %v7518_v45 = vld [vmem:[%s11089_s1 + $0x52c] ss:$16 sps:$4 sm:$0xff]   ;;  %v7513_v46 = vld [vmem:[%s11089_s1 + $0x520] ss:$16 sps:$4 sm:$0xff]  }
  0x6b   :  { %4913 = vmatpush1.bf16.msra.mxu0 %v7421_v47  ;;  %5446 = vmatpush1.bf16.msra.mxu1 %v7424_v48  ;;  %v7516_v47 = vld [vmem:[%s11089_s1 + $0x528] ss:$16 sps:$4 sm:$0xff]   ;;  %v7521_v48 = vld [vmem:[%s11089_s1 + $0x544] ss:$16 sps:$4 sm:$0xff]  }
  0x6c   :  { %4914 = vmatprep.subr.bf16.mxu0 %v7429_v49  ;;  %5447 = vmatprep.subr.bf16.mxu1 %v7432_v50  ;;  %v7524_v49 = vld [vmem:[%s11089_s1 + $0x54c] ss:$16 sps:$4 sm:$0xff]   ;;  %v7519_v50 = vld [vmem:[%s11089_s1 + $0x540] ss:$16 sps:$4 sm:$0xff]  }
  0x6f   :  { %4915 = vmatpush1.bf16.msra.mxu0 %v7427_v51  ;;  %5448 = vmatpush1.bf16.msra.mxu1 %v7430_v52  ;;  %v7522_v51 = vld [vmem:[%s11089_s1 + $0x548] ss:$16 sps:$4 sm:$0xff]   ;;  %v7527_v52 = vld [vmem:[%s11089_s1 + $0x564] ss:$16 sps:$4 sm:$0xff]  }
  0x70   :  { %4916 = vmatprep.subr.bf16.mxu0 %v7435_v53  ;;  %5449 = vmatprep.subr.bf16.mxu1 %v7438_v54  ;;  %v7530_v53 = vld [vmem:[%s11089_s1 + $0x56c] ss:$16 sps:$4 sm:$0xff]   ;;  %v7525_v54 = vld [vmem:[%s11089_s1 + $0x560] ss:$16 sps:$4 sm:$0xff]  }
  0x73   :  { %4917 = vmatpush1.bf16.msra.mxu0 %v7433_v55  ;;  %5450 = vmatpush1.bf16.msra.mxu1 %v7436_v56  ;;  %v7528_v55 = vld [vmem:[%s11089_s1 + $0x568] ss:$16 sps:$4 sm:$0xff]   ;;  %v7533_v56 = vld [vmem:[%s11089_s1 + $0x584] ss:$16 sps:$4 sm:$0xff]  }
  0x74   :  { %4918 = vmatprep.subr.bf16.mxu0 %v7441_v57  ;;  %5451 = vmatprep.subr.bf16.mxu1 %v7444_v58  ;;  %v7536_v57 = vld [vmem:[%s11089_s1 + $0x58c] ss:$16 sps:$4 sm:$0xff]   ;;  %v7531_v58 = vld [vmem:[%s11089_s1 + $0x580] ss:$16 sps:$4 sm:$0xff]  }
  0x77   :  { %4919 = vmatpush1.bf16.msra.mxu0 %v7439_v59  ;;  %5452 = vmatpush1.bf16.msra.mxu1 %v7442_v60  ;;  %v7534_v59 = vld [vmem:[%s11089_s1 + $0x588] ss:$16 sps:$4 sm:$0xff]   ;;  %v7539_v60 = vld [vmem:[%s11089_s1 + $0x5a4] ss:$16 sps:$4 sm:$0xff]  }
  0x78   :  { %4920 = vmatprep.subr.bf16.mxu0 %v7447_v61  ;;  %5453 = vmatprep.subr.bf16.mxu1 %v7450_v62  ;;  %v7542_v61 = vld [vmem:[%s11089_s1 + $0x5ac] ss:$16 sps:$4 sm:$0xff]   ;;  %v7537_v62 = vld [vmem:[%s11089_s1 + $0x5a0] ss:$16 sps:$4 sm:$0xff]  }
  0x7b   :  { %4921 = vmatpush1.bf16.msra.mxu0 %v7445_v63  ;;  %5454 = vmatpush1.bf16.msra.mxu1 %v7448_v0  ;;  %v7540_v63 = vld [vmem:[%s11089_s1 + $0x5a8] ss:$16 sps:$4 sm:$0xff]   ;;  %v7545_v0 = vld [vmem:[%s11089_s1 + $0x5c4] ss:$16 sps:$4 sm:$0xff]  }
  0x7c   :  { %4922 = vmatprep.subr.bf16.mxu0 %v7453_v1  ;;  %5455 = vmatprep.subr.bf16.mxu1 %v7456_v2  ;;  %v7548_v1 = vld [vmem:[%s11089_s1 + $0x5cc] ss:$16 sps:$4 sm:$0xff]   ;;  %v7543_v2 = vld [vmem:[%s11089_s1 + $0x5c0] ss:$16 sps:$4 sm:$0xff]  }
  0x7f   :  { %4923 = vmatpush1.bf16.msra.mxu0 %v7451_v3  ;;  %5456 = vmatpush1.bf16.msra.mxu1 %v7454_v4  ;;  %v7546_v3 = vld [vmem:[%s11089_s1 + $0x5c8] ss:$16 sps:$4 sm:$0xff]   ;;  %v7551_v4 = vld [vmem:[%s11089_s1 + $0x5e4] ss:$16 sps:$4 sm:$0xff]  }
  0x80   :  { %4933 = vmatprep.subr.bf16.mxu0 %v7461_v5  ;;  %5466 = vmatprep.subr.bf16.mxu1 %v7464_v6  ;;  %v7554_v5 = vld [vmem:[%s11089_s1 + $0x5ec] ss:$16 sps:$4 sm:$0xff]   ;;  %v7549_v6 = vld [vmem:[%s11089_s1 + $0x5e0] ss:$16 sps:$4 sm:$0xff]  }
  0x82   :  { %4925 = vmatmul.mubr.bf16.vlgmr.msra.gmra.mrb[0].mxu0 %v6276_v7  ;;  %5458 = vmatmul.mubr.bf16.vlgmr.msra.gmra.mrb[0].mxu1 %v6276_v7  ;;  %v7552_v7 = vld [vmem:[%s11089_s1 + $0x5e8] ss:$16 sps:$4 sm:$0xff]  }
  0x83   :  { %4934 = vmatpush1.bf16.msra.mxu0 %v7459_v8  ;;  %5467 = vmatpush1.bf16.msra.mxu1 %v7462_v9  ;;  %v7559_v8 = vld [vmem:[%s11089_s1 + $0x604] ss:$16 sps:$4 sm:$0xff]   ;;  %v7562_v9 = vld [vmem:[%s11089_s1 + $0x60c] ss:$16 sps:$4 sm:$0xff]  }
  0x84   :  { %4935 = vmatprep.subr.bf16.mxu0 %v7467_v10  ;;  %5468 = vmatprep.subr.bf16.mxu1 %v7470_v12  ;;  %v7557_v10 = vld [vmem:[%s11089_s1 + $0x600] ss:$16 sps:$4 sm:$0xff]   ;;  %v6278_v12 = vcombine.low %v8941_v11, %v8941_v11  ;;  %v7568_v11 = vld [vmem:[%s11089_s1 + $0x62c] ss:$16 sps:$4 sm:$0xff]  }
  0x85   :  { %4965 = vmatprep.mubr.bf16.mxu0 %v6279_v13  ;;  %5498 = vmatprep.mubr.bf16.mxu1 %v6279_v13  ;;  %v7560_v13 = vld [vmem:[%s11089_s1 + $0x608] ss:$16 sps:$4 sm:$0xff]  }
  0x87   :  { %4936 = vmatpush1.bf16.msra.mxu0 %v7465_v14  ;;  %5469 = vmatpush1.bf16.msra.mxu1 %v7468_v15  ;;  %v9139_v14 = vld [vmem:[%s11090_s0 + $0x18] sm:$0xff]  ;;  %v7565_v15 = vld [vmem:[%s11089_s1 + $0x624] ss:$16 sps:$4 sm:$0xff]  }
  0x88   :  { %4937 = vmatprep.subr.bf16.mxu0 %v7473_v16  ;;  %5470 = vmatprep.subr.bf16.mxu1 %v7476_v17  ;;  %v6281_v16 = vcombine.high %v9139_v14, %v9139_v14  ;;  %v7563_v17 = vld [vmem:[%s11089_s1 + $0x620] ss:$16 sps:$4 sm:$0xff]  }
  0x8b   :  { %4938 = vmatpush1.bf16.msra.mxu0 %v7471_v18  ;;  %5471 = vmatpush1.bf16.msra.mxu1 %v7474_v19  ;;  %v7566_v18 = vld [vmem:[%s11089_s1 + $0x628] ss:$16 sps:$4 sm:$0xff]   ;;  %v7571_v19 = vld [vmem:[%s11089_s1 + $0x644] ss:$16 sps:$4 sm:$0xff]  }
  0x8c   :  { %4939 = vmatprep.subr.bf16.mxu0 %v7479_v20  ;;  %5472 = vmatprep.subr.bf16.mxu1 %v7482_v21  ;;  %v7574_v20 = vld [vmem:[%s11089_s1 + $0x64c] ss:$16 sps:$4 sm:$0xff]   ;;  %v7569_v21 = vld [vmem:[%s11089_s1 + $0x640] ss:$16 sps:$4 sm:$0xff]  }
  0x8f   :  { %4940 = vmatpush1.bf16.msra.mxu0 %v7477_v22  ;;  %5473 = vmatpush1.bf16.msra.mxu1 %v7480_v23  ;;  %v7572_v22 = vld [vmem:[%s11089_s1 + $0x648] ss:$16 sps:$4 sm:$0xff]   ;;  %v7577_v23 = vld [vmem:[%s11089_s1 + $0x664] ss:$16 sps:$4 sm:$0xff]  }
  0x90   :  { %4941 = vmatprep.subr.bf16.mxu0 %v7485_v24  ;;  %5474 = vmatprep.subr.bf16.mxu1 %v7488_v25  ;;  %v7580_v24 = vld [vmem:[%s11089_s1 + $0x66c] ss:$16 sps:$4 sm:$0xff]   ;;  %v7575_v25 = vld [vmem:[%s11089_s1 + $0x660] ss:$16 sps:$4 sm:$0xff]  }
  0x93   :  { %4942 = vmatpush1.bf16.msra.mxu0 %v7483_v26  ;;  %5475 = vmatpush1.bf16.msra.mxu1 %v7486_v27  ;;  %v7578_v26 = vld [vmem:[%s11089_s1 + $0x668] ss:$16 sps:$4 sm:$0xff]   ;;  %v7583_v27 = vld [vmem:[%s11089_s1 + $0x684] ss:$16 sps:$4 sm:$0xff]  }
  0x94   :  { %4943 = vmatprep.subr.bf16.mxu0 %v7491_v28  ;;  %5476 = vmatprep.subr.bf16.mxu1 %v7494_v29  ;;  %v7586_v28 = vld [vmem:[%s11089_s1 + $0x68c] ss:$16 sps:$4 sm:$0xff]   ;;  %v7581_v29 = vld [vmem:[%s11089_s1 + $0x680] ss:$16 sps:$4 sm:$0xff]  }
  0x97   :  { %4944 = vmatpush1.bf16.msra.mxu0 %v7489_v30  ;;  %5477 = vmatpush1.bf16.msra.mxu1 %v7492_v31  ;;  %v7584_v30 = vld [vmem:[%s11089_s1 + $0x688] ss:$16 sps:$4 sm:$0xff]   ;;  %v7589_v31 = vld [vmem:[%s11089_s1 + $0x6a4] ss:$16 sps:$4 sm:$0xff]  }
  0x98   :  { %4945 = vmatprep.subr.bf16.mxu0 %v7497_v32  ;;  %5478 = vmatprep.subr.bf16.mxu1 %v7500_v33  ;;  %v7592_v32 = vld [vmem:[%s11089_s1 + $0x6ac] ss:$16 sps:$4 sm:$0xff]   ;;  %v7587_v33 = vld [vmem:[%s11089_s1 + $0x6a0] ss:$16 sps:$4 sm:$0xff]  }
  0x9b   :  { %4946 = vmatpush1.bf16.msra.mxu0 %v7495_v34  ;;  %5479 = vmatpush1.bf16.msra.mxu1 %v7498_v35  ;;  %v7590_v34 = vld [vmem:[%s11089_s1 + $0x6a8] ss:$16 sps:$4 sm:$0xff]   ;;  %v7595_v35 = vld [vmem:[%s11089_s1 + $0x6c4] ss:$16 sps:$4 sm:$0xff]  }
  0x9c   :  { %4947 = vmatprep.subr.bf16.mxu0 %v7503_v36  ;;  %5480 = vmatprep.subr.bf16.mxu1 %v7506_v37  ;;  %v7598_v36 = vld [vmem:[%s11089_s1 + $0x6cc] ss:$16 sps:$4 sm:$0xff]   ;;  %v7593_v37 = vld [vmem:[%s11089_s1 + $0x6c0] ss:$16 sps:$4 sm:$0xff]  }
  0x9f   :  { %4948 = vmatpush1.bf16.msra.mxu0 %v7501_v38  ;;  %5481 = vmatpush1.bf16.msra.mxu1 %v7504_v39  ;;  %v7596_v38 = vld [vmem:[%s11089_s1 + $0x6c8] ss:$16 sps:$4 sm:$0xff]   ;;  %v7601_v39 = vld [vmem:[%s11089_s1 + $0x6e4] ss:$16 sps:$4 sm:$0xff]  }
  0xa0   :  { %4949 = vmatprep.subr.bf16.mxu0 %v7509_v40  ;;  %5482 = vmatprep.subr.bf16.mxu1 %v7512_v41  ;;  %v7604_v40 = vld [vmem:[%s11089_s1 + $0x6ec] ss:$16 sps:$4 sm:$0xff]   ;;  %v7599_v41 = vld [vmem:[%s11089_s1 + $0x6e0] ss:$16 sps:$4 sm:$0xff]  }
  0xa3   :  { %4950 = vmatpush1.bf16.msra.mxu0 %v7507_v42  ;;  %5483 = vmatpush1.bf16.msra.mxu1 %v7510_v43  ;;  %v7602_v42 = vld [vmem:[%s11089_s1 + $0x6e8] ss:$16 sps:$4 sm:$0xff]   ;;  %v7607_v43 = vld [vmem:[%s11089_s1 + $0x704] ss:$16 sps:$4 sm:$0xff]  }
  0xa4   :  { %4951 = vmatprep.subr.bf16.mxu0 %v7515_v44  ;;  %5484 = vmatprep.subr.bf16.mxu1 %v7518_v45  ;;  %v7610_v44 = vld [vmem:[%s11089_s1 + $0x70c] ss:$16 sps:$4 sm:$0xff]   ;;  %v7605_v45 = vld [vmem:[%s11089_s1 + $0x700] ss:$16 sps:$4 sm:$0xff]  }
  0xa7   :  { %4952 = vmatpush1.bf16.msra.mxu0 %v7513_v46  ;;  %5485 = vmatpush1.bf16.msra.mxu1 %v7516_v47  ;;  %v7608_v46 = vld [vmem:[%s11089_s1 + $0x708] ss:$16 sps:$4 sm:$0xff]   ;;  %v7613_v47 = vld [vmem:[%s11089_s1 + $0x724] ss:$16 sps:$4 sm:$0xff]  }
  0xa8   :  { %4953 = vmatprep.subr.bf16.mxu0 %v7521_v48  ;;  %5486 = vmatprep.subr.bf16.mxu1 %v7524_v49  ;;  %v7616_v48 = vld [vmem:[%s11089_s1 + $0x72c] ss:$16 sps:$4 sm:$0xff]   ;;  %v7611_v49 = vld [vmem:[%s11089_s1 + $0x720] ss:$16 sps:$4 sm:$0xff]  }
  0xab   :  { %4954 = vmatpush1.bf16.msra.mxu0 %v7519_v50  ;;  %5487 = vmatpush1.bf16.msra.mxu1 %v7522_v51  ;;  %v7614_v50 = vld [vmem:[%s11089_s1 + $0x728] ss:$16 sps:$4 sm:$0xff]   ;;  %v7619_v51 = vld [vmem:[%s11089_s1 + $0x744] ss:$16 sps:$4 sm:$0xff]  }
  0xac   :  { %4955 = vmatprep.subr.bf16.mxu0 %v7527_v52  ;;  %5488 = vmatprep.subr.bf16.mxu1 %v7530_v53  ;;  %v7622_v52 = vld [vmem:[%s11089_s1 + $0x74c] ss:$16 sps:$4 sm:$0xff]   ;;  %v7617_v53 = vld [vmem:[%s11089_s1 + $0x740] ss:$16 sps:$4 sm:$0xff]  }
  0xaf   :  { %4956 = vmatpush1.bf16.msra.mxu0 %v7525_v54  ;;  %5489 = vmatpush1.bf16.msra.mxu1 %v7528_v55  ;;  %v7620_v54 = vld [vmem:[%s11089_s1 + $0x748] ss:$16 sps:$4 sm:$0xff]   ;;  %v7625_v55 = vld [vmem:[%s11089_s1 + $0x764] ss:$16 sps:$4 sm:$0xff]  }
  0xb0   :  { %4957 = vmatprep.subr.bf16.mxu0 %v7533_v56  ;;  %5490 = vmatprep.subr.bf16.mxu1 %v7536_v57  ;;  %v7628_v56 = vld [vmem:[%s11089_s1 + $0x76c] ss:$16 sps:$4 sm:$0xff]   ;;  %v7623_v57 = vld [vmem:[%s11089_s1 + $0x760] ss:$16 sps:$4 sm:$0xff]  }
  0xb3   :  { %4958 = vmatpush1.bf16.msra.mxu0 %v7531_v58  ;;  %5491 = vmatpush1.bf16.msra.mxu1 %v7534_v59  ;;  %v7626_v58 = vld [vmem:[%s11089_s1 + $0x768] ss:$16 sps:$4 sm:$0xff]   ;;  %v7631_v59 = vld [vmem:[%s11089_s1 + $0x784] ss:$16 sps:$4 sm:$0xff]  }
  0xb4   :  { %4959 = vmatprep.subr.bf16.mxu0 %v7539_v60  ;;  %5492 = vmatprep.subr.bf16.mxu1 %v7542_v61  ;;  %v7634_v60 = vld [vmem:[%s11089_s1 + $0x78c] ss:$16 sps:$4 sm:$0xff]   ;;  %v7629_v61 = vld [vmem:[%s11089_s1 + $0x780] ss:$16 sps:$4 sm:$0xff]  }
  0xb7   :  { %4960 = vmatpush1.bf16.msra.mxu0 %v7537_v62  ;;  %5493 = vmatpush1.bf16.msra.mxu1 %v7540_v63  ;;  %v7632_v62 = vld [vmem:[%s11089_s1 + $0x788] ss:$16 sps:$4 sm:$0xff]   ;;  %v7637_v63 = vld [vmem:[%s11089_s1 + $0x7a4] ss:$16 sps:$4 sm:$0xff]  }
  0xb8   :  { %4961 = vmatprep.subr.bf16.mxu0 %v7545_v0  ;;  %5494 = vmatprep.subr.bf16.mxu1 %v7548_v1  ;;  %v7640_v0 = vld [vmem:[%s11089_s1 + $0x7ac] ss:$16 sps:$4 sm:$0xff]   ;;  %v7635_v1 = vld [vmem:[%s11089_s1 + $0x7a0] ss:$16 sps:$4 sm:$0xff]  }
  0xbb   :  { %4962 = vmatpush1.bf16.msra.mxu0 %v7543_v2  ;;  %5495 = vmatpush1.bf16.msra.mxu1 %v7546_v3  ;;  %v7638_v2 = vld [vmem:[%s11089_s1 + $0x7a8] ss:$16 sps:$4 sm:$0xff]   ;;  %v7643_v3 = vld [vmem:[%s11089_s1 + $0x7c4] ss:$16 sps:$4 sm:$0xff]  }
  0xbc   :  { %4963 = vmatprep.subr.bf16.mxu0 %v7551_v4  ;;  %5496 = vmatprep.subr.bf16.mxu1 %v7554_v5  ;;  %v7646_v4 = vld [vmem:[%s11089_s1 + $0x7cc] ss:$16 sps:$4 sm:$0xff]   ;;  %v7641_v5 = vld [vmem:[%s11089_s1 + $0x7c0] ss:$16 sps:$4 sm:$0xff]  }
  0xbf   :  { %4964 = vmatpush1.bf16.msra.mxu0 %v7549_v6  ;;  %5497 = vmatpush1.bf16.msra.mxu1 %v7552_v7  ;;  %v7644_v6 = vld [vmem:[%s11089_s1 + $0x7c8] ss:$16 sps:$4 sm:$0xff]   ;;  %v7649_v7 = vld [vmem:[%s11089_s1 + $0x7e4] ss:$16 sps:$4 sm:$0xff]  }
  0xc0   :  { %4974 = vmatprep.subr.bf16.mxu0 %v7559_v8  ;;  %5507 = vmatprep.subr.bf16.mxu1 %v7562_v9  ;;  %v7652_v8 = vld [vmem:[%s11089_s1 + $0x7ec] ss:$16 sps:$4 sm:$0xff]   ;;  %v7647_v9 = vld [vmem:[%s11089_s1 + $0x7e0] ss:$16 sps:$4 sm:$0xff]  }
  0xc2   :  { %4966 = vmatmul.mubr.bf16.vlgmr.msra.gmra.mrb[0].mxu0 %v6278_v12  ;;  %5499 = vmatmul.mubr.bf16.vlgmr.msra.gmra.mrb[0].mxu1 %v6278_v12  ;;  %v7657_v12 = vld [vmem:[%s11089_s1 + $0x804] ss:$16 sps:$4 sm:$0xff]  }
  0xc3   :  { %4975 = vmatpush1.bf16.msra.mxu0 %v7557_v10  ;;  %5508 = vmatpush1.bf16.msra.mxu1 %v7560_v13  ;;  %v7650_v10 = vld [vmem:[%s11089_s1 + $0x7e8] ss:$16 sps:$4 sm:$0xff]   ;;  %v7660_v13 = vld [vmem:[%s11089_s1 + $0x80c] ss:$16 sps:$4 sm:$0xff]  }
  0xc4   :  { %4976 = vmatprep.subr.bf16.mxu0 %v7565_v15  ;;  %5509 = vmatprep.subr.bf16.mxu1 %v7568_v11  ;;  %v7655_v15 = vld [vmem:[%s11089_s1 + $0x800] ss:$16 sps:$4 sm:$0xff]   ;;  %v6280_v11 = vcombine.low %v9139_v14, %v9139_v14  ;;  %v7666_v14 = vld [vmem:[%s11089_s1 + $0x82c] ss:$16 sps:$4 sm:$0xff]  }
  0xc5   :  { %5006 = vmatprep.mubr.bf16.mxu0 %v6281_v16  ;;  %5539 = vmatprep.mubr.bf16.mxu1 %v6281_v16  ;;  %v9337_v16 = vld [vmem:[%s11090_s0 + $0x20] sm:$0xff] }
  0xc7   :  { %4977 = vmatpush1.bf16.msra.mxu0 %v7563_v17  ;;  %5510 = vmatpush1.bf16.msra.mxu1 %v7566_v18  ;;  %v7658_v17 = vld [vmem:[%s11089_s1 + $0x808] ss:$16 sps:$4 sm:$0xff]   ;;  %v7663_v18 = vld [vmem:[%s11089_s1 + $0x824] ss:$16 sps:$4 sm:$0xff]  }
  0xc8   :  { %4978 = vmatprep.subr.bf16.mxu0 %v7571_v19  ;;  %5511 = vmatprep.subr.bf16.mxu1 %v7574_v20  ;;  %v6283_v19 = vcombine.high %v9337_v16, %v9337_v16  ;;  %v7661_v20 = vld [vmem:[%s11089_s1 + $0x820] ss:$16 sps:$4 sm:$0xff]  }
  0xcb   :  { %4979 = vmatpush1.bf16.msra.mxu0 %v7569_v21  ;;  %5512 = vmatpush1.bf16.msra.mxu1 %v7572_v22  ;;  %v7664_v21 = vld [vmem:[%s11089_s1 + $0x828] ss:$16 sps:$4 sm:$0xff]   ;;  %v7669_v22 = vld [vmem:[%s11089_s1 + $0x844] ss:$16 sps:$4 sm:$0xff]  }
  0xcc   :  { %4980 = vmatprep.subr.bf16.mxu0 %v7577_v23  ;;  %5513 = vmatprep.subr.bf16.mxu1 %v7580_v24  ;;  %v7672_v23 = vld [vmem:[%s11089_s1 + $0x84c] ss:$16 sps:$4 sm:$0xff]   ;;  %v7667_v24 = vld [vmem:[%s11089_s1 + $0x840] ss:$16 sps:$4 sm:$0xff]  }
  0xcf   :  { %4981 = vmatpush1.bf16.msra.mxu0 %v7575_v25  ;;  %5514 = vmatpush1.bf16.msra.mxu1 %v7578_v26  ;;  %v7670_v25 = vld [vmem:[%s11089_s1 + $0x848] ss:$16 sps:$4 sm:$0xff]   ;;  %v7675_v26 = vld [vmem:[%s11089_s1 + $0x864] ss:$16 sps:$4 sm:$0xff]  }
  0xd0   :  { %4982 = vmatprep.subr.bf16.mxu0 %v7583_v27  ;;  %5515 = vmatprep.subr.bf16.mxu1 %v7586_v28  ;;  %v7678_v27 = vld [vmem:[%s11089_s1 + $0x86c] ss:$16 sps:$4 sm:$0xff]   ;;  %v7673_v28 = vld [vmem:[%s11089_s1 + $0x860] ss:$16 sps:$4 sm:$0xff]  }
  0xd3   :  { %4983 = vmatpush1.bf16.msra.mxu0 %v7581_v29  ;;  %5516 = vmatpush1.bf16.msra.mxu1 %v7584_v30  ;;  %v7676_v29 = vld [vmem:[%s11089_s1 + $0x868] ss:$16 sps:$4 sm:$0xff]   ;;  %v7681_v30 = vld [vmem:[%s11089_s1 + $0x884] ss:$16 sps:$4 sm:$0xff]  }
  0xd4   :  { %4984 = vmatprep.subr.bf16.mxu0 %v7589_v31  ;;  %5517 = vmatprep.subr.bf16.mxu1 %v7592_v32  ;;  %v7684_v31 = vld [vmem:[%s11089_s1 + $0x88c] ss:$16 sps:$4 sm:$0xff]   ;;  %v7679_v32 = vld [vmem:[%s11089_s1 + $0x880] ss:$16 sps:$4 sm:$0xff]  }
  0xd7   :  { %4985 = vmatpush1.bf16.msra.mxu0 %v7587_v33  ;;  %5518 = vmatpush1.bf16.msra.mxu1 %v7590_v34  ;;  %v7682_v33 = vld [vmem:[%s11089_s1 + $0x888] ss:$16 sps:$4 sm:$0xff]   ;;  %v7687_v34 = vld [vmem:[%s11089_s1 + $0x8a4] ss:$16 sps:$4 sm:$0xff]  }
  0xd8   :  { %4986 = vmatprep.subr.bf16.mxu0 %v7595_v35  ;;  %5519 = vmatprep.subr.bf16.mxu1 %v7598_v36  ;;  %v7690_v35 = vld [vmem:[%s11089_s1 + $0x8ac] ss:$16 sps:$4 sm:$0xff]   ;;  %v7685_v36 = vld [vmem:[%s11089_s1 + $0x8a0] ss:$16 sps:$4 sm:$0xff]  }
  0xdb   :  { %4987 = vmatpush1.bf16.msra.mxu0 %v7593_v37  ;;  %5520 = vmatpush1.bf16.msra.mxu1 %v7596_v38  ;;  %v7688_v37 = vld [vmem:[%s11089_s1 + $0x8a8] ss:$16 sps:$4 sm:$0xff]   ;;  %v7693_v38 = vld [vmem:[%s11089_s1 + $0x8c4] ss:$16 sps:$4 sm:$0xff]  }
  0xdc   :  { %4988 = vmatprep.subr.bf16.mxu0 %v7601_v39  ;;  %5521 = vmatprep.subr.bf16.mxu1 %v7604_v40  ;;  %v7696_v39 = vld [vmem:[%s11089_s1 + $0x8cc] ss:$16 sps:$4 sm:$0xff]   ;;  %v7691_v40 = vld [vmem:[%s11089_s1 + $0x8c0] ss:$16 sps:$4 sm:$0xff]  }
  0xdf   :  { %4989 = vmatpush1.bf16.msra.mxu0 %v7599_v41  ;;  %5522 = vmatpush1.bf16.msra.mxu1 %v7602_v42  ;;  %v7694_v41 = vld [vmem:[%s11089_s1 + $0x8c8] ss:$16 sps:$4 sm:$0xff]   ;;  %v7699_v42 = vld [vmem:[%s11089_s1 + $0x8e4] ss:$16 sps:$4 sm:$0xff]  }
  0xe0   :  { %4990 = vmatprep.subr.bf16.mxu0 %v7607_v43  ;;  %5523 = vmatprep.subr.bf16.mxu1 %v7610_v44  ;;  %v7702_v43 = vld [vmem:[%s11089_s1 + $0x8ec] ss:$16 sps:$4 sm:$0xff]   ;;  %v7697_v44 = vld [vmem:[%s11089_s1 + $0x8e0] ss:$16 sps:$4 sm:$0xff]  }
  0xe3   :  { %4991 = vmatpush1.bf16.msra.mxu0 %v7605_v45  ;;  %5524 = vmatpush1.bf16.msra.mxu1 %v7608_v46  ;;  %v7700_v45 = vld [vmem:[%s11089_s1 + $0x8e8] ss:$16 sps:$4 sm:$0xff]   ;;  %v7705_v46 = vld [vmem:[%s11089_s1 + $0x904] ss:$16 sps:$4 sm:$0xff]  }
  0xe4   :  { %4992 = vmatprep.subr.bf16.mxu0 %v7613_v47  ;;  %5525 = vmatprep.subr.bf16.mxu1 %v7616_v48  ;;  %v7708_v47 = vld [vmem:[%s11089_s1 + $0x90c] ss:$16 sps:$4 sm:$0xff]   ;;  %v7703_v48 = vld [vmem:[%s11089_s1 + $0x900] ss:$16 sps:$4 sm:$0xff]  }
  0xe7   :  { %4993 = vmatpush1.bf16.msra.mxu0 %v7611_v49  ;;  %5526 = vmatpush1.bf16.msra.mxu1 %v7614_v50  ;;  %v7706_v49 = vld [vmem:[%s11089_s1 + $0x908] ss:$16 sps:$4 sm:$0xff]   ;;  %v7711_v50 = vld [vmem:[%s11089_s1 + $0x924] ss:$16 sps:$4 sm:$0xff]  }
  0xe8   :  { %4994 = vmatprep.subr.bf16.mxu0 %v7619_v51  ;;  %5527 = vmatprep.subr.bf16.mxu1 %v7622_v52  ;;  %v7714_v51 = vld [vmem:[%s11089_s1 + $0x92c] ss:$16 sps:$4 sm:$0xff]   ;;  %v7709_v52 = vld [vmem:[%s11089_s1 + $0x920] ss:$16 sps:$4 sm:$0xff]  }
  0xeb   :  { %4995 = vmatpush1.bf16.msra.mxu0 %v7617_v53  ;;  %5528 = vmatpush1.bf16.msra.mxu1 %v7620_v54  ;;  %v7712_v53 = vld [vmem:[%s11089_s1 + $0x928] ss:$16 sps:$4 sm:$0xff]   ;;  %v7717_v54 = vld [vmem:[%s11089_s1 + $0x944] ss:$16 sps:$4 sm:$0xff]  }
  0xec   :  { %4996 = vmatprep.subr.bf16.mxu0 %v7625_v55  ;;  %5529 = vmatprep.subr.bf16.mxu1 %v7628_v56  ;;  %v7720_v55 = vld [vmem:[%s11089_s1 + $0x94c] ss:$16 sps:$4 sm:$0xff]   ;;  %v7715_v56 = vld [vmem:[%s11089_s1 + $0x940] ss:$16 sps:$4 sm:$0xff]  }
  0xef   :  { %4997 = vmatpush1.bf16.msra.mxu0 %v7623_v57  ;;  %5530 = vmatpush1.bf16.msra.mxu1 %v7626_v58  ;;  %v7718_v57 = vld [vmem:[%s11089_s1 + $0x948] ss:$16 sps:$4 sm:$0xff]   ;;  %v7723_v58 = vld [vmem:[%s11089_s1 + $0x964] ss:$16 sps:$4 sm:$0xff]  }
  0xf0   :  { %4998 = vmatprep.subr.bf16.mxu0 %v7631_v59  ;;  %5531 = vmatprep.subr.bf16.mxu1 %v7634_v60  ;;  %v7726_v59 = vld [vmem:[%s11089_s1 + $0x96c] ss:$16 sps:$4 sm:$0xff]   ;;  %v7721_v60 = vld [vmem:[%s11089_s1 + $0x960] ss:$16 sps:$4 sm:$0xff]  }
  0xf3   :  { %4999 = vmatpush1.bf16.msra.mxu0 %v7629_v61  ;;  %5532 = vmatpush1.bf16.msra.mxu1 %v7632_v62  ;;  %v7724_v61 = vld [vmem:[%s11089_s1 + $0x968] ss:$16 sps:$4 sm:$0xff]   ;;  %v7729_v62 = vld [vmem:[%s11089_s1 + $0x984] ss:$16 sps:$4 sm:$0xff]  }
  0xf4   :  { %5000 = vmatprep.subr.bf16.mxu0 %v7637_v63  ;;  %5533 = vmatprep.subr.bf16.mxu1 %v7640_v0  ;;  %v7732_v63 = vld [vmem:[%s11089_s1 + $0x98c] ss:$16 sps:$4 sm:$0xff]   ;;  %v7727_v0 = vld [vmem:[%s11089_s1 + $0x980] ss:$16 sps:$4 sm:$0xff]  }
  0xf7   :  { %5001 = vmatpush1.bf16.msra.mxu0 %v7635_v1  ;;  %5534 = vmatpush1.bf16.msra.mxu1 %v7638_v2  ;;  %v7730_v1 = vld [vmem:[%s11089_s1 + $0x988] ss:$16 sps:$4 sm:$0xff]   ;;  %v7735_v2 = vld [vmem:[%s11089_s1 + $0x9a4] ss:$16 sps:$4 sm:$0xff]  }
  0xf8   :  { %5002 = vmatprep.subr.bf16.mxu0 %v7643_v3  ;;  %5535 = vmatprep.subr.bf16.mxu1 %v7646_v4  ;;  %v7738_v3 = vld [vmem:[%s11089_s1 + $0x9ac] ss:$16 sps:$4 sm:$0xff]   ;;  %v7733_v4 = vld [vmem:[%s11089_s1 + $0x9a0] ss:$16 sps:$4 sm:$0xff]  }
  0xfb   :  { %5003 = vmatpush1.bf16.msra.mxu0 %v7641_v5  ;;  %5536 = vmatpush1.bf16.msra.mxu1 %v7644_v6  ;;  %v7736_v5 = vld [vmem:[%s11089_s1 + $0x9a8] ss:$16 sps:$4 sm:$0xff]   ;;  %v7741_v6 = vld [vmem:[%s11089_s1 + $0x9c4] ss:$16 sps:$4 sm:$0xff]  }
  0xfc   :  { %5004 = vmatprep.subr.bf16.mxu0 %v7649_v7  ;;  %5537 = vmatprep.subr.bf16.mxu1 %v7652_v8  ;;  %v7744_v7 = vld [vmem:[%s11089_s1 + $0x9cc] ss:$16 sps:$4 sm:$0xff]   ;;  %v7739_v8 = vld [vmem:[%s11089_s1 + $0x9c0] ss:$16 sps:$4 sm:$0xff]  }
  0xff   :  { %5005 = vmatpush1.bf16.msra.mxu0 %v7647_v9  ;;  %5538 = vmatpush1.bf16.msra.mxu1 %v7650_v10  ;;  %v7742_v9 = vld [vmem:[%s11089_s1 + $0x9c8] ss:$16 sps:$4 sm:$0xff]   ;;  %v7747_v10 = vld [vmem:[%s11089_s1 + $0x9e4] ss:$16 sps:$4 sm:$0xff]  }
 0x100   :  { %5015 = vmatprep.subr.bf16.mxu0 %v7657_v12  ;;  %5548 = vmatprep.subr.bf16.mxu1 %v7660_v13  ;;  %v7750_v12 = vld [vmem:[%s11089_s1 + $0x9ec] ss:$16 sps:$4 sm:$0xff]   ;;  %v7745_v13 = vld [vmem:[%s11089_s1 + $0x9e0] ss:$16 sps:$4 sm:$0xff]  }
 0x102   :  { %5007 = vmatmul.mubr.bf16.vlgmr.msra.gmra.mrb[0].mxu0 %v6280_v11  ;;  %5540 = vmatmul.mubr.bf16.vlgmr.msra.gmra.mrb[0].mxu1 %v6280_v11  ;;  %v7755_v11 = vld [vmem:[%s11089_s1 + $0xa04] ss:$16 sps:$4 sm:$0xff]  }
 0x103   :  { %5016 = vmatpush1.bf16.msra.mxu0 %v7655_v15  ;;  %5549 = vmatpush1.bf16.msra.mxu1 %v7658_v17  ;;  %v7748_v15 = vld [vmem:[%s11089_s1 + $0x9e8] ss:$16 sps:$4 sm:$0xff]   ;;  %v7758_v17 = vld [vmem:[%s11089_s1 + $0xa0c] ss:$16 sps:$4 sm:$0xff]  }
 0x104   :  { %5017 = vmatprep.subr.bf16.mxu0 %v7663_v18  ;;  %5550 = vmatprep.subr.bf16.mxu1 %v7666_v14  ;;  %v9533_v18 = vld [vmem:[%s11090_s0 + $0x28] sm:$0xff]  ;;  %v6282_v14 = vcombine.low %v9337_v16, %v9337_v16 }
 0x105   :  { %5047 = vmatprep.mubr.bf16.mxu0 %v6283_v19  ;;  %5580 = vmatprep.mubr.bf16.mxu1 %v6283_v19  ;;  %v7753_v19 = vld [vmem:[%s11089_s1 + $0xa00] ss:$16 sps:$4 sm:$0xff]   ;;  %v7764_v16 = vld [vmem:[%s11089_s1 + $0xa2c] ss:$16 sps:$4 sm:$0xff]  }
 0x107   :  { %5018 = vmatpush1.bf16.msra.mxu0 %v7661_v20  ;;  %5551 = vmatpush1.bf16.msra.mxu1 %v7664_v21  ;;  %v7756_v20 = vld [vmem:[%s11089_s1 + $0xa08] ss:$16 sps:$4 sm:$0xff]   ;;  %v7761_v21 = vld [vmem:[%s11089_s1 + $0xa24] ss:$16 sps:$4 sm:$0xff]  }
 0x108   :  { %5019 = vmatprep.subr.bf16.mxu0 %v7669_v22  ;;  %5552 = vmatprep.subr.bf16.mxu1 %v7672_v23  ;;  %v6285_v22 = vcombine.high %v9533_v18, %v9533_v18  ;;  %v7759_v23 = vld [vmem:[%s11089_s1 + $0xa20] ss:$16 sps:$4 sm:$0xff]  }
 0x10b   :  { %5020 = vmatpush1.bf16.msra.mxu0 %v7667_v24  ;;  %5553 = vmatpush1.bf16.msra.mxu1 %v7670_v25  ;;  %v7762_v24 = vld [vmem:[%s11089_s1 + $0xa28] ss:$16 sps:$4 sm:$0xff]   ;;  %v7767_v25 = vld [vmem:[%s11089_s1 + $0xa44] ss:$16 sps:$4 sm:$0xff]  }
 0x10c   :  { %5021 = vmatprep.subr.bf16.mxu0 %v7675_v26  ;;  %5554 = vmatprep.subr.bf16.mxu1 %v7678_v27  ;;  %v7770_v26 = vld [vmem:[%s11089_s1 + $0xa4c] ss:$16 sps:$4 sm:$0xff]   ;;  %v7765_v27 = vld [vmem:[%s11089_s1 + $0xa40] ss:$16 sps:$4 sm:$0xff]  }
 0x10f   :  { %5022 = vmatpush1.bf16.msra.mxu0 %v7673_v28  ;;  %5555 = vmatpush1.bf16.msra.mxu1 %v7676_v29  ;;  %v7768_v28 = vld [vmem:[%s11089_s1 + $0xa48] ss:$16 sps:$4 sm:$0xff]   ;;  %v7773_v29 = vld [vmem:[%s11089_s1 + $0xa64] ss:$16 sps:$4 sm:$0xff]  }
 0x110   :  { %5023 = vmatprep.subr.bf16.mxu0 %v7681_v30  ;;  %5556 = vmatprep.subr.bf16.mxu1 %v7684_v31  ;;  %v7776_v30 = vld [vmem:[%s11089_s1 + $0xa6c] ss:$16 sps:$4 sm:$0xff]   ;;  %v7771_v31 = vld [vmem:[%s11089_s1 + $0xa60] ss:$16 sps:$4 sm:$0xff]  }
 0x113   :  { %5024 = vmatpush1.bf16.msra.mxu0 %v7679_v32  ;;  %5557 = vmatpush1.bf16.msra.mxu1 %v7682_v33  ;;  %v7774_v32 = vld [vmem:[%s11089_s1 + $0xa68] ss:$16 sps:$4 sm:$0xff]   ;;  %v7779_v33 = vld [vmem:[%s11089_s1 + $0xa84] ss:$16 sps:$4 sm:$0xff]  }
 0x114   :  { %5025 = vmatprep.subr.bf16.mxu0 %v7687_v34  ;;  %5558 = vmatprep.subr.bf16.mxu1 %v7690_v35  ;;  %v7782_v34 = vld [vmem:[%s11089_s1 + $0xa8c] ss:$16 sps:$4 sm:$0xff]   ;;  %v7777_v35 = vld [vmem:[%s11089_s1 + $0xa80] ss:$16 sps:$4 sm:$0xff]  }
 0x117   :  { %5026 = vmatpush1.bf16.msra.mxu0 %v7685_v36  ;;  %5559 = vmatpush1.bf16.msra.mxu1 %v7688_v37  ;;  %v7780_v36 = vld [vmem:[%s11089_s1 + $0xa88] ss:$16 sps:$4 sm:$0xff]   ;;  %v7785_v37 = vld [vmem:[%s11089_s1 + $0xaa4] ss:$16 sps:$4 sm:$0xff]  }
 0x118   :  { %5027 = vmatprep.subr.bf16.mxu0 %v7693_v38  ;;  %5560 = vmatprep.subr.bf16.mxu1 %v7696_v39  ;;  %v7788_v38 = vld [vmem:[%s11089_s1 + $0xaac] ss:$16 sps:$4 sm:$0xff]   ;;  %v7783_v39 = vld [vmem:[%s11089_s1 + $0xaa0] ss:$16 sps:$4 sm:$0xff]  }
 0x11b   :  { %5028 = vmatpush1.bf16.msra.mxu0 %v7691_v40  ;;  %5561 = vmatpush1.bf16.msra.mxu1 %v7694_v41  ;;  %v7786_v40 = vld [vmem:[%s11089_s1 + $0xaa8] ss:$16 sps:$4 sm:$0xff]   ;;  %v7791_v41 = vld [vmem:[%s11089_s1 + $0xac4] ss:$16 sps:$4 sm:$0xff]  }
 0x11c   :  { %5029 = vmatprep.subr.bf16.mxu0 %v7699_v42  ;;  %5562 = vmatprep.subr.bf16.mxu1 %v7702_v43  ;;  %v7794_v42 = vld [vmem:[%s11089_s1 + $0xacc] ss:$16 sps:$4 sm:$0xff]   ;;  %v7789_v43 = vld [vmem:[%s11089_s1 + $0xac0] ss:$16 sps:$4 sm:$0xff]  }
 0x11f   :  { %5030 = vmatpush1.bf16.msra.mxu0 %v7697_v44  ;;  %5563 = vmatpush1.bf16.msra.mxu1 %v7700_v45  ;;  %v7792_v44 = vld [vmem:[%s11089_s1 + $0xac8] ss:$16 sps:$4 sm:$0xff]   ;;  %v7797_v45 = vld [vmem:[%s11089_s1 + $0xae4] ss:$16 sps:$4 sm:$0xff]  }
 0x120   :  { %5031 = vmatprep.subr.bf16.mxu0 %v7705_v46  ;;  %5564 = vmatprep.subr.bf16.mxu1 %v7708_v47  ;;  %v7800_v46 = vld [vmem:[%s11089_s1 + $0xaec] ss:$16 sps:$4 sm:$0xff]   ;;  %v7795_v47 = vld [vmem:[%s11089_s1 + $0xae0] ss:$16 sps:$4 sm:$0xff]  }
 0x123   :  { %5032 = vmatpush1.bf16.msra.mxu0 %v7703_v48  ;;  %5565 = vmatpush1.bf16.msra.mxu1 %v7706_v49  ;;  %v7798_v48 = vld [vmem:[%s11089_s1 + $0xae8] ss:$16 sps:$4 sm:$0xff]   ;;  %v7803_v49 = vld [vmem:[%s11089_s1 + $0xb04] ss:$16 sps:$4 sm:$0xff]  }
 0x124   :  { %5033 = vmatprep.subr.bf16.mxu0 %v7711_v50  ;;  %5566 = vmatprep.subr.bf16.mxu1 %v7714_v51  ;;  %v7806_v50 = vld [vmem:[%s11089_s1 + $0xb0c] ss:$16 sps:$4 sm:$0xff]   ;;  %v7801_v51 = vld [vmem:[%s11089_s1 + $0xb00] ss:$16 sps:$4 sm:$0xff]  }
 0x127   :  { %5034 = vmatpush1.bf16.msra.mxu0 %v7709_v52  ;;  %5567 = vmatpush1.bf16.msra.mxu1 %v7712_v53  ;;  %v7804_v52 = vld [vmem:[%s11089_s1 + $0xb08] ss:$16 sps:$4 sm:$0xff]   ;;  %v7809_v53 = vld [vmem:[%s11089_s1 + $0xb24] ss:$16 sps:$4 sm:$0xff]  }
 0x128   :  { %5035 = vmatprep.subr.bf16.mxu0 %v7717_v54  ;;  %5568 = vmatprep.subr.bf16.mxu1 %v7720_v55  ;;  %v7812_v54 = vld [vmem:[%s11089_s1 + $0xb2c] ss:$16 sps:$4 sm:$0xff]   ;;  %v7807_v55 = vld [vmem:[%s11089_s1 + $0xb20] ss:$16 sps:$4 sm:$0xff]  }
 0x12b   :  { %5036 = vmatpush1.bf16.msra.mxu0 %v7715_v56  ;;  %5569 = vmatpush1.bf16.msra.mxu1 %v7718_v57  ;;  %v7810_v56 = vld [vmem:[%s11089_s1 + $0xb28] ss:$16 sps:$4 sm:$0xff]   ;;  %v7815_v57 = vld [vmem:[%s11089_s1 + $0xb44] ss:$16 sps:$4 sm:$0xff]  }
 0x12c   :  { %5037 = vmatprep.subr.bf16.mxu0 %v7723_v58  ;;  %5570 = vmatprep.subr.bf16.mxu1 %v7726_v59  ;;  %v7818_v58 = vld [vmem:[%s11089_s1 + $0xb4c] ss:$16 sps:$4 sm:$0xff]   ;;  %v7813_v59 = vld [vmem:[%s11089_s1 + $0xb40] ss:$16 sps:$4 sm:$0xff]  }
 0x12f   :  { %5038 = vmatpush1.bf16.msra.mxu0 %v7721_v60  ;;  %5571 = vmatpush1.bf16.msra.mxu1 %v7724_v61  ;;  %v7816_v60 = vld [vmem:[%s11089_s1 + $0xb48] ss:$16 sps:$4 sm:$0xff]   ;;  %v7821_v61 = vld [vmem:[%s11089_s1 + $0xb64] ss:$16 sps:$4 sm:$0xff]  }
 0x130   :  { %5039 = vmatprep.subr.bf16.mxu0 %v7729_v62  ;;  %5572 = vmatprep.subr.bf16.mxu1 %v7732_v63  ;;  %v7824_v62 = vld [vmem:[%s11089_s1 + $0xb6c] ss:$16 sps:$4 sm:$0xff]   ;;  %v7819_v63 = vld [vmem:[%s11089_s1 + $0xb60] ss:$16 sps:$4 sm:$0xff]  }
 0x133   :  { %5040 = vmatpush1.bf16.msra.mxu0 %v7727_v0  ;;  %5573 = vmatpush1.bf16.msra.mxu1 %v7730_v1  ;;  %v7822_v0 = vld [vmem:[%s11089_s1 + $0xb68] ss:$16 sps:$4 sm:$0xff]   ;;  %v7827_v1 = vld [vmem:[%s11089_s1 + $0xb84] ss:$16 sps:$4 sm:$0xff]  }
 0x134   :  { %5041 = vmatprep.subr.bf16.mxu0 %v7735_v2  ;;  %5574 = vmatprep.subr.bf16.mxu1 %v7738_v3  ;;  %v7830_v2 = vld [vmem:[%s11089_s1 + $0xb8c] ss:$16 sps:$4 sm:$0xff]   ;;  %v7825_v3 = vld [vmem:[%s11089_s1 + $0xb80] ss:$16 sps:$4 sm:$0xff]  }
 0x137   :  { %5042 = vmatpush1.bf16.msra.mxu0 %v7733_v4  ;;  %5575 = vmatpush1.bf16.msra.mxu1 %v7736_v5  ;;  %v7828_v4 = vld [vmem:[%s11089_s1 + $0xb88] ss:$16 sps:$4 sm:$0xff]   ;;  %v7833_v5 = vld [vmem:[%s11089_s1 + $0xba4] ss:$16 sps:$4 sm:$0xff]  }
 0x138   :  { %5043 = vmatprep.subr.bf16.mxu0 %v7741_v6  ;;  %5576 = vmatprep.subr.bf16.mxu1 %v7744_v7  ;;  %v7836_v6 = vld [vmem:[%s11089_s1 + $0xbac] ss:$16 sps:$4 sm:$0xff]   ;;  %v7831_v7 = vld [vmem:[%s11089_s1 + $0xba0] ss:$16 sps:$4 sm:$0xff]  }
 0x13b   :  { %5044 = vmatpush1.bf16.msra.mxu0 %v7739_v8  ;;  %5577 = vmatpush1.bf16.msra.mxu1 %v7742_v9  ;;  %v7834_v8 = vld [vmem:[%s11089_s1 + $0xba8] ss:$16 sps:$4 sm:$0xff]   ;;  %v7839_v9 = vld [vmem:[%s11089_s1 + $0xbc4] ss:$16 sps:$4 sm:$0xff]  }
 0x13c   :  { %5045 = vmatprep.subr.bf16.mxu0 %v7747_v10  ;;  %5578 = vmatprep.subr.bf16.mxu1 %v7750_v12  ;;  %v7842_v10 = vld [vmem:[%s11089_s1 + $0xbcc] ss:$16 sps:$4 sm:$0xff]   ;;  %v7837_v12 = vld [vmem:[%s11089_s1 + $0xbc0] ss:$16 sps:$4 sm:$0xff]  }
 0x13f   :  { %5046 = vmatpush1.bf16.msra.mxu0 %v7745_v13  ;;  %5579 = vmatpush1.bf16.msra.mxu1 %v7748_v15  ;;  %v7840_v13 = vld [vmem:[%s11089_s1 + $0xbc8] ss:$16 sps:$4 sm:$0xff]   ;;  %v7845_v15 = vld [vmem:[%s11089_s1 + $0xbe4] ss:$16 sps:$4 sm:$0xff]  }
 0x140   :  { %5056 = vmatprep.subr.bf16.mxu0 %v7755_v11  ;;  %5589 = vmatprep.subr.bf16.mxu1 %v7758_v17  ;;  %v7848_v11 = vld [vmem:[%s11089_s1 + $0xbec] ss:$16 sps:$4 sm:$0xff]   ;;  %v7843_v17 = vld [vmem:[%s11089_s1 + $0xbe0] ss:$16 sps:$4 sm:$0xff]  }
 0x142   :  { %5048 = vmatmul.mubr.bf16.vlgmr.msra.gmra.mrb[0].mxu0 %v6282_v14  ;;  %5581 = vmatmul.mubr.bf16.vlgmr.msra.gmra.mrb[0].mxu1 %v6282_v14  ;;  %v7846_v14 = vld [vmem:[%s11089_s1 + $0xbe8] ss:$16 sps:$4 sm:$0xff]  }
 0x143   :  { %5057 = vmatpush1.bf16.msra.mxu0 %v7753_v19  ;;  %5590 = vmatpush1.bf16.msra.mxu1 %v7756_v20  ;;  %v7853_v19 = vld [vmem:[%s11089_s1 + $0xc04] ss:$16 sps:$4 sm:$0xff]   ;;  %v7856_v20 = vld [vmem:[%s11089_s1 + $0xc0c] ss:$16 sps:$4 sm:$0xff]  }
 0x144   :  { %5058 = vmatprep.subr.bf16.mxu0 %v7761_v21  ;;  %5591 = vmatprep.subr.bf16.mxu1 %v7764_v16  ;;  %v9734_v21 = vld [vmem:[%s11090_s0 + $0x30] sm:$0xff]  ;;  %v6284_v16 = vcombine.low %v9533_v18, %v9533_v18  ;;  %v7862_v18 = vld [vmem:[%s11089_s1 + $0xc2c] ss:$16 sps:$4 sm:$0xff]  }
 0x145   :  { %5088 = vmatprep.mubr.bf16.mxu0 %v6285_v22  ;;  %5621 = vmatprep.mubr.bf16.mxu1 %v6285_v22  ;;  %v7851_v22 = vld [vmem:[%s11089_s1 + $0xc00] ss:$16 sps:$4 sm:$0xff]  }
 0x147   :  { %5059 = vmatpush1.bf16.msra.mxu0 %v7759_v23  ;;  %5592 = vmatpush1.bf16.msra.mxu1 %v7762_v24  ;;  %v7854_v23 = vld [vmem:[%s11089_s1 + $0xc08] ss:$16 sps:$4 sm:$0xff]   ;;  %v7859_v24 = vld [vmem:[%s11089_s1 + $0xc24] ss:$16 sps:$4 sm:$0xff]  }
 0x148   :  { %5060 = vmatprep.subr.bf16.mxu0 %v7767_v25  ;;  %5593 = vmatprep.subr.bf16.mxu1 %v7770_v26  ;;  %v6287_v25 = vcombine.high %v9734_v21, %v9734_v21  ;;  %v7857_v26 = vld [vmem:[%s11089_s1 + $0xc20] ss:$16 sps:$4 sm:$0xff]  }
 0x14b   :  { %5061 = vmatpush1.bf16.msra.mxu0 %v7765_v27  ;;  %5594 = vmatpush1.bf16.msra.mxu1 %v7768_v28  ;;  %v7860_v27 = vld [vmem:[%s11089_s1 + $0xc28] ss:$16 sps:$4 sm:$0xff]   ;;  %v7865_v28 = vld [vmem:[%s11089_s1 + $0xc44] ss:$16 sps:$4 sm:$0xff]  }
 0x14c   :  { %5062 = vmatprep.subr.bf16.mxu0 %v7773_v29  ;;  %5595 = vmatprep.subr.bf16.mxu1 %v7776_v30  ;;  %v7868_v29 = vld [vmem:[%s11089_s1 + $0xc4c] ss:$16 sps:$4 sm:$0xff]   ;;  %v7863_v30 = vld [vmem:[%s11089_s1 + $0xc40] ss:$16 sps:$4 sm:$0xff]  }
 0x14f   :  { %5063 = vmatpush1.bf16.msra.mxu0 %v7771_v31  ;;  %5596 = vmatpush1.bf16.msra.mxu1 %v7774_v32  ;;  %v7866_v31 = vld [vmem:[%s11089_s1 + $0xc48] ss:$16 sps:$4 sm:$0xff]   ;;  %v7871_v32 = vld [vmem:[%s11089_s1 + $0xc64] ss:$16 sps:$4 sm:$0xff]  }
 0x150   :  { %5064 = vmatprep.subr.bf16.mxu0 %v7779_v33  ;;  %5597 = vmatprep.subr.bf16.mxu1 %v7782_v34  ;;  %v7874_v33 = vld [vmem:[%s11089_s1 + $0xc6c] ss:$16 sps:$4 sm:$0xff]   ;;  %v7869_v34 = vld [vmem:[%s11089_s1 + $0xc60] ss:$16 sps:$4 sm:$0xff]  }
 0x153   :  { %5065 = vmatpush1.bf16.msra.mxu0 %v7777_v35  ;;  %5598 = vmatpush1.bf16.msra.mxu1 %v7780_v36  ;;  %v7872_v35 = vld [vmem:[%s11089_s1 + $0xc68] ss:$16 sps:$4 sm:$0xff]   ;;  %v7877_v36 = vld [vmem:[%s11089_s1 + $0xc84] ss:$16 sps:$4 sm:$0xff]  }
 0x154   :  { %5066 = vmatprep.subr.bf16.mxu0 %v7785_v37  ;;  %5599 = vmatprep.subr.bf16.mxu1 %v7788_v38  ;;  %v7880_v37 = vld [vmem:[%s11089_s1 + $0xc8c] ss:$16 sps:$4 sm:$0xff]   ;;  %v7875_v38 = vld [vmem:[%s11089_s1 + $0xc80] ss:$16 sps:$4 sm:$0xff]  }
 0x157   :  { %5067 = vmatpush1.bf16.msra.mxu0 %v7783_v39  ;;  %5600 = vmatpush1.bf16.msra.mxu1 %v7786_v40  ;;  %v7878_v39 = vld [vmem:[%s11089_s1 + $0xc88] ss:$16 sps:$4 sm:$0xff]   ;;  %v7883_v40 = vld [vmem:[%s11089_s1 + $0xca4] ss:$16 sps:$4 sm:$0xff]  }
 0x158   :  { %5068 = vmatprep.subr.bf16.mxu0 %v7791_v41  ;;  %5601 = vmatprep.subr.bf16.mxu1 %v7794_v42  ;;  %v7886_v41 = vld [vmem:[%s11089_s1 + $0xcac] ss:$16 sps:$4 sm:$0xff]   ;;  %v7881_v42 = vld [vmem:[%s11089_s1 + $0xca0] ss:$16 sps:$4 sm:$0xff]  }
 0x15b   :  { %5069 = vmatpush1.bf16.msra.mxu0 %v7789_v43  ;;  %5602 = vmatpush1.bf16.msra.mxu1 %v7792_v44  ;;  %v7884_v43 = vld [vmem:[%s11089_s1 + $0xca8] ss:$16 sps:$4 sm:$0xff]   ;;  %v7889_v44 = vld [vmem:[%s11089_s1 + $0xcc4] ss:$16 sps:$4 sm:$0xff]  }
 0x15c   :  { %5070 = vmatprep.subr.bf16.mxu0 %v7797_v45  ;;  %5603 = vmatprep.subr.bf16.mxu1 %v7800_v46  ;;  %v7892_v45 = vld [vmem:[%s11089_s1 + $0xccc] ss:$16 sps:$4 sm:$0xff]   ;;  %v7887_v46 = vld [vmem:[%s11089_s1 + $0xcc0] ss:$16 sps:$4 sm:$0xff]  }
 0x15f   :  { %5071 = vmatpush1.bf16.msra.mxu0 %v7795_v47  ;;  %5604 = vmatpush1.bf16.msra.mxu1 %v7798_v48  ;;  %v7890_v47 = vld [vmem:[%s11089_s1 + $0xcc8] ss:$16 sps:$4 sm:$0xff]   ;;  %v7895_v48 = vld [vmem:[%s11089_s1 + $0xce4] ss:$16 sps:$4 sm:$0xff]  }
 0x160   :  { %5072 = vmatprep.subr.bf16.mxu0 %v7803_v49  ;;  %5605 = vmatprep.subr.bf16.mxu1 %v7806_v50  ;;  %v7898_v49 = vld [vmem:[%s11089_s1 + $0xcec] ss:$16 sps:$4 sm:$0xff]   ;;  %v7893_v50 = vld [vmem:[%s11089_s1 + $0xce0] ss:$16 sps:$4 sm:$0xff]  }
 0x163   :  { %5073 = vmatpush1.bf16.msra.mxu0 %v7801_v51  ;;  %5606 = vmatpush1.bf16.msra.mxu1 %v7804_v52  ;;  %v7896_v51 = vld [vmem:[%s11089_s1 + $0xce8] ss:$16 sps:$4 sm:$0xff]   ;;  %v7901_v52 = vld [vmem:[%s11089_s1 + $0xd04] ss:$16 sps:$4 sm:$0xff]  }
 0x164   :  { %5074 = vmatprep.subr.bf16.mxu0 %v7809_v53  ;;  %5607 = vmatprep.subr.bf16.mxu1 %v7812_v54  ;;  %v7904_v53 = vld [vmem:[%s11089_s1 + $0xd0c] ss:$16 sps:$4 sm:$0xff]   ;;  %v7899_v54 = vld [vmem:[%s11089_s1 + $0xd00] ss:$16 sps:$4 sm:$0xff]  }
 0x167   :  { %5075 = vmatpush1.bf16.msra.mxu0 %v7807_v55  ;;  %5608 = vmatpush1.bf16.msra.mxu1 %v7810_v56  ;;  %v7902_v55 = vld [vmem:[%s11089_s1 + $0xd08] ss:$16 sps:$4 sm:$0xff]   ;;  %v7907_v56 = vld [vmem:[%s11089_s1 + $0xd24] ss:$16 sps:$4 sm:$0xff]  }
 0x168   :  { %5076 = vmatprep.subr.bf16.mxu0 %v7815_v57  ;;  %5609 = vmatprep.subr.bf16.mxu1 %v7818_v58  ;;  %v7910_v57 = vld [vmem:[%s11089_s1 + $0xd2c] ss:$16 sps:$4 sm:$0xff]   ;;  %v7905_v58 = vld [vmem:[%s11089_s1 + $0xd20] ss:$16 sps:$4 sm:$0xff]  }
 0x16b   :  { %5077 = vmatpush1.bf16.msra.mxu0 %v7813_v59  ;;  %5610 = vmatpush1.bf16.msra.mxu1 %v7816_v60  ;;  %v7908_v59 = vld [vmem:[%s11089_s1 + $0xd28] ss:$16 sps:$4 sm:$0xff]   ;;  %v7913_v60 = vld [vmem:[%s11089_s1 + $0xd44] ss:$16 sps:$4 sm:$0xff]  }
 0x16c   :  { %5078 = vmatprep.subr.bf16.mxu0 %v7821_v61  ;;  %5611 = vmatprep.subr.bf16.mxu1 %v7824_v62  ;;  %v7916_v61 = vld [vmem:[%s11089_s1 + $0xd4c] ss:$16 sps:$4 sm:$0xff]   ;;  %v7911_v62 = vld [vmem:[%s11089_s1 + $0xd40] ss:$16 sps:$4 sm:$0xff]  }
 0x16f   :  { %5079 = vmatpush1.bf16.msra.mxu0 %v7819_v63  ;;  %5612 = vmatpush1.bf16.msra.mxu1 %v7822_v0  ;;  %v7914_v63 = vld [vmem:[%s11089_s1 + $0xd48] ss:$16 sps:$4 sm:$0xff]   ;;  %v7919_v0 = vld [vmem:[%s11089_s1 + $0xd64] ss:$16 sps:$4 sm:$0xff]  }
 0x170   :  { %5080 = vmatprep.subr.bf16.mxu0 %v7827_v1  ;;  %5613 = vmatprep.subr.bf16.mxu1 %v7830_v2  ;;  %v7922_v1 = vld [vmem:[%s11089_s1 + $0xd6c] ss:$16 sps:$4 sm:$0xff]   ;;  %v7917_v2 = vld [vmem:[%s11089_s1 + $0xd60] ss:$16 sps:$4 sm:$0xff]  }
 0x173   :  { %5081 = vmatpush1.bf16.msra.mxu0 %v7825_v3  ;;  %5614 = vmatpush1.bf16.msra.mxu1 %v7828_v4  ;;  %v7920_v3 = vld [vmem:[%s11089_s1 + $0xd68] ss:$16 sps:$4 sm:$0xff]   ;;  %v7925_v4 = vld [vmem:[%s11089_s1 + $0xd84] ss:$16 sps:$4 sm:$0xff]  }
 0x174   :  { %5082 = vmatprep.subr.bf16.mxu0 %v7833_v5  ;;  %5615 = vmatprep.subr.bf16.mxu1 %v7836_v6  ;;  %v7928_v5 = vld [vmem:[%s11089_s1 + $0xd8c] ss:$16 sps:$4 sm:$0xff]   ;;  %v7923_v6 = vld [vmem:[%s11089_s1 + $0xd80] ss:$16 sps:$4 sm:$0xff]  }
 0x177   :  { %5083 = vmatpush1.bf16.msra.mxu0 %v7831_v7  ;;  %5616 = vmatpush1.bf16.msra.mxu1 %v7834_v8  ;;  %v7926_v7 = vld [vmem:[%s11089_s1 + $0xd88] ss:$16 sps:$4 sm:$0xff]   ;;  %v7931_v8 = vld [vmem:[%s11089_s1 + $0xda4] ss:$16 sps:$4 sm:$0xff]  }
 0x178   :  { %5084 = vmatprep.subr.bf16.mxu0 %v7839_v9  ;;  %5617 = vmatprep.subr.bf16.mxu1 %v7842_v10  ;;  %v7934_v9 = vld [vmem:[%s11089_s1 + $0xdac] ss:$16 sps:$4 sm:$0xff]   ;;  %v7929_v10 = vld [vmem:[%s11089_s1 + $0xda0] ss:$16 sps:$4 sm:$0xff]  }
 0x17b   :  { %5085 = vmatpush1.bf16.msra.mxu0 %v7837_v12  ;;  %5618 = vmatpush1.bf16.msra.mxu1 %v7840_v13  ;;  %v7932_v12 = vld [vmem:[%s11089_s1 + $0xda8] ss:$16 sps:$4 sm:$0xff]   ;;  %v7937_v13 = vld [vmem:[%s11089_s1 + $0xdc4] ss:$16 sps:$4 sm:$0xff]  }
 0x17c   :  { %5086 = vmatprep.subr.bf16.mxu0 %v7845_v15  ;;  %5619 = vmatprep.subr.bf16.mxu1 %v7848_v11  ;;  %v7940_v15 = vld [vmem:[%s11089_s1 + $0xdcc] ss:$16 sps:$4 sm:$0xff]   ;;  %v7935_v11 = vld [vmem:[%s11089_s1 + $0xdc0] ss:$16 sps:$4 sm:$0xff]  }
 0x17f   :  { %5087 = vmatpush1.bf16.msra.mxu0 %v7843_v17  ;;  %5620 = vmatpush1.bf16.msra.mxu1 %v7846_v14  ;;  %v7938_v17 = vld [vmem:[%s11089_s1 + $0xdc8] ss:$16 sps:$4 sm:$0xff]   ;;  %v7943_v14 = vld [vmem:[%s11089_s1 + $0xde4] ss:$16 sps:$4 sm:$0xff]  }
 0x180   :  { %5097 = vmatprep.subr.bf16.mxu0 %v7853_v19  ;;  %5630 = vmatprep.subr.bf16.mxu1 %v7856_v20  ;;  %v7946_v19 = vld [vmem:[%s11089_s1 + $0xdec] ss:$16 sps:$4 sm:$0xff]   ;;  %v7941_v20 = vld [vmem:[%s11089_s1 + $0xde0] ss:$16 sps:$4 sm:$0xff]  }
 0x182   :  { %5089 = vmatmul.mubr.bf16.vlgmr.msra.gmra.mrb[0].mxu0 %v6284_v16  ;;  %5622 = vmatmul.mubr.bf16.vlgmr.msra.gmra.mrb[0].mxu1 %v6284_v16  ;;  %v7944_v16 = vld [vmem:[%s11089_s1 + $0xde8] ss:$16 sps:$4 sm:$0xff]  }
 0x183   :  { %5098 = vmatpush1.bf16.msra.mxu0 %v7851_v22  ;;  %5631 = vmatpush1.bf16.msra.mxu1 %v7854_v23  ;;  %v7951_v22 = vld [vmem:[%s11089_s1 + $0xe04] ss:$16 sps:$4 sm:$0xff]   ;;  %v7954_v23 = vld [vmem:[%s11089_s1 + $0xe0c] ss:$16 sps:$4 sm:$0xff]  }
 0x184   :  { %5099 = vmatprep.subr.bf16.mxu0 %v7859_v24  ;;  %5632 = vmatprep.subr.bf16.mxu1 %v7862_v18  ;;  %v9935_v24 = vld [vmem:[%s11090_s0 + $0x38] sm:$0xff]  ;;  %v6286_v18 = vcombine.low %v9734_v21, %v9734_v21 }
 0x185   :  { %5129 = vmatprep.mubr.bf16.mxu0 %v6287_v25  ;;  %5662 = vmatprep.mubr.bf16.mxu1 %v6287_v25  ;;  %v7949_v25 = vld [vmem:[%s11089_s1 + $0xe00] ss:$16 sps:$4 sm:$0xff]   ;;  %v7960_v21 = vld [vmem:[%s11089_s1 + $0xe2c] ss:$16 sps:$4 sm:$0xff]  }
 0x187   :  { %5100 = vmatpush1.bf16.msra.mxu0 %v7857_v26  ;;  %5633 = vmatpush1.bf16.msra.mxu1 %v7860_v27  ;;  %v7952_v26 = vld [vmem:[%s11089_s1 + $0xe08] ss:$16 sps:$4 sm:$0xff]   ;;  %v7957_v27 = vld [vmem:[%s11089_s1 + $0xe24] ss:$16 sps:$4 sm:$0xff]  }
 0x188   :  { %5101 = vmatprep.subr.bf16.mxu0 %v7865_v28  ;;  %5634 = vmatprep.subr.bf16.mxu1 %v7868_v29  ;;  %v6289_v28 = vcombine.high %v9935_v24, %v9935_v24  ;;  %v7955_v29 = vld [vmem:[%s11089_s1 + $0xe20] ss:$16 sps:$4 sm:$0xff]  }
 0x18b   :  { %5102 = vmatpush1.bf16.msra.mxu0 %v7863_v30  ;;  %5635 = vmatpush1.bf16.msra.mxu1 %v7866_v31  ;;  %v7958_v30 = vld [vmem:[%s11089_s1 + $0xe28] ss:$16 sps:$4 sm:$0xff]   ;;  %v7963_v31 = vld [vmem:[%s11089_s1 + $0xe44] ss:$16 sps:$4 sm:$0xff]  }
 0x18c   :  { %5103 = vmatprep.subr.bf16.mxu0 %v7871_v32  ;;  %5636 = vmatprep.subr.bf16.mxu1 %v7874_v33  ;;  %v7966_v32 = vld [vmem:[%s11089_s1 + $0xe4c] ss:$16 sps:$4 sm:$0xff]   ;;  %v7961_v33 = vld [vmem:[%s11089_s1 + $0xe40] ss:$16 sps:$4 sm:$0xff]  }
 0x18f   :  { %5104 = vmatpush1.bf16.msra.mxu0 %v7869_v34  ;;  %5637 = vmatpush1.bf16.msra.mxu1 %v7872_v35  ;;  %v7964_v34 = vld [vmem:[%s11089_s1 + $0xe48] ss:$16 sps:$4 sm:$0xff]   ;;  %v7969_v35 = vld [vmem:[%s11089_s1 + $0xe64] ss:$16 sps:$4 sm:$0xff]  }
 0x190   :  { %5105 = vmatprep.subr.bf16.mxu0 %v7877_v36  ;;  %5638 = vmatprep.subr.bf16.mxu1 %v7880_v37  ;;  %v7972_v36 = vld [vmem:[%s11089_s1 + $0xe6c] ss:$16 sps:$4 sm:$0xff]   ;;  %v7967_v37 = vld [vmem:[%s11089_s1 + $0xe60] ss:$16 sps:$4 sm:$0xff]  }
 0x193   :  { %5106 = vmatpush1.bf16.msra.mxu0 %v7875_v38  ;;  %5639 = vmatpush1.bf16.msra.mxu1 %v7878_v39  ;;  %v7970_v38 = vld [vmem:[%s11089_s1 + $0xe68] ss:$16 sps:$4 sm:$0xff]   ;;  %v7975_v39 = vld [vmem:[%s11089_s1 + $0xe84] ss:$16 sps:$4 sm:$0xff]  }
 0x194   :  { %5107 = vmatprep.subr.bf16.mxu0 %v7883_v40  ;;  %5640 = vmatprep.subr.bf16.mxu1 %v7886_v41  ;;  %v7978_v40 = vld [vmem:[%s11089_s1 + $0xe8c] ss:$16 sps:$4 sm:$0xff]   ;;  %v7973_v41 = vld [vmem:[%s11089_s1 + $0xe80] ss:$16 sps:$4 sm:$0xff]  }
 0x197   :  { %5108 = vmatpush1.bf16.msra.mxu0 %v7881_v42  ;;  %5641 = vmatpush1.bf16.msra.mxu1 %v7884_v43  ;;  %v7976_v42 = vld [vmem:[%s11089_s1 + $0xe88] ss:$16 sps:$4 sm:$0xff]   ;;  %v7981_v43 = vld [vmem:[%s11089_s1 + $0xea4] ss:$16 sps:$4 sm:$0xff]  }
 0x198   :  { %5109 = vmatprep.subr.bf16.mxu0 %v7889_v44  ;;  %5642 = vmatprep.subr.bf16.mxu1 %v7892_v45  ;;  %v7984_v44 = vld [vmem:[%s11089_s1 + $0xeac] ss:$16 sps:$4 sm:$0xff]   ;;  %v7979_v45 = vld [vmem:[%s11089_s1 + $0xea0] ss:$16 sps:$4 sm:$0xff]  }
 0x19b   :  { %5110 = vmatpush1.bf16.msra.mxu0 %v7887_v46  ;;  %5643 = vmatpush1.bf16.msra.mxu1 %v7890_v47  ;;  %v7982_v46 = vld [vmem:[%s11089_s1 + $0xea8] ss:$16 sps:$4 sm:$0xff]   ;;  %v7987_v47 = vld [vmem:[%s11089_s1 + $0xec4] ss:$16 sps:$4 sm:$0xff]  }
 0x19c   :  { %5111 = vmatprep.subr.bf16.mxu0 %v7895_v48  ;;  %5644 = vmatprep.subr.bf16.mxu1 %v7898_v49  ;;  %v7990_v48 = vld [vmem:[%s11089_s1 + $0xecc] ss:$16 sps:$4 sm:$0xff]   ;;  %v7985_v49 = vld [vmem:[%s11089_s1 + $0xec0] ss:$16 sps:$4 sm:$0xff]  }
 0x19f   :  { %5112 = vmatpush1.bf16.msra.mxu0 %v7893_v50  ;;  %5645 = vmatpush1.bf16.msra.mxu1 %v7896_v51  ;;  %v7988_v50 = vld [vmem:[%s11089_s1 + $0xec8] ss:$16 sps:$4 sm:$0xff]   ;;  %v7993_v51 = vld [vmem:[%s11089_s1 + $0xee4] ss:$16 sps:$4 sm:$0xff]  }
 0x1a0   :  { %5113 = vmatprep.subr.bf16.mxu0 %v7901_v52  ;;  %5646 = vmatprep.subr.bf16.mxu1 %v7904_v53  ;;  %v7996_v52 = vld [vmem:[%s11089_s1 + $0xeec] ss:$16 sps:$4 sm:$0xff]   ;;  %v7991_v53 = vld [vmem:[%s11089_s1 + $0xee0] ss:$16 sps:$4 sm:$0xff]  }
 0x1a3   :  { %5114 = vmatpush1.bf16.msra.mxu0 %v7899_v54  ;;  %5647 = vmatpush1.bf16.msra.mxu1 %v7902_v55  ;;  %v7994_v54 = vld [vmem:[%s11089_s1 + $0xee8] ss:$16 sps:$4 sm:$0xff]   ;;  %v7999_v55 = vld [vmem:[%s11089_s1 + $0xf04] ss:$16 sps:$4 sm:$0xff]  }
 0x1a4   :  { %5115 = vmatprep.subr.bf16.mxu0 %v7907_v56  ;;  %5648 = vmatprep.subr.bf16.mxu1 %v7910_v57  ;;  %v8002_v56 = vld [vmem:[%s11089_s1 + $0xf0c] ss:$16 sps:$4 sm:$0xff]   ;;  %v7997_v57 = vld [vmem:[%s11089_s1 + $0xf00] ss:$16 sps:$4 sm:$0xff]  }
 0x1a7   :  { %5116 = vmatpush1.bf16.msra.mxu0 %v7905_v58  ;;  %5649 = vmatpush1.bf16.msra.mxu1 %v7908_v59  ;;  %v8000_v58 = vld [vmem:[%s11089_s1 + $0xf08] ss:$16 sps:$4 sm:$0xff]   ;;  %v8005_v59 = vld [vmem:[%s11089_s1 + $0xf24] ss:$16 sps:$4 sm:$0xff]  }
 0x1a8   :  { %5117 = vmatprep.subr.bf16.mxu0 %v7913_v60  ;;  %5650 = vmatprep.subr.bf16.mxu1 %v7916_v61  ;;  %v8008_v60 = vld [vmem:[%s11089_s1 + $0xf2c] ss:$16 sps:$4 sm:$0xff]   ;;  %v8003_v61 = vld [vmem:[%s11089_s1 + $0xf20] ss:$16 sps:$4 sm:$0xff]  }
 0x1ab   :  { %5118 = vmatpush1.bf16.msra.mxu0 %v7911_v62  ;;  %5651 = vmatpush1.bf16.msra.mxu1 %v7914_v63  ;;  %v8006_v62 = vld [vmem:[%s11089_s1 + $0xf28] ss:$16 sps:$4 sm:$0xff]   ;;  %v8011_v63 = vld [vmem:[%s11089_s1 + $0xf44] ss:$16 sps:$4 sm:$0xff]  }
 0x1ac   :  { %5119 = vmatprep.subr.bf16.mxu0 %v7919_v0  ;;  %5652 = vmatprep.subr.bf16.mxu1 %v7922_v1  ;;  %v8014_v0 = vld [vmem:[%s11089_s1 + $0xf4c] ss:$16 sps:$4 sm:$0xff]   ;;  %v8009_v1 = vld [vmem:[%s11089_s1 + $0xf40] ss:$16 sps:$4 sm:$0xff]  }
 0x1af   :  { %5120 = vmatpush1.bf16.msra.mxu0 %v7917_v2  ;;  %5653 = vmatpush1.bf16.msra.mxu1 %v7920_v3  ;;  %v8012_v2 = vld [vmem:[%s11089_s1 + $0xf48] ss:$16 sps:$4 sm:$0xff]   ;;  %v8017_v3 = vld [vmem:[%s11089_s1 + $0xf64] ss:$16 sps:$4 sm:$0xff]  }
 0x1b0   :  { %5121 = vmatprep.subr.bf16.mxu0 %v7925_v4  ;;  %5654 = vmatprep.subr.bf16.mxu1 %v7928_v5  ;;  %v8020_v4 = vld [vmem:[%s11089_s1 + $0xf6c] ss:$16 sps:$4 sm:$0xff]   ;;  %v8015_v5 = vld [vmem:[%s11089_s1 + $0xf60] ss:$16 sps:$4 sm:$0xff]  }
 0x1b3   :  { %5122 = vmatpush1.bf16.msra.mxu0 %v7923_v6  ;;  %5655 = vmatpush1.bf16.msra.mxu1 %v7926_v7  ;;  %v8018_v6 = vld [vmem:[%s11089_s1 + $0xf68] ss:$16 sps:$4 sm:$0xff]   ;;  %v8023_v7 = vld [vmem:[%s11089_s1 + $0xf84] ss:$16 sps:$4 sm:$0xff]  }
 0x1b4   :  { %5123 = vmatprep.subr.bf16.mxu0 %v7931_v8  ;;  %5656 = vmatprep.subr.bf16.mxu1 %v7934_v9  ;;  %v8026_v8 = vld [vmem:[%s11089_s1 + $0xf8c] ss:$16 sps:$4 sm:$0xff]   ;;  %v8021_v9 = vld [vmem:[%s11089_s1 + $0xf80] ss:$16 sps:$4 sm:$0xff]  }
 0x1b7   :  { %5124 = vmatpush1.bf16.msra.mxu0 %v7929_v10  ;;  %5657 = vmatpush1.bf16.msra.mxu1 %v7932_v12  ;;  %v8024_v10 = vld [vmem:[%s11089_s1 + $0xf88] ss:$16 sps:$4 sm:$0xff]   ;;  %v8029_v12 = vld [vmem:[%s11089_s1 + $0xfa4] ss:$16 sps:$4 sm:$0xff]  }
 0x1b8   :  { %5125 = vmatprep.subr.bf16.mxu0 %v7937_v13  ;;  %5658 = vmatprep.subr.bf16.mxu1 %v7940_v15  ;;  %v8032_v13 = vld [vmem:[%s11089_s1 + $0xfac] ss:$16 sps:$4 sm:$0xff]   ;;  %v8027_v15 = vld [vmem:[%s11089_s1 + $0xfa0] ss:$16 sps:$4 sm:$0xff]  }
 0x1bb   :  { %5126 = vmatpush1.bf16.msra.mxu0 %v7935_v11  ;;  %5659 = vmatpush1.bf16.msra.mxu1 %v7938_v17  ;;  %v8030_v11 = vld [vmem:[%s11089_s1 + $0xfa8] ss:$16 sps:$4 sm:$0xff]   ;;  %v8035_v17 = vld [vmem:[%s11089_s1 + $0xfc4] ss:$16 sps:$4 sm:$0xff]  }
 0x1bc   :  { %5127 = vmatprep.subr.bf16.mxu0 %v7943_v14  ;;  %5660 = vmatprep.subr.bf16.mxu1 %v7946_v19  ;;  %v8038_v14 = vld [vmem:[%s11089_s1 + $0xfcc] ss:$16 sps:$4 sm:$0xff]   ;;  %v8033_v19 = vld [vmem:[%s11089_s1 + $0xfc0] ss:$16 sps:$4 sm:$0xff]  }
 0x1bf   :  { %5128 = vmatpush1.bf16.msra.mxu0 %v7941_v20  ;;  %5661 = vmatpush1.bf16.msra.mxu1 %v7944_v16  ;;  %v8036_v20 = vld [vmem:[%s11089_s1 + $0xfc8] ss:$16 sps:$4 sm:$0xff]   ;;  %v8041_v16 = vld [vmem:[%s11089_s1 + $0xfe4] ss:$16 sps:$4 sm:$0xff]  }
 0x1c0   :  { %5138 = vmatprep.subr.bf16.mxu0 %v7951_v22  ;;  %5671 = vmatprep.subr.bf16.mxu1 %v7954_v23  ;;  %v8044_v22 = vld [vmem:[%s11089_s1 + $0xfec] ss:$16 sps:$4 sm:$0xff]   ;;  %v8039_v23 = vld [vmem:[%s11089_s1 + $0xfe0] ss:$16 sps:$4 sm:$0xff]  }
 0x1c2   :  { %5130 = vmatmul.mubr.bf16.vlgmr.msra.gmra.mrb[0].mxu0 %v6286_v18  ;;  %5663 = vmatmul.mubr.bf16.vlgmr.msra.gmra.mrb[0].mxu1 %v6286_v18  ;;  %v8042_v18 = vld [vmem:[%s11089_s1 + $0xfe8] ss:$16 sps:$4 sm:$0xff]  }
 0x1c3   :  { %5139 = vmatpush1.bf16.msra.mxu0 %v7949_v25  ;;  %5672 = vmatpush1.bf16.msra.mxu1 %v7952_v26  ;;  %v8049_v25 = vld [vmem:[%s11089_s1 + $0x1004] ss:$16 sps:$4 sm:$0xff]   ;;  %v8052_v26 = vld [vmem:[%s11089_s1 + $0x100c] ss:$16 sps:$4 sm:$0xff]  }
 0x1c4   :  { %5140 = vmatprep.subr.bf16.mxu0 %v7957_v27  ;;  %5673 = vmatprep.subr.bf16.mxu1 %v7960_v21  ;;  %v6288_v27 = vcombine.low %v9935_v24, %v9935_v24  ;;  %v10138_v21 = vld [vmem:[%s11090_s0 + $0x40] sm:$0xff] }
 0x1c5   :  { %5170 = vmatprep.mubr.bf16.mxu0 %v6289_v28  ;;  %5703 = vmatprep.mubr.bf16.mxu1 %v6289_v28  ;;  %v8047_v28 = vld [vmem:[%s11089_s1 + $0x1000] ss:$16 sps:$4 sm:$0xff]   ;;  %v8055_v24 = vld [vmem:[%s11089_s1 + $0x1024] ss:$16 sps:$4 sm:$0xff]  }
 0x1c7   :  { %5141 = vmatpush1.bf16.msra.mxu0 %v7955_v29  ;;  %5674 = vmatpush1.bf16.msra.mxu1 %v7958_v30  ;;  %v8050_v29 = vld [vmem:[%s11089_s1 + $0x1008] ss:$16 sps:$4 sm:$0xff]   ;;  %v8058_v30 = vld [vmem:[%s11089_s1 + $0x102c] ss:$16 sps:$4 sm:$0xff]  }
 0x1c8   :  { %5142 = vmatprep.subr.bf16.mxu0 %v7963_v31  ;;  %5675 = vmatprep.subr.bf16.mxu1 %v7966_v32  ;;  %v6291_v31 = vcombine.high %v10138_v21, %v10138_v21  ;;  %v8053_v32 = vld [vmem:[%s11089_s1 + $0x1020] ss:$16 sps:$4 sm:$0xff]  }
 0x1cb   :  { %5143 = vmatpush1.bf16.msra.mxu0 %v7961_v33  ;;  %5676 = vmatpush1.bf16.msra.mxu1 %v7964_v34  ;;  %v8056_v33 = vld [vmem:[%s11089_s1 + $0x1028] ss:$16 sps:$4 sm:$0xff]   ;;  %v8061_v34 = vld [vmem:[%s11089_s1 + $0x1044] ss:$16 sps:$4 sm:$0xff]  }
 0x1cc   :  { %5144 = vmatprep.subr.bf16.mxu0 %v7969_v35  ;;  %5677 = vmatprep.subr.bf16.mxu1 %v7972_v36  ;;  %v8064_v35 = vld [vmem:[%s11089_s1 + $0x104c] ss:$16 sps:$4 sm:$0xff]   ;;  %v8059_v36 = vld [vmem:[%s11089_s1 + $0x1040] ss:$16 sps:$4 sm:$0xff]  }
 0x1cf   :  { %5145 = vmatpush1.bf16.msra.mxu0 %v7967_v37  ;;  %5678 = vmatpush1.bf16.msra.mxu1 %v7970_v38  ;;  %v8062_v37 = vld [vmem:[%s11089_s1 + $0x1048] ss:$16 sps:$4 sm:$0xff]   ;;  %v8067_v38 = vld [vmem:[%s11089_s1 + $0x1064] ss:$16 sps:$4 sm:$0xff]  }
 0x1d0   :  { %5146 = vmatprep.subr.bf16.mxu0 %v7975_v39  ;;  %5679 = vmatprep.subr.bf16.mxu1 %v7978_v40  ;;  %v8070_v39 = vld [vmem:[%s11089_s1 + $0x106c] ss:$16 sps:$4 sm:$0xff]   ;;  %v8065_v40 = vld [vmem:[%s11089_s1 + $0x1060] ss:$16 sps:$4 sm:$0xff]  }
 0x1d3   :  { %5147 = vmatpush1.bf16.msra.mxu0 %v7973_v41  ;;  %5680 = vmatpush1.bf16.msra.mxu1 %v7976_v42  ;;  %v8068_v41 = vld [vmem:[%s11089_s1 + $0x1068] ss:$16 sps:$4 sm:$0xff]   ;;  %v8073_v42 = vld [vmem:[%s11089_s1 + $0x1084] ss:$16 sps:$4 sm:$0xff]  }
 0x1d4   :  { %5148 = vmatprep.subr.bf16.mxu0 %v7981_v43  ;;  %5681 = vmatprep.subr.bf16.mxu1 %v7984_v44  ;;  %v8076_v43 = vld [vmem:[%s11089_s1 + $0x108c] ss:$16 sps:$4 sm:$0xff]   ;;  %v8071_v44 = vld [vmem:[%s11089_s1 + $0x1080] ss:$16 sps:$4 sm:$0xff]  }
 0x1d7   :  { %5149 = vmatpush1.bf16.msra.mxu0 %v7979_v45  ;;  %5682 = vmatpush1.bf16.msra.mxu1 %v7982_v46  ;;  %v8074_v45 = vld [vmem:[%s11089_s1 + $0x1088] ss:$16 sps:$4 sm:$0xff]   ;;  %v8079_v46 = vld [vmem:[%s11089_s1 + $0x10a4] ss:$16 sps:$4 sm:$0xff]  }
 0x1d8   :  { %5150 = vmatprep.subr.bf16.mxu0 %v7987_v47  ;;  %5683 = vmatprep.subr.bf16.mxu1 %v7990_v48  ;;  %v8082_v47 = vld [vmem:[%s11089_s1 + $0x10ac] ss:$16 sps:$4 sm:$0xff]   ;;  %v8077_v48 = vld [vmem:[%s11089_s1 + $0x10a0] ss:$16 sps:$4 sm:$0xff]  }
 0x1db   :  { %5151 = vmatpush1.bf16.msra.mxu0 %v7985_v49  ;;  %5684 = vmatpush1.bf16.msra.mxu1 %v7988_v50  ;;  %v8080_v49 = vld [vmem:[%s11089_s1 + $0x10a8] ss:$16 sps:$4 sm:$0xff]   ;;  %v8085_v50 = vld [vmem:[%s11089_s1 + $0x10c4] ss:$16 sps:$4 sm:$0xff]  }
 0x1dc   :  { %5152 = vmatprep.subr.bf16.mxu0 %v7993_v51  ;;  %5685 = vmatprep.subr.bf16.mxu1 %v7996_v52  ;;  %v8088_v51 = vld [vmem:[%s11089_s1 + $0x10cc] ss:$16 sps:$4 sm:$0xff]   ;;  %v8083_v52 = vld [vmem:[%s11089_s1 + $0x10c0] ss:$16 sps:$4 sm:$0xff]  }
 0x1df   :  { %5153 = vmatpush1.bf16.msra.mxu0 %v7991_v53  ;;  %5686 = vmatpush1.bf16.msra.mxu1 %v7994_v54  ;;  %v8086_v53 = vld [vmem:[%s11089_s1 + $0x10c8] ss:$16 sps:$4 sm:$0xff]   ;;  %v8091_v54 = vld [vmem:[%s11089_s1 + $0x10e4] ss:$16 sps:$4 sm:$0xff]  }
 0x1e0   :  { %5154 = vmatprep.subr.bf16.mxu0 %v7999_v55  ;;  %5687 = vmatprep.subr.bf16.mxu1 %v8002_v56  ;;  %v8094_v55 = vld [vmem:[%s11089_s1 + $0x10ec] ss:$16 sps:$4 sm:$0xff]   ;;  %v8089_v56 = vld [vmem:[%s11089_s1 + $0x10e0] ss:$16 sps:$4 sm:$0xff]  }
 0x1e3   :  { %5155 = vmatpush1.bf16.msra.mxu0 %v7997_v57  ;;  %5688 = vmatpush1.bf16.msra.mxu1 %v8000_v58  ;;  %v8092_v57 = vld [vmem:[%s11089_s1 + $0x10e8] ss:$16 sps:$4 sm:$0xff]   ;;  %v8097_v58 = vld [vmem:[%s11089_s1 + $0x1104] ss:$16 sps:$4 sm:$0xff]  }
 0x1e4   :  { %5156 = vmatprep.subr.bf16.mxu0 %v8005_v59  ;;  %5689 = vmatprep.subr.bf16.mxu1 %v8008_v60  ;;  %v8100_v59 = vld [vmem:[%s11089_s1 + $0x110c] ss:$16 sps:$4 sm:$0xff]   ;;  %v8095_v60 = vld [vmem:[%s11089_s1 + $0x1100] ss:$16 sps:$4 sm:$0xff]  }
 0x1e7   :  { %5157 = vmatpush1.bf16.msra.mxu0 %v8003_v61  ;;  %5690 = vmatpush1.bf16.msra.mxu1 %v8006_v62  ;;  %v8098_v61 = vld [vmem:[%s11089_s1 + $0x1108] ss:$16 sps:$4 sm:$0xff]   ;;  %v8103_v62 = vld [vmem:[%s11089_s1 + $0x1124] ss:$16 sps:$4 sm:$0xff]  }
 0x1e8   :  { %5158 = vmatprep.subr.bf16.mxu0 %v8011_v63  ;;  %5691 = vmatprep.subr.bf16.mxu1 %v8014_v0  ;;  %v8106_v63 = vld [vmem:[%s11089_s1 + $0x112c] ss:$16 sps:$4 sm:$0xff]   ;;  %v8101_v0 = vld [vmem:[%s11089_s1 + $0x1120] ss:$16 sps:$4 sm:$0xff]  }
 0x1eb   :  { %5159 = vmatpush1.bf16.msra.mxu0 %v8009_v1  ;;  %5692 = vmatpush1.bf16.msra.mxu1 %v8012_v2  ;;  %v8104_v1 = vld [vmem:[%s11089_s1 + $0x1128] ss:$16 sps:$4 sm:$0xff]   ;;  %v8109_v2 = vld [vmem:[%s11089_s1 + $0x1144] ss:$16 sps:$4 sm:$0xff]  }
 0x1ec   :  { %5160 = vmatprep.subr.bf16.mxu0 %v8017_v3  ;;  %5693 = vmatprep.subr.bf16.mxu1 %v8020_v4  ;;  %v8112_v3 = vld [vmem:[%s11089_s1 + $0x114c] ss:$16 sps:$4 sm:$0xff]   ;;  %v8107_v4 = vld [vmem:[%s11089_s1 + $0x1140] ss:$16 sps:$4 sm:$0xff]  }
 0x1ef   :  { %5161 = vmatpush1.bf16.msra.mxu0 %v8015_v5  ;;  %5694 = vmatpush1.bf16.msra.mxu1 %v8018_v6  ;;  %v8110_v5 = vld [vmem:[%s11089_s1 + $0x1148] ss:$16 sps:$4 sm:$0xff]   ;;  %v8115_v6 = vld [vmem:[%s11089_s1 + $0x1164] ss:$16 sps:$4 sm:$0xff]  }
 0x1f0   :  { %5162 = vmatprep.subr.bf16.mxu0 %v8023_v7  ;;  %5695 = vmatprep.subr.bf16.mxu1 %v8026_v8  ;;  %v8118_v7 = vld [vmem:[%s11089_s1 + $0x116c] ss:$16 sps:$4 sm:$0xff]   ;;  %v8113_v8 = vld [vmem:[%s11089_s1 + $0x1160] ss:$16 sps:$4 sm:$0xff]  }
 0x1f3   :  { %5163 = vmatpush1.bf16.msra.mxu0 %v8021_v9  ;;  %5696 = vmatpush1.bf16.msra.mxu1 %v8024_v10  ;;  %v8116_v9 = vld [vmem:[%s11089_s1 + $0x1168] ss:$16 sps:$4 sm:$0xff]   ;;  %v8121_v10 = vld [vmem:[%s11089_s1 + $0x1184] ss:$16 sps:$4 sm:$0xff]  }
 0x1f4   :  { %5164 = vmatprep.subr.bf16.mxu0 %v8029_v12  ;;  %5697 = vmatprep.subr.bf16.mxu1 %v8032_v13  ;;  %v8124_v12 = vld [vmem:[%s11089_s1 + $0x118c] ss:$16 sps:$4 sm:$0xff]   ;;  %v8119_v13 = vld [vmem:[%s11089_s1 + $0x1180] ss:$16 sps:$4 sm:$0xff]  }
 0x1f7   :  { %5165 = vmatpush1.bf16.msra.mxu0 %v8027_v15  ;;  %5698 = vmatpush1.bf16.msra.mxu1 %v8030_v11  ;;  %v8122_v15 = vld [vmem:[%s11089_s1 + $0x1188] ss:$16 sps:$4 sm:$0xff]   ;;  %v8127_v11 = vld [vmem:[%s11089_s1 + $0x11a4] ss:$16 sps:$4 sm:$0xff]  }
 0x1f8   :  { %5166 = vmatprep.subr.bf16.mxu0 %v8035_v17  ;;  %5699 = vmatprep.subr.bf16.mxu1 %v8038_v14  ;;  %v8130_v17 = vld [vmem:[%s11089_s1 + $0x11ac] ss:$16 sps:$4 sm:$0xff]   ;;  %v8125_v14 = vld [vmem:[%s11089_s1 + $0x11a0] ss:$16 sps:$4 sm:$0xff]  }
 0x1fb   :  { %5167 = vmatpush1.bf16.msra.mxu0 %v8033_v19  ;;  %5700 = vmatpush1.bf16.msra.mxu1 %v8036_v20  ;;  %v8128_v19 = vld [vmem:[%s11089_s1 + $0x11a8] ss:$16 sps:$4 sm:$0xff]   ;;  %v8133_v20 = vld [vmem:[%s11089_s1 + $0x11c4] ss:$16 sps:$4 sm:$0xff]  }
 0x1fc   :  { %5168 = vmatprep.subr.bf16.mxu0 %v8041_v16  ;;  %5701 = vmatprep.subr.bf16.mxu1 %v8044_v22  ;;  %v8136_v16 = vld [vmem:[%s11089_s1 + $0x11cc] ss:$16 sps:$4 sm:$0xff]   ;;  %v8131_v22 = vld [vmem:[%s11089_s1 + $0x11c0] ss:$16 sps:$4 sm:$0xff]  }
 0x1ff   :  { %5169 = vmatpush1.bf16.msra.mxu0 %v8039_v23  ;;  %5702 = vmatpush1.bf16.msra.mxu1 %v8042_v18  ;;  %v8134_v23 = vld [vmem:[%s11089_s1 + $0x11c8] ss:$16 sps:$4 sm:$0xff]   ;;  %v8139_v18 = vld [vmem:[%s11089_s1 + $0x11e4] ss:$16 sps:$4 sm:$0xff]  }
 0x200   :  { %5179 = vmatprep.subr.bf16.mxu0 %v8049_v25  ;;  %5712 = vmatprep.subr.bf16.mxu1 %v8052_v26  ;;  %v8142_v25 = vld [vmem:[%s11089_s1 + $0x11ec] ss:$16 sps:$4 sm:$0xff]   ;;  %v8137_v26 = vld [vmem:[%s11089_s1 + $0x11e0] ss:$16 sps:$4 sm:$0xff]  }
 0x202   :  { %5171 = vmatmul.mubr.bf16.vlgmr.msra.gmra.mrb[0].mxu0 %v6288_v27  ;;  %5704 = vmatmul.mubr.bf16.vlgmr.msra.gmra.mrb[0].mxu1 %v6288_v27  ;;  %v8140_v27 = vld [vmem:[%s11089_s1 + $0x11e8] ss:$16 sps:$4 sm:$0xff]  }
 0x203   :  { %5180 = vmatpush1.bf16.msra.mxu0 %v8047_v28  ;;  %5713 = vmatpush1.bf16.msra.mxu1 %v8050_v29  ;;  %v8147_v28 = vld [vmem:[%s11089_s1 + $0x1204] ss:$16 sps:$4 sm:$0xff]   ;;  %v8150_v29 = vld [vmem:[%s11089_s1 + $0x120c] ss:$16 sps:$4 sm:$0xff]  }
 0x204   :  { %5181 = vmatprep.subr.bf16.mxu0 %v8055_v24  ;;  %5714 = vmatprep.subr.bf16.mxu1 %v8058_v30  ;;  %v6290_v24 = vcombine.low %v10138_v21, %v10138_v21  ;;  %v10339_v30 = vld [vmem:[%s11090_s0 + $0x48] sm:$0xff]  ;;  %v8153_v21 = vld [vmem:[%s11089_s1 + $0x1224] ss:$16 sps:$4 sm:$0xff]  }
 0x205   :  { %5211 = vmatprep.mubr.bf16.mxu0 %v6291_v31  ;;  %5744 = vmatprep.mubr.bf16.mxu1 %v6291_v31  ;;  %v8145_v31 = vld [vmem:[%s11089_s1 + $0x1200] ss:$16 sps:$4 sm:$0xff]  }
 0x207   :  { %5182 = vmatpush1.bf16.msra.mxu0 %v8053_v32  ;;  %5715 = vmatpush1.bf16.msra.mxu1 %v8056_v33  ;;  %v8148_v32 = vld [vmem:[%s11089_s1 + $0x1208] ss:$16 sps:$4 sm:$0xff]   ;;  %v8156_v33 = vld [vmem:[%s11089_s1 + $0x122c] ss:$16 sps:$4 sm:$0xff]  }
 0x208   :  { %5183 = vmatprep.subr.bf16.mxu0 %v8061_v34  ;;  %5716 = vmatprep.subr.bf16.mxu1 %v8064_v35  ;;  %v6293_v34 = vcombine.high %v10339_v30, %v10339_v30  ;;  %v8151_v35 = vld [vmem:[%s11089_s1 + $0x1220] ss:$16 sps:$4 sm:$0xff]  }
 0x20b   :  { %5184 = vmatpush1.bf16.msra.mxu0 %v8059_v36  ;;  %5717 = vmatpush1.bf16.msra.mxu1 %v8062_v37  ;;  %v8154_v36 = vld [vmem:[%s11089_s1 + $0x1228] ss:$16 sps:$4 sm:$0xff]   ;;  %v8159_v37 = vld [vmem:[%s11089_s1 + $0x1244] ss:$16 sps:$4 sm:$0xff]  }
 0x20c   :  { %5185 = vmatprep.subr.bf16.mxu0 %v8067_v38  ;;  %5718 = vmatprep.subr.bf16.mxu1 %v8070_v39  ;;  %v8162_v38 = vld [vmem:[%s11089_s1 + $0x124c] ss:$16 sps:$4 sm:$0xff]   ;;  %v8157_v39 = vld [vmem:[%s11089_s1 + $0x1240] ss:$16 sps:$4 sm:$0xff]  }
 0x20f   :  { %5186 = vmatpush1.bf16.msra.mxu0 %v8065_v40  ;;  %5719 = vmatpush1.bf16.msra.mxu1 %v8068_v41  ;;  %v8160_v40 = vld [vmem:[%s11089_s1 + $0x1248] ss:$16 sps:$4 sm:$0xff]   ;;  %v8165_v41 = vld [vmem:[%s11089_s1 + $0x1264] ss:$16 sps:$4 sm:$0xff]  }
 0x210   :  { %5187 = vmatprep.subr.bf16.mxu0 %v8073_v42  ;;  %5720 = vmatprep.subr.bf16.mxu1 %v8076_v43  ;;  %v8168_v42 = vld [vmem:[%s11089_s1 + $0x126c] ss:$16 sps:$4 sm:$0xff]   ;;  %v8163_v43 = vld [vmem:[%s11089_s1 + $0x1260] ss:$16 sps:$4 sm:$0xff]  }
 0x213   :  { %5188 = vmatpush1.bf16.msra.mxu0 %v8071_v44  ;;  %5721 = vmatpush1.bf16.msra.mxu1 %v8074_v45  ;;  %v8166_v44 = vld [vmem:[%s11089_s1 + $0x1268] ss:$16 sps:$4 sm:$0xff]   ;;  %v8171_v45 = vld [vmem:[%s11089_s1 + $0x1284] ss:$16 sps:$4 sm:$0xff]  }
 0x214   :  { %5189 = vmatprep.subr.bf16.mxu0 %v8079_v46  ;;  %5722 = vmatprep.subr.bf16.mxu1 %v8082_v47  ;;  %v8174_v46 = vld [vmem:[%s11089_s1 + $0x128c] ss:$16 sps:$4 sm:$0xff]   ;;  %v8169_v47 = vld [vmem:[%s11089_s1 + $0x1280] ss:$16 sps:$4 sm:$0xff]  }
 0x217   :  { %5190 = vmatpush1.bf16.msra.mxu0 %v8077_v48  ;;  %5723 = vmatpush1.bf16.msra.mxu1 %v8080_v49  ;;  %v8172_v48 = vld [vmem:[%s11089_s1 + $0x1288] ss:$16 sps:$4 sm:$0xff]   ;;  %v8177_v49 = vld [vmem:[%s11089_s1 + $0x12a4] ss:$16 sps:$4 sm:$0xff]  }
 0x218   :  { %5191 = vmatprep.subr.bf16.mxu0 %v8085_v50  ;;  %5724 = vmatprep.subr.bf16.mxu1 %v8088_v51  ;;  %v8180_v50 = vld [vmem:[%s11089_s1 + $0x12ac] ss:$16 sps:$4 sm:$0xff]   ;;  %v8175_v51 = vld [vmem:[%s11089_s1 + $0x12a0] ss:$16 sps:$4 sm:$0xff]  }
 0x21b   :  { %5192 = vmatpush1.bf16.msra.mxu0 %v8083_v52  ;;  %5725 = vmatpush1.bf16.msra.mxu1 %v8086_v53  ;;  %v8178_v52 = vld [vmem:[%s11089_s1 + $0x12a8] ss:$16 sps:$4 sm:$0xff]   ;;  %v8183_v53 = vld [vmem:[%s11089_s1 + $0x12c4] ss:$16 sps:$4 sm:$0xff]  }
 0x21c   :  { %5193 = vmatprep.subr.bf16.mxu0 %v8091_v54  ;;  %5726 = vmatprep.subr.bf16.mxu1 %v8094_v55  ;;  %v8186_v54 = vld [vmem:[%s11089_s1 + $0x12cc] ss:$16 sps:$4 sm:$0xff]   ;;  %v8181_v55 = vld [vmem:[%s11089_s1 + $0x12c0] ss:$16 sps:$4 sm:$0xff]  }
 0x21f   :  { %5194 = vmatpush1.bf16.msra.mxu0 %v8089_v56  ;;  %5727 = vmatpush1.bf16.msra.mxu1 %v8092_v57  ;;  %v8184_v56 = vld [vmem:[%s11089_s1 + $0x12c8] ss:$16 sps:$4 sm:$0xff]   ;;  %v8189_v57 = vld [vmem:[%s11089_s1 + $0x12e4] ss:$16 sps:$4 sm:$0xff]  }
 0x220   :  { %5195 = vmatprep.subr.bf16.mxu0 %v8097_v58  ;;  %5728 = vmatprep.subr.bf16.mxu1 %v8100_v59  ;;  %v8192_v58 = vld [vmem:[%s11089_s1 + $0x12ec] ss:$16 sps:$4 sm:$0xff]   ;;  %v8187_v59 = vld [vmem:[%s11089_s1 + $0x12e0] ss:$16 sps:$4 sm:$0xff]  }
 0x223   :  { %5196 = vmatpush1.bf16.msra.mxu0 %v8095_v60  ;;  %5729 = vmatpush1.bf16.msra.mxu1 %v8098_v61  ;;  %v8190_v60 = vld [vmem:[%s11089_s1 + $0x12e8] ss:$16 sps:$4 sm:$0xff]   ;;  %v8195_v61 = vld [vmem:[%s11089_s1 + $0x1304] ss:$16 sps:$4 sm:$0xff]  }
 0x224   :  { %5197 = vmatprep.subr.bf16.mxu0 %v8103_v62  ;;  %5730 = vmatprep.subr.bf16.mxu1 %v8106_v63  ;;  %v8198_v62 = vld [vmem:[%s11089_s1 + $0x130c] ss:$16 sps:$4 sm:$0xff]   ;;  %v8193_v63 = vld [vmem:[%s11089_s1 + $0x1300] ss:$16 sps:$4 sm:$0xff]  }
 0x227   :  { %5198 = vmatpush1.bf16.msra.mxu0 %v8101_v0  ;;  %5731 = vmatpush1.bf16.msra.mxu1 %v8104_v1  ;;  %v8196_v0 = vld [vmem:[%s11089_s1 + $0x1308] ss:$16 sps:$4 sm:$0xff]   ;;  %v8201_v1 = vld [vmem:[%s11089_s1 + $0x1324] ss:$16 sps:$4 sm:$0xff]  }
 0x228   :  { %5199 = vmatprep.subr.bf16.mxu0 %v8109_v2  ;;  %5732 = vmatprep.subr.bf16.mxu1 %v8112_v3  ;;  %v8204_v2 = vld [vmem:[%s11089_s1 + $0x132c] ss:$16 sps:$4 sm:$0xff]   ;;  %v8199_v3 = vld [vmem:[%s11089_s1 + $0x1320] ss:$16 sps:$4 sm:$0xff]  }
 0x22b   :  { %5200 = vmatpush1.bf16.msra.mxu0 %v8107_v4  ;;  %5733 = vmatpush1.bf16.msra.mxu1 %v8110_v5  ;;  %v8202_v4 = vld [vmem:[%s11089_s1 + $0x1328] ss:$16 sps:$4 sm:$0xff]   ;;  %v8207_v5 = vld [vmem:[%s11089_s1 + $0x1344] ss:$16 sps:$4 sm:$0xff]  }
 0x22c   :  { %5201 = vmatprep.subr.bf16.mxu0 %v8115_v6  ;;  %5734 = vmatprep.subr.bf16.mxu1 %v8118_v7  ;;  %v8210_v6 = vld [vmem:[%s11089_s1 + $0x134c] ss:$16 sps:$4 sm:$0xff]   ;;  %v8205_v7 = vld [vmem:[%s11089_s1 + $0x1340] ss:$16 sps:$4 sm:$0xff]  }
 0x22f   :  { %5202 = vmatpush1.bf16.msra.mxu0 %v8113_v8  ;;  %5735 = vmatpush1.bf16.msra.mxu1 %v8116_v9  ;;  %v8208_v8 = vld [vmem:[%s11089_s1 + $0x1348] ss:$16 sps:$4 sm:$0xff]   ;;  %v8213_v9 = vld [vmem:[%s11089_s1 + $0x1364] ss:$16 sps:$4 sm:$0xff]  }
 0x230   :  { %5203 = vmatprep.subr.bf16.mxu0 %v8121_v10  ;;  %5736 = vmatprep.subr.bf16.mxu1 %v8124_v12  ;;  %v8216_v10 = vld [vmem:[%s11089_s1 + $0x136c] ss:$16 sps:$4 sm:$0xff]   ;;  %v8211_v12 = vld [vmem:[%s11089_s1 + $0x1360] ss:$16 sps:$4 sm:$0xff]  }
 0x233   :  { %5204 = vmatpush1.bf16.msra.mxu0 %v8119_v13  ;;  %5737 = vmatpush1.bf16.msra.mxu1 %v8122_v15  ;;  %v8214_v13 = vld [vmem:[%s11089_s1 + $0x1368] ss:$16 sps:$4 sm:$0xff]   ;;  %v8219_v15 = vld [vmem:[%s11089_s1 + $0x1384] ss:$16 sps:$4 sm:$0xff]  }
 0x234   :  { %5205 = vmatprep.subr.bf16.mxu0 %v8127_v11  ;;  %5738 = vmatprep.subr.bf16.mxu1 %v8130_v17  ;;  %v8222_v11 = vld [vmem:[%s11089_s1 + $0x138c] ss:$16 sps:$4 sm:$0xff]   ;;  %v8217_v17 = vld [vmem:[%s11089_s1 + $0x1380] ss:$16 sps:$4 sm:$0xff]  }
 0x237   :  { %5206 = vmatpush1.bf16.msra.mxu0 %v8125_v14  ;;  %5739 = vmatpush1.bf16.msra.mxu1 %v8128_v19  ;;  %v8220_v14 = vld [vmem:[%s11089_s1 + $0x1388] ss:$16 sps:$4 sm:$0xff]   ;;  %v8225_v19 = vld [vmem:[%s11089_s1 + $0x13a4] ss:$16 sps:$4 sm:$0xff]  }
 0x238   :  { %5207 = vmatprep.subr.bf16.mxu0 %v8133_v20  ;;  %5740 = vmatprep.subr.bf16.mxu1 %v8136_v16  ;;  %v8228_v20 = vld [vmem:[%s11089_s1 + $0x13ac] ss:$16 sps:$4 sm:$0xff]   ;;  %v8223_v16 = vld [vmem:[%s11089_s1 + $0x13a0] ss:$16 sps:$4 sm:$0xff]  }
 0x23b   :  { %5208 = vmatpush1.bf16.msra.mxu0 %v8131_v22  ;;  %5741 = vmatpush1.bf16.msra.mxu1 %v8134_v23  ;;  %v8226_v22 = vld [vmem:[%s11089_s1 + $0x13a8] ss:$16 sps:$4 sm:$0xff]   ;;  %v8231_v23 = vld [vmem:[%s11089_s1 + $0x13c4] ss:$16 sps:$4 sm:$0xff]  }
 0x23c   :  { %5209 = vmatprep.subr.bf16.mxu0 %v8139_v18  ;;  %5742 = vmatprep.subr.bf16.mxu1 %v8142_v25  ;;  %v8234_v18 = vld [vmem:[%s11089_s1 + $0x13cc] ss:$16 sps:$4 sm:$0xff]   ;;  %v8229_v25 = vld [vmem:[%s11089_s1 + $0x13c0] ss:$16 sps:$4 sm:$0xff]  }
 0x23f   :  { %5210 = vmatpush1.bf16.msra.mxu0 %v8137_v26  ;;  %5743 = vmatpush1.bf16.msra.mxu1 %v8140_v27  ;;  %v8232_v26 = vld [vmem:[%s11089_s1 + $0x13c8] ss:$16 sps:$4 sm:$0xff]   ;;  %v8237_v27 = vld [vmem:[%s11089_s1 + $0x13e4] ss:$16 sps:$4 sm:$0xff]  }
 0x240   :  { %5220 = vmatprep.subr.bf16.mxu0 %v8147_v28  ;;  %5753 = vmatprep.subr.bf16.mxu1 %v8150_v29  ;;  %v8240_v28 = vld [vmem:[%s11089_s1 + $0x13ec] ss:$16 sps:$4 sm:$0xff]   ;;  %v8235_v29 = vld [vmem:[%s11089_s1 + $0x13e0] ss:$16 sps:$4 sm:$0xff]  }
 0x242   :  { %5212 = vmatmul.mubr.bf16.vlgmr.msra.gmra.mrb[0].mxu0 %v6290_v24  ;;  %5745 = vmatmul.mubr.bf16.vlgmr.msra.gmra.mrb[0].mxu1 %v6290_v24  ;;  %v8238_v24 = vld [vmem:[%s11089_s1 + $0x13e8] ss:$16 sps:$4 sm:$0xff]  }
 0x243   :  { %5221 = vmatpush1.bf16.msra.mxu0 %v8145_v31  ;;  %5754 = vmatpush1.bf16.msra.mxu1 %v8148_v32  ;;  %v8245_v31 = vld [vmem:[%s11089_s1 + $0x1404] ss:$16 sps:$4 sm:$0xff]   ;;  %v8248_v32 = vld [vmem:[%s11089_s1 + $0x140c] ss:$16 sps:$4 sm:$0xff]  }
 0x244   :  { %5222 = vmatprep.subr.bf16.mxu0 %v8153_v21  ;;  %5755 = vmatprep.subr.bf16.mxu1 %v8156_v33  ;;  %v6292_v21 = vcombine.low %v10339_v30, %v10339_v30  ;;  %v10540_v33 = vld [vmem:[%s11090_s0 + $0x50] sm:$0xff] }
 0x245   :  { %5252 = vmatprep.mubr.bf16.mxu0 %v6293_v34  ;;  %5785 = vmatprep.mubr.bf16.mxu1 %v6293_v34  ;;  %v8243_v34 = vld [vmem:[%s11089_s1 + $0x1400] ss:$16 sps:$4 sm:$0xff]   ;;  %v8251_v30 = vld [vmem:[%s11089_s1 + $0x1424] ss:$16 sps:$4 sm:$0xff]  }
 0x247   :  { %5223 = vmatpush1.bf16.msra.mxu0 %v8151_v35  ;;  %5756 = vmatpush1.bf16.msra.mxu1 %v8154_v36  ;;  %v8246_v35 = vld [vmem:[%s11089_s1 + $0x1408] ss:$16 sps:$4 sm:$0xff]   ;;  %v8254_v36 = vld [vmem:[%s11089_s1 + $0x142c] ss:$16 sps:$4 sm:$0xff]  }
 0x248   :  { %5224 = vmatprep.subr.bf16.mxu0 %v8159_v37  ;;  %5757 = vmatprep.subr.bf16.mxu1 %v8162_v38  ;;  %v6295_v37 = vcombine.high %v10540_v33, %v10540_v33  ;;  %v8249_v38 = vld [vmem:[%s11089_s1 + $0x1420] ss:$16 sps:$4 sm:$0xff]  }
 0x24b   :  { %5225 = vmatpush1.bf16.msra.mxu0 %v8157_v39  ;;  %5758 = vmatpush1.bf16.msra.mxu1 %v8160_v40  ;;  %v8252_v39 = vld [vmem:[%s11089_s1 + $0x1428] ss:$16 sps:$4 sm:$0xff]   ;;  %v8257_v40 = vld [vmem:[%s11089_s1 + $0x1444] ss:$16 sps:$4 sm:$0xff]  }
 0x24c   :  { %5226 = vmatprep.subr.bf16.mxu0 %v8165_v41  ;;  %5759 = vmatprep.subr.bf16.mxu1 %v8168_v42  ;;  %v8260_v41 = vld [vmem:[%s11089_s1 + $0x144c] ss:$16 sps:$4 sm:$0xff]   ;;  %v8255_v42 = vld [vmem:[%s11089_s1 + $0x1440] ss:$16 sps:$4 sm:$0xff]  }
 0x24f   :  { %5227 = vmatpush1.bf16.msra.mxu0 %v8163_v43  ;;  %5760 = vmatpush1.bf16.msra.mxu1 %v8166_v44  ;;  %v8258_v43 = vld [vmem:[%s11089_s1 + $0x1448] ss:$16 sps:$4 sm:$0xff]   ;;  %v8263_v44 = vld [vmem:[%s11089_s1 + $0x1464] ss:$16 sps:$4 sm:$0xff]  }
 0x250   :  { %5228 = vmatprep.subr.bf16.mxu0 %v8171_v45  ;;  %5761 = vmatprep.subr.bf16.mxu1 %v8174_v46  ;;  %v8266_v45 = vld [vmem:[%s11089_s1 + $0x146c] ss:$16 sps:$4 sm:$0xff]   ;;  %v8261_v46 = vld [vmem:[%s11089_s1 + $0x1460] ss:$16 sps:$4 sm:$0xff]  }
 0x253   :  { %5229 = vmatpush1.bf16.msra.mxu0 %v8169_v47  ;;  %5762 = vmatpush1.bf16.msra.mxu1 %v8172_v48  ;;  %v8264_v47 = vld [vmem:[%s11089_s1 + $0x1468] ss:$16 sps:$4 sm:$0xff]   ;;  %v8269_v48 = vld [vmem:[%s11089_s1 + $0x1484] ss:$16 sps:$4 sm:$0xff]  }
 0x254   :  { %5230 = vmatprep.subr.bf16.mxu0 %v8177_v49  ;;  %5763 = vmatprep.subr.bf16.mxu1 %v8180_v50  ;;  %v8272_v49 = vld [vmem:[%s11089_s1 + $0x148c] ss:$16 sps:$4 sm:$0xff]   ;;  %v8267_v50 = vld [vmem:[%s11089_s1 + $0x1480] ss:$16 sps:$4 sm:$0xff]  }
 0x257   :  { %5231 = vmatpush1.bf16.msra.mxu0 %v8175_v51  ;;  %5764 = vmatpush1.bf16.msra.mxu1 %v8178_v52  ;;  %v8270_v51 = vld [vmem:[%s11089_s1 + $0x1488] ss:$16 sps:$4 sm:$0xff]   ;;  %v8275_v52 = vld [vmem:[%s11089_s1 + $0x14a4] ss:$16 sps:$4 sm:$0xff]  }
 0x258   :  { %5232 = vmatprep.subr.bf16.mxu0 %v8183_v53  ;;  %5765 = vmatprep.subr.bf16.mxu1 %v8186_v54  ;;  %v8278_v53 = vld [vmem:[%s11089_s1 + $0x14ac] ss:$16 sps:$4 sm:$0xff]   ;;  %v8273_v54 = vld [vmem:[%s11089_s1 + $0x14a0] ss:$16 sps:$4 sm:$0xff]  }
 0x25b   :  { %5233 = vmatpush1.bf16.msra.mxu0 %v8181_v55  ;;  %5766 = vmatpush1.bf16.msra.mxu1 %v8184_v56  ;;  %v8276_v55 = vld [vmem:[%s11089_s1 + $0x14a8] ss:$16 sps:$4 sm:$0xff]   ;;  %v8281_v56 = vld [vmem:[%s11089_s1 + $0x14c4] ss:$16 sps:$4 sm:$0xff]  }
 0x25c   :  { %5234 = vmatprep.subr.bf16.mxu0 %v8189_v57  ;;  %5767 = vmatprep.subr.bf16.mxu1 %v8192_v58  ;;  %v8284_v57 = vld [vmem:[%s11089_s1 + $0x14cc] ss:$16 sps:$4 sm:$0xff]   ;;  %v8279_v58 = vld [vmem:[%s11089_s1 + $0x14c0] ss:$16 sps:$4 sm:$0xff]  }
 0x25f   :  { %5235 = vmatpush1.bf16.msra.mxu0 %v8187_v59  ;;  %5768 = vmatpush1.bf16.msra.mxu1 %v8190_v60  ;;  %v8282_v59 = vld [vmem:[%s11089_s1 + $0x14c8] ss:$16 sps:$4 sm:$0xff]   ;;  %v8287_v60 = vld [vmem:[%s11089_s1 + $0x14e4] ss:$16 sps:$4 sm:$0xff]  }
 0x260   :  { %5236 = vmatprep.subr.bf16.mxu0 %v8195_v61  ;;  %5769 = vmatprep.subr.bf16.mxu1 %v8198_v62  ;;  %v8290_v61 = vld [vmem:[%s11089_s1 + $0x14ec] ss:$16 sps:$4 sm:$0xff]   ;;  %v8285_v62 = vld [vmem:[%s11089_s1 + $0x14e0] ss:$16 sps:$4 sm:$0xff]  }
 0x263   :  { %5237 = vmatpush1.bf16.msra.mxu0 %v8193_v63  ;;  %5770 = vmatpush1.bf16.msra.mxu1 %v8196_v0  ;;  %v8288_v63 = vld [vmem:[%s11089_s1 + $0x14e8] ss:$16 sps:$4 sm:$0xff]   ;;  %v8293_v0 = vld [vmem:[%s11089_s1 + $0x1504] ss:$16 sps:$4 sm:$0xff]  }
 0x264   :  { %5238 = vmatprep.subr.bf16.mxu0 %v8201_v1  ;;  %5771 = vmatprep.subr.bf16.mxu1 %v8204_v2  ;;  %v8296_v1 = vld [vmem:[%s11089_s1 + $0x150c] ss:$16 sps:$4 sm:$0xff]   ;;  %v8291_v2 = vld [vmem:[%s11089_s1 + $0x1500] ss:$16 sps:$4 sm:$0xff]  }
 0x267   :  { %5239 = vmatpush1.bf16.msra.mxu0 %v8199_v3  ;;  %5772 = vmatpush1.bf16.msra.mxu1 %v8202_v4  ;;  %v8294_v3 = vld [vmem:[%s11089_s1 + $0x1508] ss:$16 sps:$4 sm:$0xff]   ;;  %v8299_v4 = vld [vmem:[%s11089_s1 + $0x1524] ss:$16 sps:$4 sm:$0xff]  }
 0x268   :  { %5240 = vmatprep.subr.bf16.mxu0 %v8207_v5  ;;  %5773 = vmatprep.subr.bf16.mxu1 %v8210_v6  ;;  %v8302_v5 = vld [vmem:[%s11089_s1 + $0x152c] ss:$16 sps:$4 sm:$0xff]   ;;  %v8297_v6 = vld [vmem:[%s11089_s1 + $0x1520] ss:$16 sps:$4 sm:$0xff]  }
 0x26b   :  { %5241 = vmatpush1.bf16.msra.mxu0 %v8205_v7  ;;  %5774 = vmatpush1.bf16.msra.mxu1 %v8208_v8  ;;  %v8300_v7 = vld [vmem:[%s11089_s1 + $0x1528] ss:$16 sps:$4 sm:$0xff]   ;;  %v8305_v8 = vld [vmem:[%s11089_s1 + $0x1544] ss:$16 sps:$4 sm:$0xff]  }
 0x26c   :  { %5242 = vmatprep.subr.bf16.mxu0 %v8213_v9  ;;  %5775 = vmatprep.subr.bf16.mxu1 %v8216_v10  ;;  %v8308_v9 = vld [vmem:[%s11089_s1 + $0x154c] ss:$16 sps:$4 sm:$0xff]   ;;  %v8303_v10 = vld [vmem:[%s11089_s1 + $0x1540] ss:$16 sps:$4 sm:$0xff]  }
 0x26f   :  { %5243 = vmatpush1.bf16.msra.mxu0 %v8211_v12  ;;  %5776 = vmatpush1.bf16.msra.mxu1 %v8214_v13  ;;  %v8306_v12 = vld [vmem:[%s11089_s1 + $0x1548] ss:$16 sps:$4 sm:$0xff]   ;;  %v8311_v13 = vld [vmem:[%s11089_s1 + $0x1564] ss:$16 sps:$4 sm:$0xff]  }
 0x270   :  { %5244 = vmatprep.subr.bf16.mxu0 %v8219_v15  ;;  %5777 = vmatprep.subr.bf16.mxu1 %v8222_v11  ;;  %v8314_v15 = vld [vmem:[%s11089_s1 + $0x156c] ss:$16 sps:$4 sm:$0xff]   ;;  %v8309_v11 = vld [vmem:[%s11089_s1 + $0x1560] ss:$16 sps:$4 sm:$0xff]  }
 0x273   :  { %5245 = vmatpush1.bf16.msra.mxu0 %v8217_v17  ;;  %5778 = vmatpush1.bf16.msra.mxu1 %v8220_v14  ;;  %v8312_v17 = vld [vmem:[%s11089_s1 + $0x1568] ss:$16 sps:$4 sm:$0xff]   ;;  %v8317_v14 = vld [vmem:[%s11089_s1 + $0x1584] ss:$16 sps:$4 sm:$0xff]  }
 0x274   :  { %5246 = vmatprep.subr.bf16.mxu0 %v8225_v19  ;;  %5779 = vmatprep.subr.bf16.mxu1 %v8228_v20  ;;  %v8320_v19 = vld [vmem:[%s11089_s1 + $0x158c] ss:$16 sps:$4 sm:$0xff]   ;;  %v8315_v20 = vld [vmem:[%s11089_s1 + $0x1580] ss:$16 sps:$4 sm:$0xff]  }
 0x277   :  { %5247 = vmatpush1.bf16.msra.mxu0 %v8223_v16  ;;  %5780 = vmatpush1.bf16.msra.mxu1 %v8226_v22  ;;  %v8318_v16 = vld [vmem:[%s11089_s1 + $0x1588] ss:$16 sps:$4 sm:$0xff]   ;;  %v8323_v22 = vld [vmem:[%s11089_s1 + $0x15a4] ss:$16 sps:$4 sm:$0xff]  }
 0x278   :  { %5248 = vmatprep.subr.bf16.mxu0 %v8231_v23  ;;  %5781 = vmatprep.subr.bf16.mxu1 %v8234_v18  ;;  %v8326_v23 = vld [vmem:[%s11089_s1 + $0x15ac] ss:$16 sps:$4 sm:$0xff]   ;;  %v8321_v18 = vld [vmem:[%s11089_s1 + $0x15a0] ss:$16 sps:$4 sm:$0xff]  }
 0x27b   :  { %5249 = vmatpush1.bf16.msra.mxu0 %v8229_v25  ;;  %5782 = vmatpush1.bf16.msra.mxu1 %v8232_v26  ;;  %v8324_v25 = vld [vmem:[%s11089_s1 + $0x15a8] ss:$16 sps:$4 sm:$0xff]   ;;  %v8329_v26 = vld [vmem:[%s11089_s1 + $0x15c4] ss:$16 sps:$4 sm:$0xff]  }
 0x27c   :  { %5250 = vmatprep.subr.bf16.mxu0 %v8237_v27  ;;  %5783 = vmatprep.subr.bf16.mxu1 %v8240_v28  ;;  %v8332_v27 = vld [vmem:[%s11089_s1 + $0x15cc] ss:$16 sps:$4 sm:$0xff]   ;;  %v8327_v28 = vld [vmem:[%s11089_s1 + $0x15c0] ss:$16 sps:$4 sm:$0xff]  }
 0x27f   :  { %5251 = vmatpush1.bf16.msra.mxu0 %v8235_v29  ;;  %5784 = vmatpush1.bf16.msra.mxu1 %v8238_v24  ;;  %v8330_v29 = vld [vmem:[%s11089_s1 + $0x15c8] ss:$16 sps:$4 sm:$0xff]   ;;  %v8335_v24 = vld [vmem:[%s11089_s1 + $0x15e4] ss:$16 sps:$4 sm:$0xff]  }
 0x280   :  { %5261 = vmatprep.subr.bf16.mxu0 %v8245_v31  ;;  %5794 = vmatprep.subr.bf16.mxu1 %v8248_v32  ;;  %v8338_v31 = vld [vmem:[%s11089_s1 + $0x15ec] ss:$16 sps:$4 sm:$0xff]   ;;  %v8333_v32 = vld [vmem:[%s11089_s1 + $0x15e0] ss:$16 sps:$4 sm:$0xff]  }
 0x282   :  { %5253 = vmatmul.mubr.bf16.vlgmr.msra.gmra.mrb[0].mxu0 %v6292_v21  ;;  %5786 = vmatmul.mubr.bf16.vlgmr.msra.gmra.mrb[0].mxu1 %v6292_v21  ;;  %v8336_v21 = vld [vmem:[%s11089_s1 + $0x15e8] ss:$16 sps:$4 sm:$0xff]  }
 0x283   :  { %5262 = vmatpush1.bf16.msra.mxu0 %v8243_v34  ;;  %5795 = vmatpush1.bf16.msra.mxu1 %v8246_v35  ;;  %v8343_v34 = vld [vmem:[%s11089_s1 + $0x1604] ss:$16 sps:$4 sm:$0xff]   ;;  %v8346_v35 = vld [vmem:[%s11089_s1 + $0x160c] ss:$16 sps:$4 sm:$0xff]  }
 0x284   :  { %5263 = vmatprep.subr.bf16.mxu0 %v8251_v30  ;;  %5796 = vmatprep.subr.bf16.mxu1 %v8254_v36  ;;  %v6294_v30 = vcombine.low %v10540_v33, %v10540_v33  ;;  %v10741_v36 = vld [vmem:[%s11090_s0 + $0x58] sm:$0xff]  ;;  %v8349_v33 = vld [vmem:[%s11089_s1 + $0x1624] ss:$16 sps:$4 sm:$0xff]  }
 0x285   :  { %5293 = vmatprep.mubr.bf16.mxu0 %v6295_v37  ;;  %5826 = vmatprep.mubr.bf16.mxu1 %v6295_v37  ;;  %v8341_v37 = vld [vmem:[%s11089_s1 + $0x1600] ss:$16 sps:$4 sm:$0xff]  }
 0x287   :  { %5264 = vmatpush1.bf16.msra.mxu0 %v8249_v38  ;;  %5797 = vmatpush1.bf16.msra.mxu1 %v8252_v39  ;;  %v8344_v38 = vld [vmem:[%s11089_s1 + $0x1608] ss:$16 sps:$4 sm:$0xff]   ;;  %v8352_v39 = vld [vmem:[%s11089_s1 + $0x162c] ss:$16 sps:$4 sm:$0xff]  }
 0x288   :  { %5265 = vmatprep.subr.bf16.mxu0 %v8257_v40  ;;  %5798 = vmatprep.subr.bf16.mxu1 %v8260_v41  ;;  %v6297_v40 = vcombine.high %v10741_v36, %v10741_v36  ;;  %v8347_v41 = vld [vmem:[%s11089_s1 + $0x1620] ss:$16 sps:$4 sm:$0xff]  }
 0x28b   :  { %5266 = vmatpush1.bf16.msra.mxu0 %v8255_v42  ;;  %5799 = vmatpush1.bf16.msra.mxu1 %v8258_v43  ;;  %v8350_v42 = vld [vmem:[%s11089_s1 + $0x1628] ss:$16 sps:$4 sm:$0xff]   ;;  %v8355_v43 = vld [vmem:[%s11089_s1 + $0x1644] ss:$16 sps:$4 sm:$0xff]  }
 0x28c   :  { %5267 = vmatprep.subr.bf16.mxu0 %v8263_v44  ;;  %5800 = vmatprep.subr.bf16.mxu1 %v8266_v45  ;;  %v8358_v44 = vld [vmem:[%s11089_s1 + $0x164c] ss:$16 sps:$4 sm:$0xff]   ;;  %v8353_v45 = vld [vmem:[%s11089_s1 + $0x1640] ss:$16 sps:$4 sm:$0xff]  }
 0x28f   :  { %5268 = vmatpush1.bf16.msra.mxu0 %v8261_v46  ;;  %5801 = vmatpush1.bf16.msra.mxu1 %v8264_v47  ;;  %v8356_v46 = vld [vmem:[%s11089_s1 + $0x1648] ss:$16 sps:$4 sm:$0xff]   ;;  %v8361_v47 = vld [vmem:[%s11089_s1 + $0x1664] ss:$16 sps:$4 sm:$0xff]  }
 0x290   :  { %5269 = vmatprep.subr.bf16.mxu0 %v8269_v48  ;;  %5802 = vmatprep.subr.bf16.mxu1 %v8272_v49  ;;  %v8364_v48 = vld [vmem:[%s11089_s1 + $0x166c] ss:$16 sps:$4 sm:$0xff]   ;;  %v8359_v49 = vld [vmem:[%s11089_s1 + $0x1660] ss:$16 sps:$4 sm:$0xff]  }
 0x293   :  { %5270 = vmatpush1.bf16.msra.mxu0 %v8267_v50  ;;  %5803 = vmatpush1.bf16.msra.mxu1 %v8270_v51  ;;  %v8362_v50 = vld [vmem:[%s11089_s1 + $0x1668] ss:$16 sps:$4 sm:$0xff]   ;;  %v8367_v51 = vld [vmem:[%s11089_s1 + $0x1684] ss:$16 sps:$4 sm:$0xff]  }
 0x294   :  { %5271 = vmatprep.subr.bf16.mxu0 %v8275_v52  ;;  %5804 = vmatprep.subr.bf16.mxu1 %v8278_v53  ;;  %v8370_v52 = vld [vmem:[%s11089_s1 + $0x168c] ss:$16 sps:$4 sm:$0xff]   ;;  %v8365_v53 = vld [vmem:[%s11089_s1 + $0x1680] ss:$16 sps:$4 sm:$0xff]  }
 0x297   :  { %5272 = vmatpush1.bf16.msra.mxu0 %v8273_v54  ;;  %5805 = vmatpush1.bf16.msra.mxu1 %v8276_v55  ;;  %v8368_v54 = vld [vmem:[%s11089_s1 + $0x1688] ss:$16 sps:$4 sm:$0xff]   ;;  %v8373_v55 = vld [vmem:[%s11089_s1 + $0x16a4] ss:$16 sps:$4 sm:$0xff]  }
 0x298   :  { %5273 = vmatprep.subr.bf16.mxu0 %v8281_v56  ;;  %5806 = vmatprep.subr.bf16.mxu1 %v8284_v57  ;;  %v8376_v56 = vld [vmem:[%s11089_s1 + $0x16ac] ss:$16 sps:$4 sm:$0xff]   ;;  %v8371_v57 = vld [vmem:[%s11089_s1 + $0x16a0] ss:$16 sps:$4 sm:$0xff]  }
 0x29b   :  { %5274 = vmatpush1.bf16.msra.mxu0 %v8279_v58  ;;  %5807 = vmatpush1.bf16.msra.mxu1 %v8282_v59  ;;  %v8374_v58 = vld [vmem:[%s11089_s1 + $0x16a8] ss:$16 sps:$4 sm:$0xff]   ;;  %v8379_v59 = vld [vmem:[%s11089_s1 + $0x16c4] ss:$16 sps:$4 sm:$0xff]  }
 0x29c   :  { %5275 = vmatprep.subr.bf16.mxu0 %v8287_v60  ;;  %5808 = vmatprep.subr.bf16.mxu1 %v8290_v61  ;;  %v8382_v60 = vld [vmem:[%s11089_s1 + $0x16cc] ss:$16 sps:$4 sm:$0xff]   ;;  %v8377_v61 = vld [vmem:[%s11089_s1 + $0x16c0] ss:$16 sps:$4 sm:$0xff]  }
 0x29f   :  { %5276 = vmatpush1.bf16.msra.mxu0 %v8285_v62  ;;  %5809 = vmatpush1.bf16.msra.mxu1 %v8288_v63  ;;  %v8380_v62 = vld [vmem:[%s11089_s1 + $0x16c8] ss:$16 sps:$4 sm:$0xff]   ;;  %v8385_v63 = vld [vmem:[%s11089_s1 + $0x16e4] ss:$16 sps:$4 sm:$0xff]  }
 0x2a0   :  { %5277 = vmatprep.subr.bf16.mxu0 %v8293_v0  ;;  %5810 = vmatprep.subr.bf16.mxu1 %v8296_v1  ;;  %v8388_v0 = vld [vmem:[%s11089_s1 + $0x16ec] ss:$16 sps:$4 sm:$0xff]   ;;  %v8383_v1 = vld [vmem:[%s11089_s1 + $0x16e0] ss:$16 sps:$4 sm:$0xff]  }
 0x2a3   :  { %5278 = vmatpush1.bf16.msra.mxu0 %v8291_v2  ;;  %5811 = vmatpush1.bf16.msra.mxu1 %v8294_v3  ;;  %v8386_v2 = vld [vmem:[%s11089_s1 + $0x16e8] ss:$16 sps:$4 sm:$0xff]   ;;  %v8391_v3 = vld [vmem:[%s11089_s1 + $0x1704] ss:$16 sps:$4 sm:$0xff]  }
 0x2a4   :  { %5279 = vmatprep.subr.bf16.mxu0 %v8299_v4  ;;  %5812 = vmatprep.subr.bf16.mxu1 %v8302_v5  ;;  %v8394_v4 = vld [vmem:[%s11089_s1 + $0x170c] ss:$16 sps:$4 sm:$0xff]   ;;  %v8389_v5 = vld [vmem:[%s11089_s1 + $0x1700] ss:$16 sps:$4 sm:$0xff]  }
 0x2a7   :  { %5280 = vmatpush1.bf16.msra.mxu0 %v8297_v6  ;;  %5813 = vmatpush1.bf16.msra.mxu1 %v8300_v7  ;;  %v8392_v6 = vld [vmem:[%s11089_s1 + $0x1708] ss:$16 sps:$4 sm:$0xff]   ;;  %v8397_v7 = vld [vmem:[%s11089_s1 + $0x1724] ss:$16 sps:$4 sm:$0xff]  }
 0x2a8   :  { %5281 = vmatprep.subr.bf16.mxu0 %v8305_v8  ;;  %5814 = vmatprep.subr.bf16.mxu1 %v8308_v9  ;;  %v8400_v8 = vld [vmem:[%s11089_s1 + $0x172c] ss:$16 sps:$4 sm:$0xff]   ;;  %v8395_v9 = vld [vmem:[%s11089_s1 + $0x1720] ss:$16 sps:$4 sm:$0xff]  }
 0x2ab   :  { %5282 = vmatpush1.bf16.msra.mxu0 %v8303_v10  ;;  %5815 = vmatpush1.bf16.msra.mxu1 %v8306_v12  ;;  %v8398_v10 = vld [vmem:[%s11089_s1 + $0x1728] ss:$16 sps:$4 sm:$0xff]   ;;  %v8403_v12 = vld [vmem:[%s11089_s1 + $0x1744] ss:$16 sps:$4 sm:$0xff]  }
 0x2ac   :  { %5283 = vmatprep.subr.bf16.mxu0 %v8311_v13  ;;  %5816 = vmatprep.subr.bf16.mxu1 %v8314_v15  ;;  %v8406_v13 = vld [vmem:[%s11089_s1 + $0x174c] ss:$16 sps:$4 sm:$0xff]   ;;  %v8401_v15 = vld [vmem:[%s11089_s1 + $0x1740] ss:$16 sps:$4 sm:$0xff]  }
 0x2af   :  { %5284 = vmatpush1.bf16.msra.mxu0 %v8309_v11  ;;  %5817 = vmatpush1.bf16.msra.mxu1 %v8312_v17  ;;  %v8404_v11 = vld [vmem:[%s11089_s1 + $0x1748] ss:$16 sps:$4 sm:$0xff]   ;;  %v8409_v17 = vld [vmem:[%s11089_s1 + $0x1764] ss:$16 sps:$4 sm:$0xff]  }
 0x2b0   :  { %5285 = vmatprep.subr.bf16.mxu0 %v8317_v14  ;;  %5818 = vmatprep.subr.bf16.mxu1 %v8320_v19  ;;  %v8412_v14 = vld [vmem:[%s11089_s1 + $0x176c] ss:$16 sps:$4 sm:$0xff]   ;;  %v8407_v19 = vld [vmem:[%s11089_s1 + $0x1760] ss:$16 sps:$4 sm:$0xff]  }
 0x2b3   :  { %5286 = vmatpush1.bf16.msra.mxu0 %v8315_v20  ;;  %5819 = vmatpush1.bf16.msra.mxu1 %v8318_v16  ;;  %v8410_v20 = vld [vmem:[%s11089_s1 + $0x1768] ss:$16 sps:$4 sm:$0xff]   ;;  %v8415_v16 = vld [vmem:[%s11089_s1 + $0x1784] ss:$16 sps:$4 sm:$0xff]  }
 0x2b4   :  { %5287 = vmatprep.subr.bf16.mxu0 %v8323_v22  ;;  %5820 = vmatprep.subr.bf16.mxu1 %v8326_v23  ;;  %v8418_v22 = vld [vmem:[%s11089_s1 + $0x178c] ss:$16 sps:$4 sm:$0xff]   ;;  %v8413_v23 = vld [vmem:[%s11089_s1 + $0x1780] ss:$16 sps:$4 sm:$0xff]  }
 0x2b7   :  { %5288 = vmatpush1.bf16.msra.mxu0 %v8321_v18  ;;  %5821 = vmatpush1.bf16.msra.mxu1 %v8324_v25  ;;  %v8416_v18 = vld [vmem:[%s11089_s1 + $0x1788] ss:$16 sps:$4 sm:$0xff]   ;;  %v8421_v25 = vld [vmem:[%s11089_s1 + $0x17a4] ss:$16 sps:$4 sm:$0xff]  }
 0x2b8   :  { %5289 = vmatprep.subr.bf16.mxu0 %v8329_v26  ;;  %5822 = vmatprep.subr.bf16.mxu1 %v8332_v27  ;;  %v8424_v26 = vld [vmem:[%s11089_s1 + $0x17ac] ss:$16 sps:$4 sm:$0xff]   ;;  %v8419_v27 = vld [vmem:[%s11089_s1 + $0x17a0] ss:$16 sps:$4 sm:$0xff]  }
 0x2bb   :  { %5290 = vmatpush1.bf16.msra.mxu0 %v8327_v28  ;;  %5823 = vmatpush1.bf16.msra.mxu1 %v8330_v29  ;;  %v8422_v28 = vld [vmem:[%s11089_s1 + $0x17a8] ss:$16 sps:$4 sm:$0xff]   ;;  %v8427_v29 = vld [vmem:[%s11089_s1 + $0x17c4] ss:$16 sps:$4 sm:$0xff]  }
 0x2bc   :  { %5291 = vmatprep.subr.bf16.mxu0 %v8335_v24  ;;  %5824 = vmatprep.subr.bf16.mxu1 %v8338_v31  ;;  %v8430_v24 = vld [vmem:[%s11089_s1 + $0x17cc] ss:$16 sps:$4 sm:$0xff]   ;;  %v8425_v31 = vld [vmem:[%s11089_s1 + $0x17c0] ss:$16 sps:$4 sm:$0xff]  }
 0x2bf   :  { %5292 = vmatpush1.bf16.msra.mxu0 %v8333_v32  ;;  %5825 = vmatpush1.bf16.msra.mxu1 %v8336_v21  ;;  %v8428_v32 = vld [vmem:[%s11089_s1 + $0x17c8] ss:$16 sps:$4 sm:$0xff]   ;;  %v8433_v21 = vld [vmem:[%s11089_s1 + $0x17e4] ss:$16 sps:$4 sm:$0xff]  }
 0x2c0   :  { %5302 = vmatprep.subr.bf16.mxu0 %v8343_v34  ;;  %5835 = vmatprep.subr.bf16.mxu1 %v8346_v35  ;;  %v8436_v34 = vld [vmem:[%s11089_s1 + $0x17ec] ss:$16 sps:$4 sm:$0xff]   ;;  %v8431_v35 = vld [vmem:[%s11089_s1 + $0x17e0] ss:$16 sps:$4 sm:$0xff]  }
 0x2c2   :  { %5294 = vmatmul.mubr.bf16.vlgmr.msra.gmra.mrb[0].mxu0 %v6294_v30  ;;  %5827 = vmatmul.mubr.bf16.vlgmr.msra.gmra.mrb[0].mxu1 %v6294_v30  ;;  %v8434_v30 = vld [vmem:[%s11089_s1 + $0x17e8] ss:$16 sps:$4 sm:$0xff]  }
 0x2c3   :  { %5303 = vmatpush1.bf16.msra.mxu0 %v8341_v37  ;;  %5836 = vmatpush1.bf16.msra.mxu1 %v8344_v38  ;;  %v8441_v37 = vld [vmem:[%s11089_s1 + $0x1804] ss:$16 sps:$4 sm:$0xff]   ;;  %v8444_v38 = vld [vmem:[%s11089_s1 + $0x180c] ss:$16 sps:$4 sm:$0xff]  }
 0x2c4   :  { %5304 = vmatprep.subr.bf16.mxu0 %v8349_v33  ;;  %5837 = vmatprep.subr.bf16.mxu1 %v8352_v39  ;;  %v6296_v33 = vcombine.low %v10741_v36, %v10741_v36  ;;  %v8439_v39 = vld [vmem:[%s11089_s1 + $0x1800] ss:$16 sps:$4 sm:$0xff]   ;;  %v8450_v36 = vld [vmem:[%s11089_s1 + $0x182c] ss:$16 sps:$4 sm:$0xff]  }
 0x2c5   :  { %5334 = vmatprep.mubr.bf16.mxu0 %v6297_v40  ;;  %5867 = vmatprep.mubr.bf16.mxu1 %v6297_v40  ;;  %v8442_v40 = vld [vmem:[%s11089_s1 + $0x1808] ss:$16 sps:$4 sm:$0xff]  }
 0x2c7   :  { %5305 = vmatpush1.bf16.msra.mxu0 %v8347_v41  ;;  %5838 = vmatpush1.bf16.msra.mxu1 %v8350_v42  ;;  %v8447_v41 = vld [vmem:[%s11089_s1 + $0x1824] ss:$16 sps:$4 sm:$0xff]   ;;  %v8445_v42 = vld [vmem:[%s11089_s1 + $0x1820] ss:$16 sps:$4 sm:$0xff]  }
 0x2c8   :  { %5306 = vmatprep.subr.bf16.mxu0 %v8355_v43  ;;  %5839 = vmatprep.subr.bf16.mxu1 %v8358_v44  ;;  %v8448_v43 = vld [vmem:[%s11089_s1 + $0x1828] ss:$16 sps:$4 sm:$0xff]   ;;  %v8453_v44 = vld [vmem:[%s11089_s1 + $0x1844] ss:$16 sps:$4 sm:$0xff]  }
 0x2cb   :  { %5307 = vmatpush1.bf16.msra.mxu0 %v8353_v45  ;;  %5840 = vmatpush1.bf16.msra.mxu1 %v8356_v46  ;;  %v8456_v45 = vld [vmem:[%s11089_s1 + $0x184c] ss:$16 sps:$4 sm:$0xff]   ;;  %v8496_v46 = vmov 0  }
 0x2cc   :  { %5308 = vmatprep.subr.bf16.mxu0 %v8361_v47  ;;  %5841 = vmatprep.subr.bf16.mxu1 %v8364_v48  ;;  %v8451_v47 = vld [vmem:[%s11089_s1 + $0x1840] ss:$16 sps:$4 sm:$0xff]   ;;  %v8454_v48 = vld [vmem:[%s11089_s1 + $0x1848] ss:$16 sps:$4 sm:$0xff]  }
 0x2cf   :  { %5309 = vmatpush1.bf16.msra.mxu0 %v8359_v49  ;;  %5842 = vmatpush1.bf16.msra.mxu1 %v8362_v50  ;;  %v8459_v49 = vld [vmem:[%s11089_s1 + $0x1864] ss:$16 sps:$4 sm:$0xff]   ;;  %v8462_v50 = vld [vmem:[%s11089_s1 + $0x186c] ss:$16 sps:$4 sm:$0xff]  }
 0x2d0   :  { %5310 = vmatprep.subr.bf16.mxu0 %v8367_v51  ;;  %5843 = vmatprep.subr.bf16.mxu1 %v8370_v52  ;;  %v8457_v51 = vld [vmem:[%s11089_s1 + $0x1860] ss:$16 sps:$4 sm:$0xff]   ;;  %v8460_v52 = vld [vmem:[%s11089_s1 + $0x1868] ss:$16 sps:$4 sm:$0xff]  }
 0x2d3   :  { %5311 = vmatpush1.bf16.msra.mxu0 %v8365_v53  ;;  %5844 = vmatpush1.bf16.msra.mxu1 %v8368_v54  ;;  %v8464_v53 = vld [vmem:[%s11091_s3 + $0x40] sm:$0xff]  }
 0x2d4   :  { %5312 = vmatprep.subr.bf16.mxu0 %v8373_v55  ;;  %5845 = vmatprep.subr.bf16.mxu1 %v8376_v56  ;;  %v8465_v54 = vld [vmem:[%s11091_s3 + $0xc0] sm:$0xff]  }
 0x2d5   :  { %v8463_v55 = vld [vmem:[%s11090_s0 + $0x60] ss:$0 sps:$4 sm:$0xff]  }
 0x2d6   :  { %v8466_v56 = vld [vmem:[%s11091_s3] sm:$0xff]  }
 0x2d7   :  { %5313 = vmatpush1.bf16.msra.mxu0 %v8371_v57  ;;  %5846 = vmatpush1.bf16.msra.mxu1 %v8374_v58  ;;  %v8467_v57 = vld [vmem:[%s11091_s3 + $0x80] sm:$0xff]   ;;  %v8468_v58 = vld [vmem:[%s11091_s3 + $0x48] sm:$0xff]  }
 0x2d8   :  { %5314 = vmatprep.subr.bf16.mxu0 %v8379_v59  ;;  %5847 = vmatprep.subr.bf16.mxu1 %v8382_v60  ;;  %v8469_v59 = vld [vmem:[%s11091_s3 + $0xc8] sm:$0xff]  }
 0x2d9   :  { %v8470_v60 = vld [vmem:[%s11091_s3 + $0x8] sm:$0xff]  }
 0x2db   :  { %5315 = vmatpush1.bf16.msra.mxu0 %v8377_v61  ;;  %5848 = vmatpush1.bf16.msra.mxu1 %v8380_v62  ;;  %v8471_v61 = vld [vmem:[%s11091_s3 + $0x88] sm:$0xff]   ;;  %v8472_v62 = vld [vmem:[%s11091_s3 + $0x50] sm:$0xff]  }
 0x2dc   :  { %5316 = vmatprep.subr.bf16.mxu0 %v8385_v63  ;;  %5849 = vmatprep.subr.bf16.mxu1 %v8388_v0  ;;  %v8473_v63 = vld [vmem:[%s11091_s3 + $0xd0] sm:$0xff]  }
 0x2dd   :  { %v8474_v0 = vld [vmem:[%s11091_s3 + $0x10] sm:$0xff]  }
 0x2df   :  { %5317 = vmatpush1.bf16.msra.mxu0 %v8383_v1  ;;  %5850 = vmatpush1.bf16.msra.mxu1 %v8386_v2  ;;  %v8475_v1 = vld [vmem:[%s11091_s3 + $0x90] sm:$0xff]   ;;  %v8476_v2 = vld [vmem:[%s11091_s3 + $0x58] sm:$0xff]  }
 0x2e0   :  { %5318 = vmatprep.subr.bf16.mxu0 %v8391_v3  ;;  %5851 = vmatprep.subr.bf16.mxu1 %v8394_v4  ;;  %v8477_v3 = vld [vmem:[%s11091_s3 + $0xd8] sm:$0xff]  }
 0x2e1   :  { %v8478_v4 = vld [vmem:[%s11091_s3 + $0x18] sm:$0xff]  }
 0x2e3   :  { %5319 = vmatpush1.bf16.msra.mxu0 %v8389_v5  ;;  %5852 = vmatpush1.bf16.msra.mxu1 %v8392_v6  ;;  %v8479_v5 = vld [vmem:[%s11091_s3 + $0x98] sm:$0xff]   ;;  %v8480_v6 = vld [vmem:[%s11091_s3 + $0x60] sm:$0xff]  }
 0x2e4   :  { %5320 = vmatprep.subr.bf16.mxu0 %v8397_v7  ;;  %5853 = vmatprep.subr.bf16.mxu1 %v8400_v8  ;;  %v8481_v7 = vld [vmem:[%s11091_s3 + $0xe0] sm:$0xff]  }
 0x2e5   :  { %v8482_v8 = vld [vmem:[%s11091_s3 + $0x20] sm:$0xff]  }
 0x2e7   :  { %5321 = vmatpush1.bf16.msra.mxu0 %v8395_v9  ;;  %5854 = vmatpush1.bf16.msra.mxu1 %v8398_v10  ;;  %v8483_v9 = vld [vmem:[%s11091_s3 + $0xa0] sm:$0xff]   ;;  %v8484_v10 = vld [vmem:[%s11091_s3 + $0x68] sm:$0xff]  }
 0x2e8   :  { %5322 = vmatprep.subr.bf16.mxu0 %v8403_v12  ;;  %5855 = vmatprep.subr.bf16.mxu1 %v8406_v13  ;;  %v8485_v12 = vld [vmem:[%s11091_s3 + $0xe8] sm:$0xff]  }
 0x2e9   :  { %v8486_v13 = vld [vmem:[%s11091_s3 + $0x28] sm:$0xff]  }
 0x2eb   :  { %5323 = vmatpush1.bf16.msra.mxu0 %v8401_v15  ;;  %5856 = vmatpush1.bf16.msra.mxu1 %v8404_v11  ;;  %v8487_v15 = vld [vmem:[%s11091_s3 + $0xa8] sm:$0xff]   ;;  %v8488_v11 = vld [vmem:[%s11091_s3 + $0x70] sm:$0xff]  }
 0x2ec   :  { %5324 = vmatprep.subr.bf16.mxu0 %v8409_v17  ;;  %5857 = vmatprep.subr.bf16.mxu1 %v8412_v14  ;;  %v8489_v17 = vld [vmem:[%s11091_s3 + $0xf0] sm:$0xff]  }
 0x2ed   :  { %v8490_v14 = vld [vmem:[%s11091_s3 + $0x30] sm:$0xff]  }
 0x2ef   :  { %5325 = vmatpush1.bf16.msra.mxu0 %v8407_v19  ;;  %5858 = vmatpush1.bf16.msra.mxu1 %v8410_v20  ;;  %v8491_v19 = vld [vmem:[%s11091_s3 + $0xb0] sm:$0xff]   ;;  %v8492_v20 = vld [vmem:[%s11091_s3 + $0x78] sm:$0xff]  }
 0x2f0   :  { %5326 = vmatprep.subr.bf16.mxu0 %v8415_v16  ;;  %5859 = vmatprep.subr.bf16.mxu1 %v8418_v22  ;;  %v8493_v16 = vld [vmem:[%s11091_s3 + $0xf8] sm:$0xff]  }
 0x2f1   :  { %v8494_v22 = vld [vmem:[%s11091_s3 + $0x38] sm:$0xff]  }
 0x2f3   :  { %5327 = vmatpush1.bf16.msra.mxu0 %v8413_v23  ;;  %5860 = vmatpush1.bf16.msra.mxu1 %v8416_v18  ;;  %v8495_v23 = vld [vmem:[%s11091_s3 + $0xb8] sm:$0xff]   ;;  %v820_v18 = vlaneseq }
 0x2f4   :  { %5328 = vmatprep.subr.bf16.mxu0 %v8421_v25  ;;  %5861 = vmatprep.subr.bf16.mxu1 %v8424_v26 }
 0x2f5   :  { %v821_v25 = vshrl.u32 %v820_v18, 7 }
 0x2f7   :  { %5329 = vmatpush1.bf16.msra.mxu0 %v8419_v27  ;;  %5862 = vmatpush1.bf16.msra.mxu1 %v8422_v28  ;;  %v822_v26 = vsub.s32 0, %v821_v25  ;;  %v830_v27 = vsub.s32 2, %v821_v25  ;;  %v818_v28 = vld [vmem:[%s11092_s2] sm:$0xf] }
 0x2f8   :  { %5330 = vmatprep.subr.bf16.mxu0 %v8427_v29  ;;  %5863 = vmatprep.subr.bf16.mxu1 %v8430_v24  ;;  %v826_v29 = vsub.s32 1, %v821_v25  ;;  %v834_v24 = vsub.s32 3, %v821_v25 }
 0x2fb   :  { %5331 = vmatpush1.bf16.msra.mxu0 %v8425_v31  ;;  %5864 = vmatpush1.bf16.msra.mxu1 %v8428_v32  ;;  %v823_v31 = vrot.slane %v818_v28, %v822_v26  ;;  %v831_v32 = vrot.slane %v818_v28, %v830_v27 }
 0x2fc   :  { %5332 = vmatprep.subr.bf16.mxu0 %v8433_v21  ;;  %5865 = vmatprep.subr.bf16.mxu1 %v8436_v34  ;;  %v827_v21 = vrot.slane %v818_v28, %v826_v29  ;;  %v835_v34 = vrot.slane %v818_v28, %v834_v24 }
 0x2ff   :  { %5333 = vmatpush1.bf16.msra.mxu0 %v8431_v35  ;;  %5866 = vmatpush1.bf16.msra.mxu1 %v8434_v30 }
 0x300   :  { %5343 = vmatprep.subr.bf16.mxu0 %v8441_v37  ;;  %5876 = vmatprep.subr.bf16.mxu1 %v8444_v38 }
 0x302   :  { %5335 = vmatmul.mubr.bf16.vlgmr.msra.gmra.mrb[0].mxu0 %v6296_v33  ;;  %5868 = vmatmul.mubr.bf16.vlgmr.msra.gmra.mrb[0].mxu1 %v6296_v33 }
 0x303   :  { %5344 = vmatpush1.bf16.msra.mxu0 %v8439_v39  ;;  %5877 = vmatpush1.bf16.msra.mxu1 %v8442_v40 }
 0x304   :  { %5345 = vmatprep.subr.bf16.mxu0 %v8447_v41  ;;  %5878 = vmatprep.subr.bf16.mxu1 %v8450_v36 }
 0x305   :  { %5375 = vmatprep.mubr.bf16.mxu0 %v8496_v46  ;;  %5908 = vmatprep.mubr.bf16.mxu1 %v8496_v46 }
 0x307   :  { %5346 = vmatpush1.bf16.msra.mxu0 %v8445_v42  ;;  %5879 = vmatpush1.bf16.msra.mxu1 %v8448_v43 }
 0x308   :  { %5347 = vmatprep.subr.bf16.mxu0 %v8453_v44  ;;  %5880 = vmatprep.subr.bf16.mxu1 %v8456_v45 }
 0x30b   :  { %5348 = vmatpush1.bf16.msra.mxu0 %v8451_v47  ;;  %5881 = vmatpush1.bf16.msra.mxu1 %v8454_v48 }
 0x30c   :  { %5349 = vmatprep.subr.bf16.mxu0 %v8459_v49  ;;  %5882 = vmatprep.subr.bf16.mxu1 %v8462_v50 }
 0x30f   :  { %5350 = vmatpush1.bf16.msra.mxu0 %v8457_v51  ;;  %5883 = vmatpush1.bf16.msra.mxu1 %v8460_v52 }
 0x310   :  { %7118 = vmatprep.subr.bf16.mxu0 %v8464_v53  ;;  %7140 = vmatprep.subr.bf16.mxu1 %v8465_v54 }
 0x312   :  { %7083 = vmatmul.mubr.msk.bf16.vlgmr.msra.gmra.mrb[0].mxu0 %vm4847_vm0, %v8463_v55  ;;  %7084 = vmatmul.mubr.msk.bf16.vlgmr.msra.gmra.mrb[0].mxu1 %vm4847_vm0, %v8463_v55  ;;  %v7085_v55 = vld [vmem:[%s11093_s4] ss:$0 sm:$0xff] }
 0x313   :  { %7119 = vmatpush3.bf16.msra.mxu0 %v8466_v56  ;;  %7141 = vmatpush3.bf16.msra.mxu1 %v8467_v57 }
 0x314   :  { %7120 = vmatprep.subr.bf16.mxu0 %v8468_v58  ;;  %7142 = vmatprep.subr.bf16.mxu1 %v8469_v59 }
 0x317   :  { %7121 = vmatpush3.bf16.msra.mxu0 %v8470_v60  ;;  %7143 = vmatpush3.bf16.msra.mxu1 %v8471_v61 }
 0x318   :  { %7122 = vmatprep.subr.bf16.mxu0 %v8472_v62  ;;  %7144 = vmatprep.subr.bf16.mxu1 %v8473_v63 }
 0x31b   :  { %7123 = vmatpush3.bf16.msra.mxu0 %v8474_v0  ;;  %7145 = vmatpush3.bf16.msra.mxu1 %v8475_v1 }
 0x31c   :  { %7124 = vmatprep.subr.bf16.mxu0 %v8476_v2  ;;  %7146 = vmatprep.subr.bf16.mxu1 %v8477_v3 }
 0x31f   :  { %7125 = vmatpush3.bf16.msra.mxu0 %v8478_v4  ;;  %7147 = vmatpush3.bf16.msra.mxu1 %v8479_v5 }
 0x320   :  { %7126 = vmatprep.subr.bf16.mxu0 %v8480_v6  ;;  %7148 = vmatprep.subr.bf16.mxu1 %v8481_v7 }
 0x323   :  { %7127 = vmatpush3.bf16.msra.mxu0 %v8482_v8  ;;  %7149 = vmatpush3.bf16.msra.mxu1 %v8483_v9 }
 0x324   :  { %7128 = vmatprep.subr.bf16.mxu0 %v8484_v10  ;;  %7150 = vmatprep.subr.bf16.mxu1 %v8485_v12 }
 0x327   :  { %7129 = vmatpush3.bf16.msra.mxu0 %v8486_v13  ;;  %7151 = vmatpush3.bf16.msra.mxu1 %v8487_v15 }
 0x328   :  { %7130 = vmatprep.subr.bf16.mxu0 %v8488_v11  ;;  %7152 = vmatprep.subr.bf16.mxu1 %v8489_v17 }
 0x32b   :  { %7131 = vmatpush3.bf16.msra.mxu0 %v8490_v14  ;;  %7153 = vmatpush3.bf16.msra.mxu1 %v8491_v19 }
 0x32c   :  { %7132 = vmatprep.subr.bf16.mxu0 %v8492_v20  ;;  %7154 = vmatprep.subr.bf16.mxu1 %v8493_v16 }
 0x32f   :  { %7133 = vmatpush3.bf16.msra.mxu0 %v8494_v22  ;;  %7155 = vmatpush3.bf16.msra.mxu1 %v8495_v23 }
 0x3e5   :  { %v5377_v35 = vpop.f32.mrb[0].mxu0  ;;  %v5910_v30 = vpop.f32.mrb[0].mxu1 }
 0x3e6   :  { %v7162_v37 = vadd.f32 %v5377_v35, %v823_v31  ;;  %v7164_v38 = vadd.f32 %v5910_v30, %v831_v32  ;;  %v5379_v33 = vpop.f32.mrb[1].mxu0  ;;  %v5912_v39 = vpop.f32.mrb[1].mxu1 }
 0x3e7   :  { %v7163_v40 = vadd.f32 %v5379_v33, %v827_v21  ;;  %v7165_v41 = vadd.f32 %v5912_v39, %v835_v34  ;;  %v5381_v36 = vpop.f32.mrb[2].mxu0  ;;  %v5914_v42 = vpop.f32.mrb[2].mxu1 }
 0x3e8   :  { %v5917_v43 = vmax.f32 %v7162_v37, 0.0  ;;  %v5919_v44 = vmax.f32 %v7164_v38, 0.0  ;;  %v5382_v45 = vpop.f32.mrb[3].mxu0  ;;  %v5915_v46 = vpop.f32.mrb[3].mxu1 }
 0x3e9   :  { %v5918_v47 = vmax.f32 %v7163_v40, 0.0  ;;  %v5920_v48 = vmax.f32 %v7165_v41, 0.0 }
 0x3ea   :  { %v5921_v51 = vpack.c.bf16 %v5917_v43, %v5917_v43  ;;  %v5923_v52 = vpack.c.bf16 %v5919_v44, %v5919_v44 }
 0x3eb   :  { %v5922_v49 = vpack.c.bf16 %v5918_v47, %v5918_v47  ;;  %v5924_v50 = vpack.c.bf16 %v5920_v48, %v5920_v48 }
 0x3ed   :  { %6220 = vmatprep.mubr.bf16.mxu0 %v5922_v49  ;;  %6260 = vmatprep.mubr.bf16.mxu1 %v5924_v50 }
 0x3ee   :  { %6221 = vmatmul.mubr.bf16.vlgmr.msra.gmra.mrb[4].mxu0 %v5921_v51  ;;  %6261 = vmatmul.mubr.bf16.vlgmr.msra.gmra.mrb[4].mxu1 %v5923_v52 }
 0x4c1   :  { %v7134_v53 = vpop.f32.mrb[4].mxu0  ;;  %v7156_v54 = vpop.f32.mrb[4].mxu1 }
 0x4c2   :  { %v7135_v56 = vpop.f32.mrb[5].mxu0  ;;  %v7157_v57 = vpop.f32.mrb[5].mxu1 }
 0x4c3   :  { %v7136_v58 = vadd.f32 %v7135_v56, %v7134_v53  ;;  %v7158_v59 = vadd.f32 %v7157_v57, %v7156_v54  ;;  %v7137_v60 = vpop.f32.mrb[6].mxu0  ;;  %v7159_v61 = vpop.f32.mrb[6].mxu1 }
 0x4c4   :  { %v7138_v62 = vpop.f32.mrb[7].mxu0  ;;  %v7160_v63 = vpop.f32.mrb[7].mxu1 }
 0x4c5   :  { %v6223_v0 = vadd.f32 %v7136_v58, %v7085_v55 }
 0x4c7   :  { %v6263_v1 = vadd.f32 %v7158_v59, %v6223_v0 }
 0x4c9   :  { %6269 = vst.msk [vmem:[%s11094_s5] sm:$0xff] %vm6268_vm1, %v6263_v1 }

</bundles_post_ra>
